<compile_context>
chip_gen: v6e
topology: v6e:2x2x1
jax: 0.10.0
libtpu: 0.0.40
codegen_flags: <defaults>
</compile_context>

<pallas_src>
import jax
import jax.numpy as jnp
from jax.experimental import pallas as pl
from jax.experimental.pallas import tpu as pltpu

# ----- small synthetic config (lane-dense feature dims) -----
B = 2            # batch
S = 8            # sequence length == max_len
D = 128          # synthetic BERT hidden size (stands in for 768); lane-dense
NH = 4           # attention heads
DH = D // NH     # per-head dim
FF = 256         # FFN intermediate size (stands in for 3072)
H = 128          # DualAttentiveBert hidden_size (stands in for 256)
NUM_LAYERS = 2
VOCAB = 128
LN_EPS = 1e-12
BS = B * S
LOGIT_PAD = 128  # merge output padded to a full lane width (real logits are cols 0..1)


def _ln(x, g, b):
    mu = jnp.mean(x, axis=-1, keepdims=True)
    var = jnp.mean((x - mu) ** 2, axis=-1, keepdims=True)
    return (x - mu) * jax.lax.rsqrt(var + LN_EPS) * g + b


def _bf16(x):
    return x.astype(jnp.bfloat16)


# ---------------- fused Pallas kernel (whole forward) ----------------

def _fused_forward_kernel(*refs):
    it = iter(refs)
    emb_ref, am_ref, defs_ref, lab_ref, eg_ref, eb_ref = (next(it) for _ in range(6))
    layer_refs = [tuple(next(it) for _ in range(12)) for _ in range(NUM_LAYERS)]
    w1_ref, b1_ref, we_ref, be_ref, wm_ref, bm_ref = (next(it) for _ in range(6))
    logits_ref, loss_ref = next(it), next(it)

    am = am_ref[...]                                            # (B, S) additive mask
    amb_list = [am[b:b + 1, :] for b in range(B)]               # hoisted out of layer loop
    scale = 1.0 / (DH ** 0.5)

    # --- BERT embeddings LayerNorm ---
    h = _ln(emb_ref[...], eg_ref[...], eb_ref[...])             # (B*S, D) f32, VMEM-resident

    # --- post-LN transformer encoder layers ---
    for (wqkv, bqkv, wo, bo, g1, e1, wi, bi, w2, b2, g2, e2) in layer_refs:
        qkv = jnp.dot(_bf16(h), wqkv[...],
                      preferred_element_type=jnp.float32) + bqkv[...]      # (B*S, 3D)
        q, k, v = qkv[:, :D], qkv[:, D:2 * D], qkv[:, 2 * D:]
        ctx_rows = []
        for b in range(B):                                   # static unroll, B=2
            r0, r1 = b * S, (b + 1) * S
            qb, kb, vb = q[r0:r1], k[r0:r1], v[r0:r1]
            amb = amb_list[b]                                # (1, S) broadcast over queries
            heads = []
            for hd in range(NH):                             # static unroll over heads
                c0, c1 = hd * DH, (hd + 1) * DH
                sc = jax.lax.dot_general(
                    qb[:, c0:c1], kb[:, c0:c1], (((1,), (1,)), ((), ())),
                    preferred_element_type=jnp.float32) * scale + amb      # (S, S)
                sc = sc - jnp.max(sc, axis=-1, keepdims=True)
                p = jnp.exp(sc)
                p = p * pl.reciprocal(jnp.sum(p, axis=-1, keepdims=True), approx=True)
                heads.append(jnp.dot(p, vb[:, c0:c1],
                                     preferred_element_type=jnp.float32))  # (S, DH)
            ctx_rows.append(jnp.concatenate(heads, axis=-1))               # (S, D)
        ctx = jnp.concatenate(ctx_rows, axis=0)                            # (B*S, D)
        attn = jnp.dot(_bf16(ctx), wo[...],
                       preferred_element_type=jnp.float32) + bo[...]       # fused out-proj
        h1 = _ln(h + attn, g1[...], e1[...])
        ff = jnp.dot(_bf16(h1), wi[...],
                     preferred_element_type=jnp.float32) + bi[...]
        ff = jax.nn.gelu(ff, approximate=True)  # TODO(synk): bert-base uses exact erf-GELU
        ff = jnp.dot(_bf16(ff), w2[...],
                     preferred_element_type=jnp.float32) + b2[...]
        h = _ln(h1 + ff, g2[...], e2[...])

    # --- DualAttentiveBert head: layer1 / encode / merge ---
    src1 = jnp.dot(_bf16(h), w1_ref[...],
                   preferred_element_type=jnp.float32) + b1_ref[...]       # (B*S, H)
    # encode = Dropout(ReLU(Linear(defs))); Dropout is identity in eval.
    src2 = jnp.maximum(
        jnp.dot(defs_ref[...], we_ref[...],
                preferred_element_type=jnp.float32) + be_ref[...], 0.0)    # (B, H)
    src2b = jnp.concatenate(
        [jnp.broadcast_to(src2[b:b + 1, :], (S, H)) for b in range(B)], axis=0)
    multi = src1 + src2b                                                   # == src2.unsqueeze(1)
    # merge weight is zero-padded to LOGIT_PAD lanes -> full-lane (unmasked) store.
    logits = jnp.dot(_bf16(multi), wm_ref[...],
                     preferred_element_type=jnp.float32) + bm_ref[...]     # (B*S, LOGIT_PAD)
    logits_ref[...] = logits

    # --- CrossEntropyLoss(logits.view(-1,2), labels.view(-1)), mean reduction ---
    y = lab_ref[...]                                                       # (B*S, 1) float labels
    l0, l1 = logits[:, 0:1], logits[:, 1:2]
    m = jnp.maximum(l0, l1)
    lse = m + jnp.log(jnp.exp(l0 - m) + jnp.exp(l1 - m))
    picked = y * l1 + (1.0 - y) * l0
    loss_ref[...] = jnp.mean(lse - picked, keepdims=True)                  # (1, 1)


# ---------------- pallas_call wrapper ----------------

def _vspec(shape):
    n = len(shape)
    return pl.BlockSpec(shape, lambda i, _n=n: (0,) * _n)


def fused_forward(emb2d, add_mask, defs_f, labels_f, params):
    flat_w = [params["emb_ln_g"], params["emb_ln_b"]]
    for lp in params["layers"]:
        flat_w.extend(lp)
    flat_w.extend(params["head"])
    inputs = [emb2d, add_mask, defs_f, labels_f] + flat_w
    logits2d, loss = pl.pallas_call(
        _fused_forward_kernel,
        out_shape=(jax.ShapeDtypeStruct((BS, LOGIT_PAD), jnp.float32),
                   jax.ShapeDtypeStruct((1, 1), jnp.float32)),
        grid=(1,),
        in_specs=[_vspec(a.shape) for a in inputs],
        out_specs=(_vspec((BS, LOGIT_PAD)), _vspec((1, 1))),
        compiler_params=pltpu.CompilerParams(dimension_semantics=("arbitrary",)),
    )(*inputs)
    return logits2d, loss


# ---------------- parameters (deterministic synthetic init) ----------------

def init_params(key):
    ks = iter(jax.random.split(key, 64))

    def nrm(shape, dtype=jnp.float32):
        return (jax.random.normal(next(ks), shape, jnp.float32) * 0.02).astype(dtype)

    params = {
        "word_emb": nrm((VOCAB, D)),
        "pos_emb": nrm((S, D)),
        "type_emb": nrm((2, D)),
        "emb_ln_g": jnp.ones((1, D), jnp.float32),
        "emb_ln_b": jnp.zeros((1, D), jnp.float32),
    }
    layers = []
    for _ in range(NUM_LAYERS):
        layers.append((
            nrm((D, 3 * D), jnp.bfloat16), jnp.zeros((1, 3 * D), jnp.float32),  # fused Wqkv, bqkv
            nrm((D, D), jnp.bfloat16), jnp.zeros((1, D), jnp.float32),          # Wo, bo
            jnp.ones((1, D), jnp.float32), jnp.zeros((1, D), jnp.float32),      # LN1 gamma/beta
            nrm((D, FF), jnp.bfloat16), jnp.zeros((1, FF), jnp.float32),        # FFN in
            nrm((FF, D), jnp.bfloat16), jnp.zeros((1, D), jnp.float32),         # FFN out
            jnp.ones((1, D), jnp.float32), jnp.zeros((1, D), jnp.float32),      # LN2 gamma/beta
        ))
    params["layers"] = layers

    # merge: Linear(hidden -> 2); weight zero-padded to LOGIT_PAD lanes for lane-dense output.
    wm_real = nrm((H, 2), jnp.float32)
    wm_pad = jnp.zeros((H, LOGIT_PAD), jnp.float32).at[:, :2].set(wm_real).astype(jnp.bfloat16)
    params["head"] = (
        nrm((D, H), jnp.bfloat16), jnp.zeros((1, H), jnp.float32),   # layer1: Linear(768->hidden)
        nrm((S, H), jnp.float32), jnp.zeros((1, H), jnp.float32),    # encode[0]: Linear(max_len->hidden)
        wm_pad, jnp.zeros((1, LOGIT_PAD), jnp.float32),              # merge: Linear(hidden->2), padded
    )
    return params


# ---------------- forward pass ----------------

def dual_attentive_bert(params, ids, mask, defs, labels=None):
    # BERT embeddings: token-id gather stays as plain-JAX glue; everything else is in-kernel.
    emb = (params["word_emb"][ids]
           + params["pos_emb"][None, :, :]
           + params["type_emb"][0][None, None, :])
    emb2d = emb.reshape(BS, D)
    add_mask = (1.0 - mask.astype(jnp.float32)) * -10000.0            # (B, S) additive mask
    if labels is None:
        labels_f = jnp.zeros((BS, 1), jnp.float32)
    else:
        labels_f = labels.astype(jnp.float32).reshape(BS, 1)
    logits2d, loss_arr = fused_forward(emb2d, add_mask, defs.astype(jnp.float32),
                                       labels_f, params)
    logits = logits2d[:, :2].reshape(B, S, 2)                          # drop lane padding
    loss = loss_arr[0, 0] if labels is not None else None
    return loss, logits


if __name__ == "__main__":
    key = jax.random.PRNGKey(0)
    kp, ki, kd, kl = jax.random.split(key, 4)
    params = init_params(kp)

    ids = jax.random.randint(ki, (B, S), 0, VOCAB, dtype=jnp.int32)
    mask = jnp.ones((B, S), jnp.int32).at[1, S - 2:].set(0)
    defs = jax.random.normal(kd, (B, S), jnp.float32)          # max_len == S
    labels = jax.random.randint(kl, (B, S), 0, 2, dtype=jnp.int32)

    fwd = jax.jit(dual_attentive_bert)
    loss, logits = fwd(params, ids, mask, defs, labels)
    jax.block_until_ready((loss, logits))

    assert logits.shape == (B, S, 2) and logits.dtype == jnp.float32
    assert loss.shape == () and bool(jnp.isfinite(loss))
    print("KERNEL_OK")
</pallas_src>

<mosaic_0001>
module attributes {stable_mosaic.version = 11 : i64} {
  func.func @_fused_forward_kernel(%arg0: i32, %arg1: memref<16x128xf32, #tpu.memory_space<vmem>>, %arg2: memref<2x8xf32, #tpu.memory_space<vmem>>, %arg3: memref<2x8xf32, #tpu.memory_space<vmem>>, %arg4: memref<16x1xf32, #tpu.memory_space<vmem>>, %arg5: memref<1x128xf32, #tpu.memory_space<vmem>>, %arg6: memref<1x128xf32, #tpu.memory_space<vmem>>, %arg7: memref<128x384xbf16, #tpu.memory_space<vmem>>, %arg8: memref<1x384xf32, #tpu.memory_space<vmem>>, %arg9: memref<128x128xbf16, #tpu.memory_space<vmem>>, %arg10: memref<1x128xf32, #tpu.memory_space<vmem>>, %arg11: memref<1x128xf32, #tpu.memory_space<vmem>>, %arg12: memref<1x128xf32, #tpu.memory_space<vmem>>, %arg13: memref<128x256xbf16, #tpu.memory_space<vmem>>, %arg14: memref<1x256xf32, #tpu.memory_space<vmem>>, %arg15: memref<256x128xbf16, #tpu.memory_space<vmem>>, %arg16: memref<1x128xf32, #tpu.memory_space<vmem>>, %arg17: memref<1x128xf32, #tpu.memory_space<vmem>>, %arg18: memref<1x128xf32, #tpu.memory_space<vmem>>, %arg19: memref<128x384xbf16, #tpu.memory_space<vmem>>, %arg20: memref<1x384xf32, #tpu.memory_space<vmem>>, %arg21: memref<128x128xbf16, #tpu.memory_space<vmem>>, %arg22: memref<1x128xf32, #tpu.memory_space<vmem>>, %arg23: memref<1x128xf32, #tpu.memory_space<vmem>>, %arg24: memref<1x128xf32, #tpu.memory_space<vmem>>, %arg25: memref<128x256xbf16, #tpu.memory_space<vmem>>, %arg26: memref<1x256xf32, #tpu.memory_space<vmem>>, %arg27: memref<256x128xbf16, #tpu.memory_space<vmem>>, %arg28: memref<1x128xf32, #tpu.memory_space<vmem>>, %arg29: memref<1x128xf32, #tpu.memory_space<vmem>>, %arg30: memref<1x128xf32, #tpu.memory_space<vmem>>, %arg31: memref<128x128xbf16, #tpu.memory_space<vmem>>, %arg32: memref<1x128xf32, #tpu.memory_space<vmem>>, %arg33: memref<8x128xf32, #tpu.memory_space<vmem>>, %arg34: memref<1x128xf32, #tpu.memory_space<vmem>>, %arg35: memref<128x128xbf16, #tpu.memory_space<vmem>>, %arg36: memref<1x128xf32, #tpu.memory_space<vmem>>, %arg37: memref<16x128xf32, #tpu.memory_space<vmem>>, %arg38: memref<1x1xf32, #tpu.memory_space<vmem>>) attributes {dimension_semantics = [#tpu.dimension_semantics<arbitrary>], iteration_bounds = array<i64: 1>, scalar_prefetch = 0 : i64, scratch_operands = 0 : i64, tpu.core_type = #tpu.core_type<tc>, window_params = [{pipeline_mode = #tpu.pipeline_mode<synchronous>, transform_indices = @transform_0, window_bounds = array<i64: 16, 128>}, {pipeline_mode = #tpu.pipeline_mode<synchronous>, transform_indices = @transform_1, window_bounds = array<i64: 2, 8>}, {pipeline_mode = #tpu.pipeline_mode<synchronous>, transform_indices = @transform_2, window_bounds = array<i64: 2, 8>}, {pipeline_mode = #tpu.pipeline_mode<synchronous>, transform_indices = @transform_3, window_bounds = array<i64: 16, 1>}, {pipeline_mode = #tpu.pipeline_mode<synchronous>, transform_indices = @transform_4, window_bounds = array<i64: 1, 128>}, {pipeline_mode = #tpu.pipeline_mode<synchronous>, transform_indices = @transform_5, window_bounds = array<i64: 1, 128>}, {pipeline_mode = #tpu.pipeline_mode<synchronous>, transform_indices = @transform_6, window_bounds = array<i64: 128, 384>}, {pipeline_mode = #tpu.pipeline_mode<synchronous>, transform_indices = @transform_7, window_bounds = array<i64: 1, 384>}, {pipeline_mode = #tpu.pipeline_mode<synchronous>, transform_indices = @transform_8, window_bounds = array<i64: 128, 128>}, {pipeline_mode = #tpu.pipeline_mode<synchronous>, transform_indices = @transform_9, window_bounds = array<i64: 1, 128>}, {pipeline_mode = #tpu.pipeline_mode<synchronous>, transform_indices = @transform_10, window_bounds = array<i64: 1, 128>}, {pipeline_mode = #tpu.pipeline_mode<synchronous>, transform_indices = @transform_11, window_bounds = array<i64: 1, 128>}, {pipeline_mode = #tpu.pipeline_mode<synchronous>, transform_indices = @transform_12, window_bounds = array<i64: 128, 256>}, {pipeline_mode = #tpu.pipeline_mode<synchronous>, transform_indices = @transform_13, window_bounds = array<i64: 1, 256>}, {pipeline_mode = #tpu.pipeline_mode<synchronous>, transform_indices = @transform_14, window_bounds = array<i64: 256, 128>}, {pipeline_mode = #tpu.pipeline_mode<synchronous>, transform_indices = @transform_15, window_bounds = array<i64: 1, 128>}, {pipeline_mode = #tpu.pipeline_mode<synchronous>, transform_indices = @transform_16, window_bounds = array<i64: 1, 128>}, {pipeline_mode = #tpu.pipeline_mode<synchronous>, transform_indices = @transform_17, window_bounds = array<i64: 1, 128>}, {pipeline_mode = #tpu.pipeline_mode<synchronous>, transform_indices = @transform_18, window_bounds = array<i64: 128, 384>}, {pipeline_mode = #tpu.pipeline_mode<synchronous>, transform_indices = @transform_19, window_bounds = array<i64: 1, 384>}, {pipeline_mode = #tpu.pipeline_mode<synchronous>, transform_indices = @transform_20, window_bounds = array<i64: 128, 128>}, {pipeline_mode = #tpu.pipeline_mode<synchronous>, transform_indices = @transform_21, window_bounds = array<i64: 1, 128>}, {pipeline_mode = #tpu.pipeline_mode<synchronous>, transform_indices = @transform_22, window_bounds = array<i64: 1, 128>}, {pipeline_mode = #tpu.pipeline_mode<synchronous>, transform_indices = @transform_23, window_bounds = array<i64: 1, 128>}, {pipeline_mode = #tpu.pipeline_mode<synchronous>, transform_indices = @transform_24, window_bounds = array<i64: 128, 256>}, {pipeline_mode = #tpu.pipeline_mode<synchronous>, transform_indices = @transform_25, window_bounds = array<i64: 1, 256>}, {pipeline_mode = #tpu.pipeline_mode<synchronous>, transform_indices = @transform_26, window_bounds = array<i64: 256, 128>}, {pipeline_mode = #tpu.pipeline_mode<synchronous>, transform_indices = @transform_27, window_bounds = array<i64: 1, 128>}, {pipeline_mode = #tpu.pipeline_mode<synchronous>, transform_indices = @transform_28, window_bounds = array<i64: 1, 128>}, {pipeline_mode = #tpu.pipeline_mode<synchronous>, transform_indices = @transform_29, window_bounds = array<i64: 1, 128>}, {pipeline_mode = #tpu.pipeline_mode<synchronous>, transform_indices = @transform_30, window_bounds = array<i64: 128, 128>}, {pipeline_mode = #tpu.pipeline_mode<synchronous>, transform_indices = @transform_31, window_bounds = array<i64: 1, 128>}, {pipeline_mode = #tpu.pipeline_mode<synchronous>, transform_indices = @transform_32, window_bounds = array<i64: 8, 128>}, {pipeline_mode = #tpu.pipeline_mode<synchronous>, transform_indices = @transform_33, window_bounds = array<i64: 1, 128>}, {pipeline_mode = #tpu.pipeline_mode<synchronous>, transform_indices = @transform_34, window_bounds = array<i64: 128, 128>}, {pipeline_mode = #tpu.pipeline_mode<synchronous>, transform_indices = @transform_35, window_bounds = array<i64: 1, 128>}, {pipeline_mode = #tpu.pipeline_mode<synchronous>, transform_indices = @transform_36, window_bounds = array<i64: 16, 128>}, {pipeline_mode = #tpu.pipeline_mode<synchronous>, transform_indices = @transform_37, window_bounds = array<i64: 1, 1>}]} {
    %c0 = arith.constant 0 : index
    %c0_0 = arith.constant 0 : index
    %0 = vector.load %arg2[%c0, %c0_0] : memref<2x8xf32, #tpu.memory_space<vmem>>, vector<2x8xf32>
    %1 = vector.extract_strided_slice %0 {offsets = [0, 0], sizes = [1, 8], strides = [1, 1]} : vector<2x8xf32> to vector<1x8xf32>
    %2 = vector.extract_strided_slice %0 {offsets = [1, 0], sizes = [1, 8], strides = [1, 1]} : vector<2x8xf32> to vector<1x8xf32>
    %c0_1 = arith.constant 0 : index
    %c0_2 = arith.constant 0 : index
    %3 = vector.load %arg1[%c0_1, %c0_2] : memref<16x128xf32, #tpu.memory_space<vmem>>, vector<16x128xf32>
    %c0_3 = arith.constant 0 : index
    %c0_4 = arith.constant 0 : index
    %4 = vector.load %arg5[%c0_3, %c0_4] : memref<1x128xf32, #tpu.memory_space<vmem>>, vector<1x128xf32>
    %c0_5 = arith.constant 0 : index
    %c0_6 = arith.constant 0 : index
    %5 = vector.load %arg6[%c0_5, %c0_6] : memref<1x128xf32, #tpu.memory_space<vmem>>, vector<1x128xf32>
    %cst = arith.constant dense<0.000000e+00> : vector<16xf32>
    %6 = vector.multi_reduction <add>, %3, %cst [1] : vector<16x128xf32> to vector<16xf32>
    %7 = vector.shape_cast %6 : vector<16xf32> to vector<16x1xf32>
    %cst_7 = arith.constant 1.280000e+02 : f32
    %8 = vector.broadcast %cst_7 : f32 to vector<16x1xf32>
    %9 = arith.divf %7, %8 : vector<16x1xf32>
    %10 = vector.broadcast %9 : vector<16x1xf32> to vector<16x128xf32>
    %11 = arith.subf %3, %10 : vector<16x128xf32>
    %12 = arith.mulf %11, %11 : vector<16x128xf32>
    %cst_8 = arith.constant dense<0.000000e+00> : vector<16xf32>
    %13 = vector.multi_reduction <add>, %12, %cst_8 [1] : vector<16x128xf32> to vector<16xf32>
    %14 = vector.shape_cast %13 : vector<16xf32> to vector<16x1xf32>
    %cst_9 = arith.constant 1.280000e+02 : f32
    %15 = vector.broadcast %cst_9 : f32 to vector<16x1xf32>
    %16 = arith.divf %14, %15 : vector<16x1xf32>
    %17 = vector.broadcast %9 : vector<16x1xf32> to vector<16x128xf32>
    %18 = arith.subf %3, %17 : vector<16x128xf32>
    %cst_10 = arith.constant 9.99999996E-13 : f32
    %19 = vector.broadcast %cst_10 : f32 to vector<16x1xf32>
    %20 = arith.addf %16, %19 : vector<16x1xf32>
    %21 = math.rsqrt %20 : vector<16x1xf32>
    %22 = vector.broadcast %21 : vector<16x1xf32> to vector<16x128xf32>
    %23 = arith.mulf %18, %22 : vector<16x128xf32>
    %24 = vector.broadcast %4 : vector<1x128xf32> to vector<16x128xf32>
    %25 = arith.mulf %23, %24 : vector<16x128xf32>
    %26 = vector.broadcast %5 : vector<1x128xf32> to vector<16x128xf32>
    %27 = arith.addf %25, %26 : vector<16x128xf32>
    %28 = arith.truncf %27 : vector<16x128xf32> to vector<16x128xbf16>
    %c0_11 = arith.constant 0 : index
    %c0_12 = arith.constant 0 : index
    %29 = vector.load %arg7[%c0_11, %c0_12] : memref<128x384xbf16, #tpu.memory_space<vmem>>, vector<128x384xbf16>
    %cst_13 = arith.constant dense<0.000000e+00> : vector<16x384xf32>
    %30 = tpu.matmul %28, %29, %cst_13 {dimension_numbers = #tpu.dot_dimension_numbers<[1], [0], [0], [1], [0, 0, 1, 1], [], []>} : vector<16x128xbf16>, vector<128x384xbf16>, vector<16x384xf32> -> vector<16x384xf32>
    %c0_14 = arith.constant 0 : index
    %c0_15 = arith.constant 0 : index
    %31 = vector.load %arg8[%c0_14, %c0_15] : memref<1x384xf32, #tpu.memory_space<vmem>>, vector<1x384xf32>
    %32 = vector.broadcast %31 : vector<1x384xf32> to vector<16x384xf32>
    %33 = arith.addf %30, %32 : vector<16x384xf32>
    %34 = vector.extract_strided_slice %33 {offsets = [0, 0], sizes = [16, 128], strides = [1, 1]} : vector<16x384xf32> to vector<16x128xf32>
    %35 = vector.extract_strided_slice %33 {offsets = [0, 128], sizes = [16, 128], strides = [1, 1]} : vector<16x384xf32> to vector<16x128xf32>
    %36 = vector.extract_strided_slice %33 {offsets = [0, 256], sizes = [16, 128], strides = [1, 1]} : vector<16x384xf32> to vector<16x128xf32>
    %37 = vector.extract_strided_slice %34 {offsets = [0, 0], sizes = [8, 128], strides = [1, 1]} : vector<16x128xf32> to vector<8x128xf32>
    %38 = vector.extract_strided_slice %35 {offsets = [0, 0], sizes = [8, 128], strides = [1, 1]} : vector<16x128xf32> to vector<8x128xf32>
    %39 = vector.extract_strided_slice %36 {offsets = [0, 0], sizes = [8, 128], strides = [1, 1]} : vector<16x128xf32> to vector<8x128xf32>
    %40 = vector.extract_strided_slice %37 {offsets = [0, 0], sizes = [8, 32], strides = [1, 1]} : vector<8x128xf32> to vector<8x32xf32>
    %41 = vector.extract_strided_slice %38 {offsets = [0, 0], sizes = [8, 32], strides = [1, 1]} : vector<8x128xf32> to vector<8x32xf32>
    %cst_16 = arith.constant dense<0.000000e+00> : vector<8x8xf32>
    %42 = tpu.matmul %40, %41, %cst_16 {dimension_numbers = #tpu.dot_dimension_numbers<[1], [1], [0], [0], [0, 0, 1, 0], [], []>} : vector<8x32xf32>, vector<8x32xf32>, vector<8x8xf32> -> vector<8x8xf32>
    %cst_17 = arith.constant 0.176776692 : f32
    %43 = vector.broadcast %cst_17 : f32 to vector<8x8xf32>
    %44 = arith.mulf %42, %43 : vector<8x8xf32>
    %45 = vector.broadcast %1 : vector<1x8xf32> to vector<8x8xf32>
    %46 = arith.addf %44, %45 : vector<8x8xf32>
    %cst_18 = arith.constant dense<0xFF800000> : vector<8xf32>
    %47 = vector.multi_reduction <maximumf>, %46, %cst_18 [1] : vector<8x8xf32> to vector<8xf32>
    %48 = vector.shape_cast %47 : vector<8xf32> to vector<8x1xf32>
    %49 = vector.broadcast %48 : vector<8x1xf32> to vector<8x8xf32>
    %50 = arith.subf %46, %49 : vector<8x8xf32>
    %51 = math.exp %50 : vector<8x8xf32>
    %cst_19 = arith.constant dense<0.000000e+00> : vector<8xf32>
    %52 = vector.multi_reduction <add>, %51, %cst_19 [1] : vector<8x8xf32> to vector<8xf32>
    %53 = vector.shape_cast %52 : vector<8xf32> to vector<8x1xf32>
    %54 = tpu.reciprocal %53 {approx = true} : vector<8x1xf32> -> vector<8x1xf32>
    %55 = vector.broadcast %54 : vector<8x1xf32> to vector<8x8xf32>
    %56 = arith.mulf %51, %55 : vector<8x8xf32>
    %57 = vector.extract_strided_slice %39 {offsets = [0, 0], sizes = [8, 32], strides = [1, 1]} : vector<8x128xf32> to vector<8x32xf32>
    %cst_20 = arith.constant dense<0.000000e+00> : vector<8x32xf32>
    %58 = tpu.matmul %56, %57, %cst_20 {dimension_numbers = #tpu.dot_dimension_numbers<[1], [0], [0], [1], [0, 0, 1, 1], [], []>} : vector<8x8xf32>, vector<8x32xf32>, vector<8x32xf32> -> vector<8x32xf32>
    %59 = vector.extract_strided_slice %37 {offsets = [0, 32], sizes = [8, 32], strides = [1, 1]} : vector<8x128xf32> to vector<8x32xf32>
    %60 = vector.extract_strided_slice %38 {offsets = [0, 32], sizes = [8, 32], strides = [1, 1]} : vector<8x128xf32> to vector<8x32xf32>
    %cst_21 = arith.constant dense<0.000000e+00> : vector<8x8xf32>
    %61 = tpu.matmul %59, %60, %cst_21 {dimension_numbers = #tpu.dot_dimension_numbers<[1], [1], [0], [0], [0, 0, 1, 0], [], []>} : vector<8x32xf32>, vector<8x32xf32>, vector<8x8xf32> -> vector<8x8xf32>
    %cst_22 = arith.constant 0.176776692 : f32
    %62 = vector.broadcast %cst_22 : f32 to vector<8x8xf32>
    %63 = arith.mulf %61, %62 : vector<8x8xf32>
    %64 = vector.broadcast %1 : vector<1x8xf32> to vector<8x8xf32>
    %65 = arith.addf %63, %64 : vector<8x8xf32>
    %cst_23 = arith.constant dense<0xFF800000> : vector<8xf32>
    %66 = vector.multi_reduction <maximumf>, %65, %cst_23 [1] : vector<8x8xf32> to vector<8xf32>
    %67 = vector.shape_cast %66 : vector<8xf32> to vector<8x1xf32>
    %68 = vector.broadcast %67 : vector<8x1xf32> to vector<8x8xf32>
    %69 = arith.subf %65, %68 : vector<8x8xf32>
    %70 = math.exp %69 : vector<8x8xf32>
    %cst_24 = arith.constant dense<0.000000e+00> : vector<8xf32>
    %71 = vector.multi_reduction <add>, %70, %cst_24 [1] : vector<8x8xf32> to vector<8xf32>
    %72 = vector.shape_cast %71 : vector<8xf32> to vector<8x1xf32>
    %73 = tpu.reciprocal %72 {approx = true} : vector<8x1xf32> -> vector<8x1xf32>
    %74 = vector.broadcast %73 : vector<8x1xf32> to vector<8x8xf32>
    %75 = arith.mulf %70, %74 : vector<8x8xf32>
    %76 = vector.extract_strided_slice %39 {offsets = [0, 32], sizes = [8, 32], strides = [1, 1]} : vector<8x128xf32> to vector<8x32xf32>
    %cst_25 = arith.constant dense<0.000000e+00> : vector<8x32xf32>
    %77 = tpu.matmul %75, %76, %cst_25 {dimension_numbers = #tpu.dot_dimension_numbers<[1], [0], [0], [1], [0, 0, 1, 1], [], []>} : vector<8x8xf32>, vector<8x32xf32>, vector<8x32xf32> -> vector<8x32xf32>
    %78 = vector.extract_strided_slice %37 {offsets = [0, 64], sizes = [8, 32], strides = [1, 1]} : vector<8x128xf32> to vector<8x32xf32>
    %79 = vector.extract_strided_slice %38 {offsets = [0, 64], sizes = [8, 32], strides = [1, 1]} : vector<8x128xf32> to vector<8x32xf32>
    %cst_26 = arith.constant dense<0.000000e+00> : vector<8x8xf32>
    %80 = tpu.matmul %78, %79, %cst_26 {dimension_numbers = #tpu.dot_dimension_numbers<[1], [1], [0], [0], [0, 0, 1, 0], [], []>} : vector<8x32xf32>, vector<8x32xf32>, vector<8x8xf32> -> vector<8x8xf32>
    %cst_27 = arith.constant 0.176776692 : f32
    %81 = vector.broadcast %cst_27 : f32 to vector<8x8xf32>
    %82 = arith.mulf %80, %81 : vector<8x8xf32>
    %83 = vector.broadcast %1 : vector<1x8xf32> to vector<8x8xf32>
    %84 = arith.addf %82, %83 : vector<8x8xf32>
    %cst_28 = arith.constant dense<0xFF800000> : vector<8xf32>
    %85 = vector.multi_reduction <maximumf>, %84, %cst_28 [1] : vector<8x8xf32> to vector<8xf32>
    %86 = vector.shape_cast %85 : vector<8xf32> to vector<8x1xf32>
    %87 = vector.broadcast %86 : vector<8x1xf32> to vector<8x8xf32>
    %88 = arith.subf %84, %87 : vector<8x8xf32>
    %89 = math.exp %88 : vector<8x8xf32>
    %cst_29 = arith.constant dense<0.000000e+00> : vector<8xf32>
    %90 = vector.multi_reduction <add>, %89, %cst_29 [1] : vector<8x8xf32> to vector<8xf32>
    %91 = vector.shape_cast %90 : vector<8xf32> to vector<8x1xf32>
    %92 = tpu.reciprocal %91 {approx = true} : vector<8x1xf32> -> vector<8x1xf32>
    %93 = vector.broadcast %92 : vector<8x1xf32> to vector<8x8xf32>
    %94 = arith.mulf %89, %93 : vector<8x8xf32>
    %95 = vector.extract_strided_slice %39 {offsets = [0, 64], sizes = [8, 32], strides = [1, 1]} : vector<8x128xf32> to vector<8x32xf32>
    %cst_30 = arith.constant dense<0.000000e+00> : vector<8x32xf32>
    %96 = tpu.matmul %94, %95, %cst_30 {dimension_numbers = #tpu.dot_dimension_numbers<[1], [0], [0], [1], [0, 0, 1, 1], [], []>} : vector<8x8xf32>, vector<8x32xf32>, vector<8x32xf32> -> vector<8x32xf32>
    %97 = vector.extract_strided_slice %37 {offsets = [0, 96], sizes = [8, 32], strides = [1, 1]} : vector<8x128xf32> to vector<8x32xf32>
    %98 = vector.extract_strided_slice %38 {offsets = [0, 96], sizes = [8, 32], strides = [1, 1]} : vector<8x128xf32> to vector<8x32xf32>
    %cst_31 = arith.constant dense<0.000000e+00> : vector<8x8xf32>
    %99 = tpu.matmul %97, %98, %cst_31 {dimension_numbers = #tpu.dot_dimension_numbers<[1], [1], [0], [0], [0, 0, 1, 0], [], []>} : vector<8x32xf32>, vector<8x32xf32>, vector<8x8xf32> -> vector<8x8xf32>
    %cst_32 = arith.constant 0.176776692 : f32
    %100 = vector.broadcast %cst_32 : f32 to vector<8x8xf32>
    %101 = arith.mulf %99, %100 : vector<8x8xf32>
    %102 = vector.broadcast %1 : vector<1x8xf32> to vector<8x8xf32>
    %103 = arith.addf %101, %102 : vector<8x8xf32>
    %cst_33 = arith.constant dense<0xFF800000> : vector<8xf32>
    %104 = vector.multi_reduction <maximumf>, %103, %cst_33 [1] : vector<8x8xf32> to vector<8xf32>
    %105 = vector.shape_cast %104 : vector<8xf32> to vector<8x1xf32>
    %106 = vector.broadcast %105 : vector<8x1xf32> to vector<8x8xf32>
    %107 = arith.subf %103, %106 : vector<8x8xf32>
    %108 = math.exp %107 : vector<8x8xf32>
    %cst_34 = arith.constant dense<0.000000e+00> : vector<8xf32>
    %109 = vector.multi_reduction <add>, %108, %cst_34 [1] : vector<8x8xf32> to vector<8xf32>
    %110 = vector.shape_cast %109 : vector<8xf32> to vector<8x1xf32>
    %111 = tpu.reciprocal %110 {approx = true} : vector<8x1xf32> -> vector<8x1xf32>
    %112 = vector.broadcast %111 : vector<8x1xf32> to vector<8x8xf32>
    %113 = arith.mulf %108, %112 : vector<8x8xf32>
    %114 = vector.extract_strided_slice %39 {offsets = [0, 96], sizes = [8, 32], strides = [1, 1]} : vector<8x128xf32> to vector<8x32xf32>
    %cst_35 = arith.constant dense<0.000000e+00> : vector<8x32xf32>
    %115 = tpu.matmul %113, %114, %cst_35 {dimension_numbers = #tpu.dot_dimension_numbers<[1], [0], [0], [1], [0, 0, 1, 1], [], []>} : vector<8x8xf32>, vector<8x32xf32>, vector<8x32xf32> -> vector<8x32xf32>
    %116 = tpu.concatenate %58, %77, %96, %115 in 1 : vector<8x32xf32>, vector<8x32xf32>, vector<8x32xf32>, vector<8x32xf32> -> vector<8x128xf32>
    %117 = vector.extract_strided_slice %34 {offsets = [8, 0], sizes = [8, 128], strides = [1, 1]} : vector<16x128xf32> to vector<8x128xf32>
    %118 = vector.extract_strided_slice %35 {offsets = [8, 0], sizes = [8, 128], strides = [1, 1]} : vector<16x128xf32> to vector<8x128xf32>
    %119 = vector.extract_strided_slice %36 {offsets = [8, 0], sizes = [8, 128], strides = [1, 1]} : vector<16x128xf32> to vector<8x128xf32>
    %120 = vector.extract_strided_slice %117 {offsets = [0, 0], sizes = [8, 32], strides = [1, 1]} : vector<8x128xf32> to vector<8x32xf32>
    %121 = vector.extract_strided_slice %118 {offsets = [0, 0], sizes = [8, 32], strides = [1, 1]} : vector<8x128xf32> to vector<8x32xf32>
    %cst_36 = arith.constant dense<0.000000e+00> : vector<8x8xf32>
    %122 = tpu.matmul %120, %121, %cst_36 {dimension_numbers = #tpu.dot_dimension_numbers<[1], [1], [0], [0], [0, 0, 1, 0], [], []>} : vector<8x32xf32>, vector<8x32xf32>, vector<8x8xf32> -> vector<8x8xf32>
    %cst_37 = arith.constant 0.176776692 : f32
    %123 = vector.broadcast %cst_37 : f32 to vector<8x8xf32>
    %124 = arith.mulf %122, %123 : vector<8x8xf32>
    %125 = vector.broadcast %2 : vector<1x8xf32> to vector<8x8xf32>
    %126 = arith.addf %124, %125 : vector<8x8xf32>
    %cst_38 = arith.constant dense<0xFF800000> : vector<8xf32>
    %127 = vector.multi_reduction <maximumf>, %126, %cst_38 [1] : vector<8x8xf32> to vector<8xf32>
    %128 = vector.shape_cast %127 : vector<8xf32> to vector<8x1xf32>
    %129 = vector.broadcast %128 : vector<8x1xf32> to vector<8x8xf32>
    %130 = arith.subf %126, %129 : vector<8x8xf32>
    %131 = math.exp %130 : vector<8x8xf32>
    %cst_39 = arith.constant dense<0.000000e+00> : vector<8xf32>
    %132 = vector.multi_reduction <add>, %131, %cst_39 [1] : vector<8x8xf32> to vector<8xf32>
    %133 = vector.shape_cast %132 : vector<8xf32> to vector<8x1xf32>
    %134 = tpu.reciprocal %133 {approx = true} : vector<8x1xf32> -> vector<8x1xf32>
    %135 = vector.broadcast %134 : vector<8x1xf32> to vector<8x8xf32>
    %136 = arith.mulf %131, %135 : vector<8x8xf32>
    %137 = vector.extract_strided_slice %119 {offsets = [0, 0], sizes = [8, 32], strides = [1, 1]} : vector<8x128xf32> to vector<8x32xf32>
    %cst_40 = arith.constant dense<0.000000e+00> : vector<8x32xf32>
    %138 = tpu.matmul %136, %137, %cst_40 {dimension_numbers = #tpu.dot_dimension_numbers<[1], [0], [0], [1], [0, 0, 1, 1], [], []>} : vector<8x8xf32>, vector<8x32xf32>, vector<8x32xf32> -> vector<8x32xf32>
    %139 = vector.extract_strided_slice %117 {offsets = [0, 32], sizes = [8, 32], strides = [1, 1]} : vector<8x128xf32> to vector<8x32xf32>
    %140 = vector.extract_strided_slice %118 {offsets = [0, 32], sizes = [8, 32], strides = [1, 1]} : vector<8x128xf32> to vector<8x32xf32>
    %cst_41 = arith.constant dense<0.000000e+00> : vector<8x8xf32>
    %141 = tpu.matmul %139, %140, %cst_41 {dimension_numbers = #tpu.dot_dimension_numbers<[1], [1], [0], [0], [0, 0, 1, 0], [], []>} : vector<8x32xf32>, vector<8x32xf32>, vector<8x8xf32> -> vector<8x8xf32>
    %cst_42 = arith.constant 0.176776692 : f32
    %142 = vector.broadcast %cst_42 : f32 to vector<8x8xf32>
    %143 = arith.mulf %141, %142 : vector<8x8xf32>
    %144 = vector.broadcast %2 : vector<1x8xf32> to vector<8x8xf32>
    %145 = arith.addf %143, %144 : vector<8x8xf32>
    %cst_43 = arith.constant dense<0xFF800000> : vector<8xf32>
    %146 = vector.multi_reduction <maximumf>, %145, %cst_43 [1] : vector<8x8xf32> to vector<8xf32>
    %147 = vector.shape_cast %146 : vector<8xf32> to vector<8x1xf32>
    %148 = vector.broadcast %147 : vector<8x1xf32> to vector<8x8xf32>
    %149 = arith.subf %145, %148 : vector<8x8xf32>
    %150 = math.exp %149 : vector<8x8xf32>
    %cst_44 = arith.constant dense<0.000000e+00> : vector<8xf32>
    %151 = vector.multi_reduction <add>, %150, %cst_44 [1] : vector<8x8xf32> to vector<8xf32>
    %152 = vector.shape_cast %151 : vector<8xf32> to vector<8x1xf32>
    %153 = tpu.reciprocal %152 {approx = true} : vector<8x1xf32> -> vector<8x1xf32>
    %154 = vector.broadcast %153 : vector<8x1xf32> to vector<8x8xf32>
    %155 = arith.mulf %150, %154 : vector<8x8xf32>
    %156 = vector.extract_strided_slice %119 {offsets = [0, 32], sizes = [8, 32], strides = [1, 1]} : vector<8x128xf32> to vector<8x32xf32>
    %cst_45 = arith.constant dense<0.000000e+00> : vector<8x32xf32>
    %157 = tpu.matmul %155, %156, %cst_45 {dimension_numbers = #tpu.dot_dimension_numbers<[1], [0], [0], [1], [0, 0, 1, 1], [], []>} : vector<8x8xf32>, vector<8x32xf32>, vector<8x32xf32> -> vector<8x32xf32>
    %158 = vector.extract_strided_slice %117 {offsets = [0, 64], sizes = [8, 32], strides = [1, 1]} : vector<8x128xf32> to vector<8x32xf32>
    %159 = vector.extract_strided_slice %118 {offsets = [0, 64], sizes = [8, 32], strides = [1, 1]} : vector<8x128xf32> to vector<8x32xf32>
    %cst_46 = arith.constant dense<0.000000e+00> : vector<8x8xf32>
    %160 = tpu.matmul %158, %159, %cst_46 {dimension_numbers = #tpu.dot_dimension_numbers<[1], [1], [0], [0], [0, 0, 1, 0], [], []>} : vector<8x32xf32>, vector<8x32xf32>, vector<8x8xf32> -> vector<8x8xf32>
    %cst_47 = arith.constant 0.176776692 : f32
    %161 = vector.broadcast %cst_47 : f32 to vector<8x8xf32>
    %162 = arith.mulf %160, %161 : vector<8x8xf32>
    %163 = vector.broadcast %2 : vector<1x8xf32> to vector<8x8xf32>
    %164 = arith.addf %162, %163 : vector<8x8xf32>
    %cst_48 = arith.constant dense<0xFF800000> : vector<8xf32>
    %165 = vector.multi_reduction <maximumf>, %164, %cst_48 [1] : vector<8x8xf32> to vector<8xf32>
    %166 = vector.shape_cast %165 : vector<8xf32> to vector<8x1xf32>
    %167 = vector.broadcast %166 : vector<8x1xf32> to vector<8x8xf32>
    %168 = arith.subf %164, %167 : vector<8x8xf32>
    %169 = math.exp %168 : vector<8x8xf32>
    %cst_49 = arith.constant dense<0.000000e+00> : vector<8xf32>
    %170 = vector.multi_reduction <add>, %169, %cst_49 [1] : vector<8x8xf32> to vector<8xf32>
    %171 = vector.shape_cast %170 : vector<8xf32> to vector<8x1xf32>
    %172 = tpu.reciprocal %171 {approx = true} : vector<8x1xf32> -> vector<8x1xf32>
    %173 = vector.broadcast %172 : vector<8x1xf32> to vector<8x8xf32>
    %174 = arith.mulf %169, %173 : vector<8x8xf32>
    %175 = vector.extract_strided_slice %119 {offsets = [0, 64], sizes = [8, 32], strides = [1, 1]} : vector<8x128xf32> to vector<8x32xf32>
    %cst_50 = arith.constant dense<0.000000e+00> : vector<8x32xf32>
    %176 = tpu.matmul %174, %175, %cst_50 {dimension_numbers = #tpu.dot_dimension_numbers<[1], [0], [0], [1], [0, 0, 1, 1], [], []>} : vector<8x8xf32>, vector<8x32xf32>, vector<8x32xf32> -> vector<8x32xf32>
    %177 = vector.extract_strided_slice %117 {offsets = [0, 96], sizes = [8, 32], strides = [1, 1]} : vector<8x128xf32> to vector<8x32xf32>
    %178 = vector.extract_strided_slice %118 {offsets = [0, 96], sizes = [8, 32], strides = [1, 1]} : vector<8x128xf32> to vector<8x32xf32>
    %cst_51 = arith.constant dense<0.000000e+00> : vector<8x8xf32>
    %179 = tpu.matmul %177, %178, %cst_51 {dimension_numbers = #tpu.dot_dimension_numbers<[1], [1], [0], [0], [0, 0, 1, 0], [], []>} : vector<8x32xf32>, vector<8x32xf32>, vector<8x8xf32> -> vector<8x8xf32>
    %cst_52 = arith.constant 0.176776692 : f32
    %180 = vector.broadcast %cst_52 : f32 to vector<8x8xf32>
    %181 = arith.mulf %179, %180 : vector<8x8xf32>
    %182 = vector.broadcast %2 : vector<1x8xf32> to vector<8x8xf32>
    %183 = arith.addf %181, %182 : vector<8x8xf32>
    %cst_53 = arith.constant dense<0xFF800000> : vector<8xf32>
    %184 = vector.multi_reduction <maximumf>, %183, %cst_53 [1] : vector<8x8xf32> to vector<8xf32>
    %185 = vector.shape_cast %184 : vector<8xf32> to vector<8x1xf32>
    %186 = vector.broadcast %185 : vector<8x1xf32> to vector<8x8xf32>
    %187 = arith.subf %183, %186 : vector<8x8xf32>
    %188 = math.exp %187 : vector<8x8xf32>
    %cst_54 = arith.constant dense<0.000000e+00> : vector<8xf32>
    %189 = vector.multi_reduction <add>, %188, %cst_54 [1] : vector<8x8xf32> to vector<8xf32>
    %190 = vector.shape_cast %189 : vector<8xf32> to vector<8x1xf32>
    %191 = tpu.reciprocal %190 {approx = true} : vector<8x1xf32> -> vector<8x1xf32>
    %192 = vector.broadcast %191 : vector<8x1xf32> to vector<8x8xf32>
    %193 = arith.mulf %188, %192 : vector<8x8xf32>
    %194 = vector.extract_strided_slice %119 {offsets = [0, 96], sizes = [8, 32], strides = [1, 1]} : vector<8x128xf32> to vector<8x32xf32>
    %cst_55 = arith.constant dense<0.000000e+00> : vector<8x32xf32>
    %195 = tpu.matmul %193, %194, %cst_55 {dimension_numbers = #tpu.dot_dimension_numbers<[1], [0], [0], [1], [0, 0, 1, 1], [], []>} : vector<8x8xf32>, vector<8x32xf32>, vector<8x32xf32> -> vector<8x32xf32>
    %196 = tpu.concatenate %138, %157, %176, %195 in 1 : vector<8x32xf32>, vector<8x32xf32>, vector<8x32xf32>, vector<8x32xf32> -> vector<8x128xf32>
    %197 = tpu.concatenate %116, %196 in 0 : vector<8x128xf32>, vector<8x128xf32> -> vector<16x128xf32>
    %198 = arith.truncf %197 : vector<16x128xf32> to vector<16x128xbf16>
    %c0_56 = arith.constant 0 : index
    %c0_57 = arith.constant 0 : index
    %199 = vector.load %arg9[%c0_56, %c0_57] : memref<128x128xbf16, #tpu.memory_space<vmem>>, vector<128x128xbf16>
    %cst_58 = arith.constant dense<0.000000e+00> : vector<16x128xf32>
    %200 = tpu.matmul %198, %199, %cst_58 {dimension_numbers = #tpu.dot_dimension_numbers<[1], [0], [0], [1], [0, 0, 1, 1], [], []>} : vector<16x128xbf16>, vector<128x128xbf16>, vector<16x128xf32> -> vector<16x128xf32>
    %c0_59 = arith.constant 0 : index
    %c0_60 = arith.constant 0 : index
    %201 = vector.load %arg10[%c0_59, %c0_60] : memref<1x128xf32, #tpu.memory_space<vmem>>, vector<1x128xf32>
    %202 = vector.broadcast %201 : vector<1x128xf32> to vector<16x128xf32>
    %203 = arith.addf %200, %202 : vector<16x128xf32>
    %204 = arith.addf %27, %203 : vector<16x128xf32>
    %c0_61 = arith.constant 0 : index
    %c0_62 = arith.constant 0 : index
    %205 = vector.load %arg11[%c0_61, %c0_62] : memref<1x128xf32, #tpu.memory_space<vmem>>, vector<1x128xf32>
    %c0_63 = arith.constant 0 : index
    %c0_64 = arith.constant 0 : index
    %206 = vector.load %arg12[%c0_63, %c0_64] : memref<1x128xf32, #tpu.memory_space<vmem>>, vector<1x128xf32>
    %cst_65 = arith.constant dense<0.000000e+00> : vector<16xf32>
    %207 = vector.multi_reduction <add>, %204, %cst_65 [1] : vector<16x128xf32> to vector<16xf32>
    %208 = vector.shape_cast %207 : vector<16xf32> to vector<16x1xf32>
    %cst_66 = arith.constant 1.280000e+02 : f32
    %209 = vector.broadcast %cst_66 : f32 to vector<16x1xf32>
    %210 = arith.divf %208, %209 : vector<16x1xf32>
    %211 = vector.broadcast %210 : vector<16x1xf32> to vector<16x128xf32>
    %212 = arith.subf %204, %211 : vector<16x128xf32>
    %213 = arith.mulf %212, %212 : vector<16x128xf32>
    %cst_67 = arith.constant dense<0.000000e+00> : vector<16xf32>
    %214 = vector.multi_reduction <add>, %213, %cst_67 [1] : vector<16x128xf32> to vector<16xf32>
    %215 = vector.shape_cast %214 : vector<16xf32> to vector<16x1xf32>
    %cst_68 = arith.constant 1.280000e+02 : f32
    %216 = vector.broadcast %cst_68 : f32 to vector<16x1xf32>
    %217 = arith.divf %215, %216 : vector<16x1xf32>
    %218 = vector.broadcast %210 : vector<16x1xf32> to vector<16x128xf32>
    %219 = arith.subf %204, %218 : vector<16x128xf32>
    %cst_69 = arith.constant 9.99999996E-13 : f32
    %220 = vector.broadcast %cst_69 : f32 to vector<16x1xf32>
    %221 = arith.addf %217, %220 : vector<16x1xf32>
    %222 = math.rsqrt %221 : vector<16x1xf32>
    %223 = vector.broadcast %222 : vector<16x1xf32> to vector<16x128xf32>
    %224 = arith.mulf %219, %223 : vector<16x128xf32>
    %225 = vector.broadcast %205 : vector<1x128xf32> to vector<16x128xf32>
    %226 = arith.mulf %224, %225 : vector<16x128xf32>
    %227 = vector.broadcast %206 : vector<1x128xf32> to vector<16x128xf32>
    %228 = arith.addf %226, %227 : vector<16x128xf32>
    %229 = arith.truncf %228 : vector<16x128xf32> to vector<16x128xbf16>
    %c0_70 = arith.constant 0 : index
    %c0_71 = arith.constant 0 : index
    %230 = vector.load %arg13[%c0_70, %c0_71] : memref<128x256xbf16, #tpu.memory_space<vmem>>, vector<128x256xbf16>
    %cst_72 = arith.constant dense<0.000000e+00> : vector<16x256xf32>
    %231 = tpu.matmul %229, %230, %cst_72 {dimension_numbers = #tpu.dot_dimension_numbers<[1], [0], [0], [1], [0, 0, 1, 1], [], []>} : vector<16x128xbf16>, vector<128x256xbf16>, vector<16x256xf32> -> vector<16x256xf32>
    %c0_73 = arith.constant 0 : index
    %c0_74 = arith.constant 0 : index
    %232 = vector.load %arg14[%c0_73, %c0_74] : memref<1x256xf32, #tpu.memory_space<vmem>>, vector<1x256xf32>
    %233 = vector.broadcast %232 : vector<1x256xf32> to vector<16x256xf32>
    %234 = arith.addf %231, %233 : vector<16x256xf32>
    %235 = arith.mulf %234, %234 : vector<16x256xf32>
    %236 = arith.mulf %234, %235 : vector<16x256xf32>
    %cst_75 = arith.constant 4.471500e-02 : f32
    %237 = vector.broadcast %cst_75 : f32 to vector<16x256xf32>
    %238 = arith.mulf %237, %236 : vector<16x256xf32>
    %239 = arith.addf %234, %238 : vector<16x256xf32>
    %cst_76 = arith.constant 0.797884583 : f32
    %240 = vector.broadcast %cst_76 : f32 to vector<16x256xf32>
    %241 = arith.mulf %240, %239 : vector<16x256xf32>
    %242 = math.tanh %241 : vector<16x256xf32>
    %cst_77 = arith.constant 1.000000e+00 : f32
    %243 = vector.broadcast %cst_77 : f32 to vector<16x256xf32>
    %244 = arith.addf %243, %242 : vector<16x256xf32>
    %cst_78 = arith.constant 5.000000e-01 : f32
    %245 = vector.broadcast %cst_78 : f32 to vector<16x256xf32>
    %246 = arith.mulf %245, %244 : vector<16x256xf32>
    %247 = arith.mulf %234, %246 : vector<16x256xf32>
    %248 = arith.truncf %247 : vector<16x256xf32> to vector<16x256xbf16>
    %c0_79 = arith.constant 0 : index
    %c0_80 = arith.constant 0 : index
    %249 = vector.load %arg15[%c0_79, %c0_80] : memref<256x128xbf16, #tpu.memory_space<vmem>>, vector<256x128xbf16>
    %cst_81 = arith.constant dense<0.000000e+00> : vector<16x128xf32>
    %250 = tpu.matmul %248, %249, %cst_81 {dimension_numbers = #tpu.dot_dimension_numbers<[1], [0], [0], [1], [0, 0, 1, 1], [], []>} : vector<16x256xbf16>, vector<256x128xbf16>, vector<16x128xf32> -> vector<16x128xf32>
    %c0_82 = arith.constant 0 : index
    %c0_83 = arith.constant 0 : index
    %251 = vector.load %arg16[%c0_82, %c0_83] : memref<1x128xf32, #tpu.memory_space<vmem>>, vector<1x128xf32>
    %252 = vector.broadcast %251 : vector<1x128xf32> to vector<16x128xf32>
    %253 = arith.addf %250, %252 : vector<16x128xf32>
    %254 = arith.addf %228, %253 : vector<16x128xf32>
    %c0_84 = arith.constant 0 : index
    %c0_85 = arith.constant 0 : index
    %255 = vector.load %arg17[%c0_84, %c0_85] : memref<1x128xf32, #tpu.memory_space<vmem>>, vector<1x128xf32>
    %c0_86 = arith.constant 0 : index
    %c0_87 = arith.constant 0 : index
    %256 = vector.load %arg18[%c0_86, %c0_87] : memref<1x128xf32, #tpu.memory_space<vmem>>, vector<1x128xf32>
    %cst_88 = arith.constant dense<0.000000e+00> : vector<16xf32>
    %257 = vector.multi_reduction <add>, %254, %cst_88 [1] : vector<16x128xf32> to vector<16xf32>
    %258 = vector.shape_cast %257 : vector<16xf32> to vector<16x1xf32>
    %cst_89 = arith.constant 1.280000e+02 : f32
    %259 = vector.broadcast %cst_89 : f32 to vector<16x1xf32>
    %260 = arith.divf %258, %259 : vector<16x1xf32>
    %261 = vector.broadcast %260 : vector<16x1xf32> to vector<16x128xf32>
    %262 = arith.subf %254, %261 : vector<16x128xf32>
    %263 = arith.mulf %262, %262 : vector<16x128xf32>
    %cst_90 = arith.constant dense<0.000000e+00> : vector<16xf32>
    %264 = vector.multi_reduction <add>, %263, %cst_90 [1] : vector<16x128xf32> to vector<16xf32>
    %265 = vector.shape_cast %264 : vector<16xf32> to vector<16x1xf32>
    %cst_91 = arith.constant 1.280000e+02 : f32
    %266 = vector.broadcast %cst_91 : f32 to vector<16x1xf32>
    %267 = arith.divf %265, %266 : vector<16x1xf32>
    %268 = vector.broadcast %260 : vector<16x1xf32> to vector<16x128xf32>
    %269 = arith.subf %254, %268 : vector<16x128xf32>
    %cst_92 = arith.constant 9.99999996E-13 : f32
    %270 = vector.broadcast %cst_92 : f32 to vector<16x1xf32>
    %271 = arith.addf %267, %270 : vector<16x1xf32>
    %272 = math.rsqrt %271 : vector<16x1xf32>
    %273 = vector.broadcast %272 : vector<16x1xf32> to vector<16x128xf32>
    %274 = arith.mulf %269, %273 : vector<16x128xf32>
    %275 = vector.broadcast %255 : vector<1x128xf32> to vector<16x128xf32>
    %276 = arith.mulf %274, %275 : vector<16x128xf32>
    %277 = vector.broadcast %256 : vector<1x128xf32> to vector<16x128xf32>
    %278 = arith.addf %276, %277 : vector<16x128xf32>
    %279 = arith.truncf %278 : vector<16x128xf32> to vector<16x128xbf16>
    %c0_93 = arith.constant 0 : index
    %c0_94 = arith.constant 0 : index
    %280 = vector.load %arg19[%c0_93, %c0_94] : memref<128x384xbf16, #tpu.memory_space<vmem>>, vector<128x384xbf16>
    %cst_95 = arith.constant dense<0.000000e+00> : vector<16x384xf32>
    %281 = tpu.matmul %279, %280, %cst_95 {dimension_numbers = #tpu.dot_dimension_numbers<[1], [0], [0], [1], [0, 0, 1, 1], [], []>} : vector<16x128xbf16>, vector<128x384xbf16>, vector<16x384xf32> -> vector<16x384xf32>
    %c0_96 = arith.constant 0 : index
    %c0_97 = arith.constant 0 : index
    %282 = vector.load %arg20[%c0_96, %c0_97] : memref<1x384xf32, #tpu.memory_space<vmem>>, vector<1x384xf32>
    %283 = vector.broadcast %282 : vector<1x384xf32> to vector<16x384xf32>
    %284 = arith.addf %281, %283 : vector<16x384xf32>
    %285 = vector.extract_strided_slice %284 {offsets = [0, 0], sizes = [16, 128], strides = [1, 1]} : vector<16x384xf32> to vector<16x128xf32>
    %286 = vector.extract_strided_slice %284 {offsets = [0, 128], sizes = [16, 128], strides = [1, 1]} : vector<16x384xf32> to vector<16x128xf32>
    %287 = vector.extract_strided_slice %284 {offsets = [0, 256], sizes = [16, 128], strides = [1, 1]} : vector<16x384xf32> to vector<16x128xf32>
    %288 = vector.extract_strided_slice %285 {offsets = [0, 0], sizes = [8, 128], strides = [1, 1]} : vector<16x128xf32> to vector<8x128xf32>
    %289 = vector.extract_strided_slice %286 {offsets = [0, 0], sizes = [8, 128], strides = [1, 1]} : vector<16x128xf32> to vector<8x128xf32>
    %290 = vector.extract_strided_slice %287 {offsets = [0, 0], sizes = [8, 128], strides = [1, 1]} : vector<16x128xf32> to vector<8x128xf32>
    %291 = vector.extract_strided_slice %288 {offsets = [0, 0], sizes = [8, 32], strides = [1, 1]} : vector<8x128xf32> to vector<8x32xf32>
    %292 = vector.extract_strided_slice %289 {offsets = [0, 0], sizes = [8, 32], strides = [1, 1]} : vector<8x128xf32> to vector<8x32xf32>
    %cst_98 = arith.constant dense<0.000000e+00> : vector<8x8xf32>
    %293 = tpu.matmul %291, %292, %cst_98 {dimension_numbers = #tpu.dot_dimension_numbers<[1], [1], [0], [0], [0, 0, 1, 0], [], []>} : vector<8x32xf32>, vector<8x32xf32>, vector<8x8xf32> -> vector<8x8xf32>
    %cst_99 = arith.constant 0.176776692 : f32
    %294 = vector.broadcast %cst_99 : f32 to vector<8x8xf32>
    %295 = arith.mulf %293, %294 : vector<8x8xf32>
    %296 = vector.broadcast %1 : vector<1x8xf32> to vector<8x8xf32>
    %297 = arith.addf %295, %296 : vector<8x8xf32>
    %cst_100 = arith.constant dense<0xFF800000> : vector<8xf32>
    %298 = vector.multi_reduction <maximumf>, %297, %cst_100 [1] : vector<8x8xf32> to vector<8xf32>
    %299 = vector.shape_cast %298 : vector<8xf32> to vector<8x1xf32>
    %300 = vector.broadcast %299 : vector<8x1xf32> to vector<8x8xf32>
    %301 = arith.subf %297, %300 : vector<8x8xf32>
    %302 = math.exp %301 : vector<8x8xf32>
    %cst_101 = arith.constant dense<0.000000e+00> : vector<8xf32>
    %303 = vector.multi_reduction <add>, %302, %cst_101 [1] : vector<8x8xf32> to vector<8xf32>
    %304 = vector.shape_cast %303 : vector<8xf32> to vector<8x1xf32>
    %305 = tpu.reciprocal %304 {approx = true} : vector<8x1xf32> -> vector<8x1xf32>
    %306 = vector.broadcast %305 : vector<8x1xf32> to vector<8x8xf32>
    %307 = arith.mulf %302, %306 : vector<8x8xf32>
    %308 = vector.extract_strided_slice %290 {offsets = [0, 0], sizes = [8, 32], strides = [1, 1]} : vector<8x128xf32> to vector<8x32xf32>
    %cst_102 = arith.constant dense<0.000000e+00> : vector<8x32xf32>
    %309 = tpu.matmul %307, %308, %cst_102 {dimension_numbers = #tpu.dot_dimension_numbers<[1], [0], [0], [1], [0, 0, 1, 1], [], []>} : vector<8x8xf32>, vector<8x32xf32>, vector<8x32xf32> -> vector<8x32xf32>
    %310 = vector.extract_strided_slice %288 {offsets = [0, 32], sizes = [8, 32], strides = [1, 1]} : vector<8x128xf32> to vector<8x32xf32>
    %311 = vector.extract_strided_slice %289 {offsets = [0, 32], sizes = [8, 32], strides = [1, 1]} : vector<8x128xf32> to vector<8x32xf32>
    %cst_103 = arith.constant dense<0.000000e+00> : vector<8x8xf32>
    %312 = tpu.matmul %310, %311, %cst_103 {dimension_numbers = #tpu.dot_dimension_numbers<[1], [1], [0], [0], [0, 0, 1, 0], [], []>} : vector<8x32xf32>, vector<8x32xf32>, vector<8x8xf32> -> vector<8x8xf32>
    %cst_104 = arith.constant 0.176776692 : f32
    %313 = vector.broadcast %cst_104 : f32 to vector<8x8xf32>
    %314 = arith.mulf %312, %313 : vector<8x8xf32>
    %315 = vector.broadcast %1 : vector<1x8xf32> to vector<8x8xf32>
    %316 = arith.addf %314, %315 : vector<8x8xf32>
    %cst_105 = arith.constant dense<0xFF800000> : vector<8xf32>
    %317 = vector.multi_reduction <maximumf>, %316, %cst_105 [1] : vector<8x8xf32> to vector<8xf32>
    %318 = vector.shape_cast %317 : vector<8xf32> to vector<8x1xf32>
    %319 = vector.broadcast %318 : vector<8x1xf32> to vector<8x8xf32>
    %320 = arith.subf %316, %319 : vector<8x8xf32>
    %321 = math.exp %320 : vector<8x8xf32>
    %cst_106 = arith.constant dense<0.000000e+00> : vector<8xf32>
    %322 = vector.multi_reduction <add>, %321, %cst_106 [1] : vector<8x8xf32> to vector<8xf32>
    %323 = vector.shape_cast %322 : vector<8xf32> to vector<8x1xf32>
    %324 = tpu.reciprocal %323 {approx = true} : vector<8x1xf32> -> vector<8x1xf32>
    %325 = vector.broadcast %324 : vector<8x1xf32> to vector<8x8xf32>
    %326 = arith.mulf %321, %325 : vector<8x8xf32>
    %327 = vector.extract_strided_slice %290 {offsets = [0, 32], sizes = [8, 32], strides = [1, 1]} : vector<8x128xf32> to vector<8x32xf32>
    %cst_107 = arith.constant dense<0.000000e+00> : vector<8x32xf32>
    %328 = tpu.matmul %326, %327, %cst_107 {dimension_numbers = #tpu.dot_dimension_numbers<[1], [0], [0], [1], [0, 0, 1, 1], [], []>} : vector<8x8xf32>, vector<8x32xf32>, vector<8x32xf32> -> vector<8x32xf32>
    %329 = vector.extract_strided_slice %288 {offsets = [0, 64], sizes = [8, 32], strides = [1, 1]} : vector<8x128xf32> to vector<8x32xf32>
    %330 = vector.extract_strided_slice %289 {offsets = [0, 64], sizes = [8, 32], strides = [1, 1]} : vector<8x128xf32> to vector<8x32xf32>
    %cst_108 = arith.constant dense<0.000000e+00> : vector<8x8xf32>
    %331 = tpu.matmul %329, %330, %cst_108 {dimension_numbers = #tpu.dot_dimension_numbers<[1], [1], [0], [0], [0, 0, 1, 0], [], []>} : vector<8x32xf32>, vector<8x32xf32>, vector<8x8xf32> -> vector<8x8xf32>
    %cst_109 = arith.constant 0.176776692 : f32
    %332 = vector.broadcast %cst_109 : f32 to vector<8x8xf32>
    %333 = arith.mulf %331, %332 : vector<8x8xf32>
    %334 = vector.broadcast %1 : vector<1x8xf32> to vector<8x8xf32>
    %335 = arith.addf %333, %334 : vector<8x8xf32>
    %cst_110 = arith.constant dense<0xFF800000> : vector<8xf32>
    %336 = vector.multi_reduction <maximumf>, %335, %cst_110 [1] : vector<8x8xf32> to vector<8xf32>
    %337 = vector.shape_cast %336 : vector<8xf32> to vector<8x1xf32>
    %338 = vector.broadcast %337 : vector<8x1xf32> to vector<8x8xf32>
    %339 = arith.subf %335, %338 : vector<8x8xf32>
    %340 = math.exp %339 : vector<8x8xf32>
    %cst_111 = arith.constant dense<0.000000e+00> : vector<8xf32>
    %341 = vector.multi_reduction <add>, %340, %cst_111 [1] : vector<8x8xf32> to vector<8xf32>
    %342 = vector.shape_cast %341 : vector<8xf32> to vector<8x1xf32>
    %343 = tpu.reciprocal %342 {approx = true} : vector<8x1xf32> -> vector<8x1xf32>
    %344 = vector.broadcast %343 : vector<8x1xf32> to vector<8x8xf32>
    %345 = arith.mulf %340, %344 : vector<8x8xf32>
    %346 = vector.extract_strided_slice %290 {offsets = [0, 64], sizes = [8, 32], strides = [1, 1]} : vector<8x128xf32> to vector<8x32xf32>
    %cst_112 = arith.constant dense<0.000000e+00> : vector<8x32xf32>
    %347 = tpu.matmul %345, %346, %cst_112 {dimension_numbers = #tpu.dot_dimension_numbers<[1], [0], [0], [1], [0, 0, 1, 1], [], []>} : vector<8x8xf32>, vector<8x32xf32>, vector<8x32xf32> -> vector<8x32xf32>
    %348 = vector.extract_strided_slice %288 {offsets = [0, 96], sizes = [8, 32], strides = [1, 1]} : vector<8x128xf32> to vector<8x32xf32>
    %349 = vector.extract_strided_slice %289 {offsets = [0, 96], sizes = [8, 32], strides = [1, 1]} : vector<8x128xf32> to vector<8x32xf32>
    %cst_113 = arith.constant dense<0.000000e+00> : vector<8x8xf32>
    %350 = tpu.matmul %348, %349, %cst_113 {dimension_numbers = #tpu.dot_dimension_numbers<[1], [1], [0], [0], [0, 0, 1, 0], [], []>} : vector<8x32xf32>, vector<8x32xf32>, vector<8x8xf32> -> vector<8x8xf32>
    %cst_114 = arith.constant 0.176776692 : f32
    %351 = vector.broadcast %cst_114 : f32 to vector<8x8xf32>
    %352 = arith.mulf %350, %351 : vector<8x8xf32>
    %353 = vector.broadcast %1 : vector<1x8xf32> to vector<8x8xf32>
    %354 = arith.addf %352, %353 : vector<8x8xf32>
    %cst_115 = arith.constant dense<0xFF800000> : vector<8xf32>
    %355 = vector.multi_reduction <maximumf>, %354, %cst_115 [1] : vector<8x8xf32> to vector<8xf32>
    %356 = vector.shape_cast %355 : vector<8xf32> to vector<8x1xf32>
    %357 = vector.broadcast %356 : vector<8x1xf32> to vector<8x8xf32>
    %358 = arith.subf %354, %357 : vector<8x8xf32>
    %359 = math.exp %358 : vector<8x8xf32>
    %cst_116 = arith.constant dense<0.000000e+00> : vector<8xf32>
    %360 = vector.multi_reduction <add>, %359, %cst_116 [1] : vector<8x8xf32> to vector<8xf32>
    %361 = vector.shape_cast %360 : vector<8xf32> to vector<8x1xf32>
    %362 = tpu.reciprocal %361 {approx = true} : vector<8x1xf32> -> vector<8x1xf32>
    %363 = vector.broadcast %362 : vector<8x1xf32> to vector<8x8xf32>
    %364 = arith.mulf %359, %363 : vector<8x8xf32>
    %365 = vector.extract_strided_slice %290 {offsets = [0, 96], sizes = [8, 32], strides = [1, 1]} : vector<8x128xf32> to vector<8x32xf32>
    %cst_117 = arith.constant dense<0.000000e+00> : vector<8x32xf32>
    %366 = tpu.matmul %364, %365, %cst_117 {dimension_numbers = #tpu.dot_dimension_numbers<[1], [0], [0], [1], [0, 0, 1, 1], [], []>} : vector<8x8xf32>, vector<8x32xf32>, vector<8x32xf32> -> vector<8x32xf32>
    %367 = tpu.concatenate %309, %328, %347, %366 in 1 : vector<8x32xf32>, vector<8x32xf32>, vector<8x32xf32>, vector<8x32xf32> -> vector<8x128xf32>
    %368 = vector.extract_strided_slice %285 {offsets = [8, 0], sizes = [8, 128], strides = [1, 1]} : vector<16x128xf32> to vector<8x128xf32>
    %369 = vector.extract_strided_slice %286 {offsets = [8, 0], sizes = [8, 128], strides = [1, 1]} : vector<16x128xf32> to vector<8x128xf32>
    %370 = vector.extract_strided_slice %287 {offsets = [8, 0], sizes = [8, 128], strides = [1, 1]} : vector<16x128xf32> to vector<8x128xf32>
    %371 = vector.extract_strided_slice %368 {offsets = [0, 0], sizes = [8, 32], strides = [1, 1]} : vector<8x128xf32> to vector<8x32xf32>
    %372 = vector.extract_strided_slice %369 {offsets = [0, 0], sizes = [8, 32], strides = [1, 1]} : vector<8x128xf32> to vector<8x32xf32>
    %cst_118 = arith.constant dense<0.000000e+00> : vector<8x8xf32>
    %373 = tpu.matmul %371, %372, %cst_118 {dimension_numbers = #tpu.dot_dimension_numbers<[1], [1], [0], [0], [0, 0, 1, 0], [], []>} : vector<8x32xf32>, vector<8x32xf32>, vector<8x8xf32> -> vector<8x8xf32>
    %cst_119 = arith.constant 0.176776692 : f32
    %374 = vector.broadcast %cst_119 : f32 to vector<8x8xf32>
    %375 = arith.mulf %373, %374 : vector<8x8xf32>
    %376 = vector.broadcast %2 : vector<1x8xf32> to vector<8x8xf32>
    %377 = arith.addf %375, %376 : vector<8x8xf32>
    %cst_120 = arith.constant dense<0xFF800000> : vector<8xf32>
    %378 = vector.multi_reduction <maximumf>, %377, %cst_120 [1] : vector<8x8xf32> to vector<8xf32>
    %379 = vector.shape_cast %378 : vector<8xf32> to vector<8x1xf32>
    %380 = vector.broadcast %379 : vector<8x1xf32> to vector<8x8xf32>
    %381 = arith.subf %377, %380 : vector<8x8xf32>
    %382 = math.exp %381 : vector<8x8xf32>
    %cst_121 = arith.constant dense<0.000000e+00> : vector<8xf32>
    %383 = vector.multi_reduction <add>, %382, %cst_121 [1] : vector<8x8xf32> to vector<8xf32>
    %384 = vector.shape_cast %383 : vector<8xf32> to vector<8x1xf32>
    %385 = tpu.reciprocal %384 {approx = true} : vector<8x1xf32> -> vector<8x1xf32>
    %386 = vector.broadcast %385 : vector<8x1xf32> to vector<8x8xf32>
    %387 = arith.mulf %382, %386 : vector<8x8xf32>
    %388 = vector.extract_strided_slice %370 {offsets = [0, 0], sizes = [8, 32], strides = [1, 1]} : vector<8x128xf32> to vector<8x32xf32>
    %cst_122 = arith.constant dense<0.000000e+00> : vector<8x32xf32>
    %389 = tpu.matmul %387, %388, %cst_122 {dimension_numbers = #tpu.dot_dimension_numbers<[1], [0], [0], [1], [0, 0, 1, 1], [], []>} : vector<8x8xf32>, vector<8x32xf32>, vector<8x32xf32> -> vector<8x32xf32>
    %390 = vector.extract_strided_slice %368 {offsets = [0, 32], sizes = [8, 32], strides = [1, 1]} : vector<8x128xf32> to vector<8x32xf32>
    %391 = vector.extract_strided_slice %369 {offsets = [0, 32], sizes = [8, 32], strides = [1, 1]} : vector<8x128xf32> to vector<8x32xf32>
    %cst_123 = arith.constant dense<0.000000e+00> : vector<8x8xf32>
    %392 = tpu.matmul %390, %391, %cst_123 {dimension_numbers = #tpu.dot_dimension_numbers<[1], [1], [0], [0], [0, 0, 1, 0], [], []>} : vector<8x32xf32>, vector<8x32xf32>, vector<8x8xf32> -> vector<8x8xf32>
    %cst_124 = arith.constant 0.176776692 : f32
    %393 = vector.broadcast %cst_124 : f32 to vector<8x8xf32>
    %394 = arith.mulf %392, %393 : vector<8x8xf32>
    %395 = vector.broadcast %2 : vector<1x8xf32> to vector<8x8xf32>
    %396 = arith.addf %394, %395 : vector<8x8xf32>
    %cst_125 = arith.constant dense<0xFF800000> : vector<8xf32>
    %397 = vector.multi_reduction <maximumf>, %396, %cst_125 [1] : vector<8x8xf32> to vector<8xf32>
    %398 = vector.shape_cast %397 : vector<8xf32> to vector<8x1xf32>
    %399 = vector.broadcast %398 : vector<8x1xf32> to vector<8x8xf32>
    %400 = arith.subf %396, %399 : vector<8x8xf32>
    %401 = math.exp %400 : vector<8x8xf32>
    %cst_126 = arith.constant dense<0.000000e+00> : vector<8xf32>
    %402 = vector.multi_reduction <add>, %401, %cst_126 [1] : vector<8x8xf32> to vector<8xf32>
    %403 = vector.shape_cast %402 : vector<8xf32> to vector<8x1xf32>
    %404 = tpu.reciprocal %403 {approx = true} : vector<8x1xf32> -> vector<8x1xf32>
    %405 = vector.broadcast %404 : vector<8x1xf32> to vector<8x8xf32>
    %406 = arith.mulf %401, %405 : vector<8x8xf32>
    %407 = vector.extract_strided_slice %370 {offsets = [0, 32], sizes = [8, 32], strides = [1, 1]} : vector<8x128xf32> to vector<8x32xf32>
    %cst_127 = arith.constant dense<0.000000e+00> : vector<8x32xf32>
    %408 = tpu.matmul %406, %407, %cst_127 {dimension_numbers = #tpu.dot_dimension_numbers<[1], [0], [0], [1], [0, 0, 1, 1], [], []>} : vector<8x8xf32>, vector<8x32xf32>, vector<8x32xf32> -> vector<8x32xf32>
    %409 = vector.extract_strided_slice %368 {offsets = [0, 64], sizes = [8, 32], strides = [1, 1]} : vector<8x128xf32> to vector<8x32xf32>
    %410 = vector.extract_strided_slice %369 {offsets = [0, 64], sizes = [8, 32], strides = [1, 1]} : vector<8x128xf32> to vector<8x32xf32>
    %cst_128 = arith.constant dense<0.000000e+00> : vector<8x8xf32>
    %411 = tpu.matmul %409, %410, %cst_128 {dimension_numbers = #tpu.dot_dimension_numbers<[1], [1], [0], [0], [0, 0, 1, 0], [], []>} : vector<8x32xf32>, vector<8x32xf32>, vector<8x8xf32> -> vector<8x8xf32>
    %cst_129 = arith.constant 0.176776692 : f32
    %412 = vector.broadcast %cst_129 : f32 to vector<8x8xf32>
    %413 = arith.mulf %411, %412 : vector<8x8xf32>
    %414 = vector.broadcast %2 : vector<1x8xf32> to vector<8x8xf32>
    %415 = arith.addf %413, %414 : vector<8x8xf32>
    %cst_130 = arith.constant dense<0xFF800000> : vector<8xf32>
    %416 = vector.multi_reduction <maximumf>, %415, %cst_130 [1] : vector<8x8xf32> to vector<8xf32>
    %417 = vector.shape_cast %416 : vector<8xf32> to vector<8x1xf32>
    %418 = vector.broadcast %417 : vector<8x1xf32> to vector<8x8xf32>
    %419 = arith.subf %415, %418 : vector<8x8xf32>
    %420 = math.exp %419 : vector<8x8xf32>
    %cst_131 = arith.constant dense<0.000000e+00> : vector<8xf32>
    %421 = vector.multi_reduction <add>, %420, %cst_131 [1] : vector<8x8xf32> to vector<8xf32>
    %422 = vector.shape_cast %421 : vector<8xf32> to vector<8x1xf32>
    %423 = tpu.reciprocal %422 {approx = true} : vector<8x1xf32> -> vector<8x1xf32>
    %424 = vector.broadcast %423 : vector<8x1xf32> to vector<8x8xf32>
    %425 = arith.mulf %420, %424 : vector<8x8xf32>
    %426 = vector.extract_strided_slice %370 {offsets = [0, 64], sizes = [8, 32], strides = [1, 1]} : vector<8x128xf32> to vector<8x32xf32>
    %cst_132 = arith.constant dense<0.000000e+00> : vector<8x32xf32>
    %427 = tpu.matmul %425, %426, %cst_132 {dimension_numbers = #tpu.dot_dimension_numbers<[1], [0], [0], [1], [0, 0, 1, 1], [], []>} : vector<8x8xf32>, vector<8x32xf32>, vector<8x32xf32> -> vector<8x32xf32>
    %428 = vector.extract_strided_slice %368 {offsets = [0, 96], sizes = [8, 32], strides = [1, 1]} : vector<8x128xf32> to vector<8x32xf32>
    %429 = vector.extract_strided_slice %369 {offsets = [0, 96], sizes = [8, 32], strides = [1, 1]} : vector<8x128xf32> to vector<8x32xf32>
    %cst_133 = arith.constant dense<0.000000e+00> : vector<8x8xf32>
    %430 = tpu.matmul %428, %429, %cst_133 {dimension_numbers = #tpu.dot_dimension_numbers<[1], [1], [0], [0], [0, 0, 1, 0], [], []>} : vector<8x32xf32>, vector<8x32xf32>, vector<8x8xf32> -> vector<8x8xf32>
    %cst_134 = arith.constant 0.176776692 : f32
    %431 = vector.broadcast %cst_134 : f32 to vector<8x8xf32>
    %432 = arith.mulf %430, %431 : vector<8x8xf32>
    %433 = vector.broadcast %2 : vector<1x8xf32> to vector<8x8xf32>
    %434 = arith.addf %432, %433 : vector<8x8xf32>
    %cst_135 = arith.constant dense<0xFF800000> : vector<8xf32>
    %435 = vector.multi_reduction <maximumf>, %434, %cst_135 [1] : vector<8x8xf32> to vector<8xf32>
    %436 = vector.shape_cast %435 : vector<8xf32> to vector<8x1xf32>
    %437 = vector.broadcast %436 : vector<8x1xf32> to vector<8x8xf32>
    %438 = arith.subf %434, %437 : vector<8x8xf32>
    %439 = math.exp %438 : vector<8x8xf32>
    %cst_136 = arith.constant dense<0.000000e+00> : vector<8xf32>
    %440 = vector.multi_reduction <add>, %439, %cst_136 [1] : vector<8x8xf32> to vector<8xf32>
    %441 = vector.shape_cast %440 : vector<8xf32> to vector<8x1xf32>
    %442 = tpu.reciprocal %441 {approx = true} : vector<8x1xf32> -> vector<8x1xf32>
    %443 = vector.broadcast %442 : vector<8x1xf32> to vector<8x8xf32>
    %444 = arith.mulf %439, %443 : vector<8x8xf32>
    %445 = vector.extract_strided_slice %370 {offsets = [0, 96], sizes = [8, 32], strides = [1, 1]} : vector<8x128xf32> to vector<8x32xf32>
    %cst_137 = arith.constant dense<0.000000e+00> : vector<8x32xf32>
    %446 = tpu.matmul %444, %445, %cst_137 {dimension_numbers = #tpu.dot_dimension_numbers<[1], [0], [0], [1], [0, 0, 1, 1], [], []>} : vector<8x8xf32>, vector<8x32xf32>, vector<8x32xf32> -> vector<8x32xf32>
    %447 = tpu.concatenate %389, %408, %427, %446 in 1 : vector<8x32xf32>, vector<8x32xf32>, vector<8x32xf32>, vector<8x32xf32> -> vector<8x128xf32>
    %448 = tpu.concatenate %367, %447 in 0 : vector<8x128xf32>, vector<8x128xf32> -> vector<16x128xf32>
    %449 = arith.truncf %448 : vector<16x128xf32> to vector<16x128xbf16>
    %c0_138 = arith.constant 0 : index
    %c0_139 = arith.constant 0 : index
    %450 = vector.load %arg21[%c0_138, %c0_139] : memref<128x128xbf16, #tpu.memory_space<vmem>>, vector<128x128xbf16>
    %cst_140 = arith.constant dense<0.000000e+00> : vector<16x128xf32>
    %451 = tpu.matmul %449, %450, %cst_140 {dimension_numbers = #tpu.dot_dimension_numbers<[1], [0], [0], [1], [0, 0, 1, 1], [], []>} : vector<16x128xbf16>, vector<128x128xbf16>, vector<16x128xf32> -> vector<16x128xf32>
    %c0_141 = arith.constant 0 : index
    %c0_142 = arith.constant 0 : index
    %452 = vector.load %arg22[%c0_141, %c0_142] : memref<1x128xf32, #tpu.memory_space<vmem>>, vector<1x128xf32>
    %453 = vector.broadcast %452 : vector<1x128xf32> to vector<16x128xf32>
    %454 = arith.addf %451, %453 : vector<16x128xf32>
    %455 = arith.addf %278, %454 : vector<16x128xf32>
    %c0_143 = arith.constant 0 : index
    %c0_144 = arith.constant 0 : index
    %456 = vector.load %arg23[%c0_143, %c0_144] : memref<1x128xf32, #tpu.memory_space<vmem>>, vector<1x128xf32>
    %c0_145 = arith.constant 0 : index
    %c0_146 = arith.constant 0 : index
    %457 = vector.load %arg24[%c0_145, %c0_146] : memref<1x128xf32, #tpu.memory_space<vmem>>, vector<1x128xf32>
    %cst_147 = arith.constant dense<0.000000e+00> : vector<16xf32>
    %458 = vector.multi_reduction <add>, %455, %cst_147 [1] : vector<16x128xf32> to vector<16xf32>
    %459 = vector.shape_cast %458 : vector<16xf32> to vector<16x1xf32>
    %cst_148 = arith.constant 1.280000e+02 : f32
    %460 = vector.broadcast %cst_148 : f32 to vector<16x1xf32>
    %461 = arith.divf %459, %460 : vector<16x1xf32>
    %462 = vector.broadcast %461 : vector<16x1xf32> to vector<16x128xf32>
    %463 = arith.subf %455, %462 : vector<16x128xf32>
    %464 = arith.mulf %463, %463 : vector<16x128xf32>
    %cst_149 = arith.constant dense<0.000000e+00> : vector<16xf32>
    %465 = vector.multi_reduction <add>, %464, %cst_149 [1] : vector<16x128xf32> to vector<16xf32>
    %466 = vector.shape_cast %465 : vector<16xf32> to vector<16x1xf32>
    %cst_150 = arith.constant 1.280000e+02 : f32
    %467 = vector.broadcast %cst_150 : f32 to vector<16x1xf32>
    %468 = arith.divf %466, %467 : vector<16x1xf32>
    %469 = vector.broadcast %461 : vector<16x1xf32> to vector<16x128xf32>
    %470 = arith.subf %455, %469 : vector<16x128xf32>
    %cst_151 = arith.constant 9.99999996E-13 : f32
    %471 = vector.broadcast %cst_151 : f32 to vector<16x1xf32>
    %472 = arith.addf %468, %471 : vector<16x1xf32>
    %473 = math.rsqrt %472 : vector<16x1xf32>
    %474 = vector.broadcast %473 : vector<16x1xf32> to vector<16x128xf32>
    %475 = arith.mulf %470, %474 : vector<16x128xf32>
    %476 = vector.broadcast %456 : vector<1x128xf32> to vector<16x128xf32>
    %477 = arith.mulf %475, %476 : vector<16x128xf32>
    %478 = vector.broadcast %457 : vector<1x128xf32> to vector<16x128xf32>
    %479 = arith.addf %477, %478 : vector<16x128xf32>
    %480 = arith.truncf %479 : vector<16x128xf32> to vector<16x128xbf16>
    %c0_152 = arith.constant 0 : index
    %c0_153 = arith.constant 0 : index
    %481 = vector.load %arg25[%c0_152, %c0_153] : memref<128x256xbf16, #tpu.memory_space<vmem>>, vector<128x256xbf16>
    %cst_154 = arith.constant dense<0.000000e+00> : vector<16x256xf32>
    %482 = tpu.matmul %480, %481, %cst_154 {dimension_numbers = #tpu.dot_dimension_numbers<[1], [0], [0], [1], [0, 0, 1, 1], [], []>} : vector<16x128xbf16>, vector<128x256xbf16>, vector<16x256xf32> -> vector<16x256xf32>
    %c0_155 = arith.constant 0 : index
    %c0_156 = arith.constant 0 : index
    %483 = vector.load %arg26[%c0_155, %c0_156] : memref<1x256xf32, #tpu.memory_space<vmem>>, vector<1x256xf32>
    %484 = vector.broadcast %483 : vector<1x256xf32> to vector<16x256xf32>
    %485 = arith.addf %482, %484 : vector<16x256xf32>
    %486 = arith.mulf %485, %485 : vector<16x256xf32>
    %487 = arith.mulf %485, %486 : vector<16x256xf32>
    %cst_157 = arith.constant 4.471500e-02 : f32
    %488 = vector.broadcast %cst_157 : f32 to vector<16x256xf32>
    %489 = arith.mulf %488, %487 : vector<16x256xf32>
    %490 = arith.addf %485, %489 : vector<16x256xf32>
    %cst_158 = arith.constant 0.797884583 : f32
    %491 = vector.broadcast %cst_158 : f32 to vector<16x256xf32>
    %492 = arith.mulf %491, %490 : vector<16x256xf32>
    %493 = math.tanh %492 : vector<16x256xf32>
    %cst_159 = arith.constant 1.000000e+00 : f32
    %494 = vector.broadcast %cst_159 : f32 to vector<16x256xf32>
    %495 = arith.addf %494, %493 : vector<16x256xf32>
    %cst_160 = arith.constant 5.000000e-01 : f32
    %496 = vector.broadcast %cst_160 : f32 to vector<16x256xf32>
    %497 = arith.mulf %496, %495 : vector<16x256xf32>
    %498 = arith.mulf %485, %497 : vector<16x256xf32>
    %499 = arith.truncf %498 : vector<16x256xf32> to vector<16x256xbf16>
    %c0_161 = arith.constant 0 : index
    %c0_162 = arith.constant 0 : index
    %500 = vector.load %arg27[%c0_161, %c0_162] : memref<256x128xbf16, #tpu.memory_space<vmem>>, vector<256x128xbf16>
    %cst_163 = arith.constant dense<0.000000e+00> : vector<16x128xf32>
    %501 = tpu.matmul %499, %500, %cst_163 {dimension_numbers = #tpu.dot_dimension_numbers<[1], [0], [0], [1], [0, 0, 1, 1], [], []>} : vector<16x256xbf16>, vector<256x128xbf16>, vector<16x128xf32> -> vector<16x128xf32>
    %c0_164 = arith.constant 0 : index
    %c0_165 = arith.constant 0 : index
    %502 = vector.load %arg28[%c0_164, %c0_165] : memref<1x128xf32, #tpu.memory_space<vmem>>, vector<1x128xf32>
    %503 = vector.broadcast %502 : vector<1x128xf32> to vector<16x128xf32>
    %504 = arith.addf %501, %503 : vector<16x128xf32>
    %505 = arith.addf %479, %504 : vector<16x128xf32>
    %c0_166 = arith.constant 0 : index
    %c0_167 = arith.constant 0 : index
    %506 = vector.load %arg29[%c0_166, %c0_167] : memref<1x128xf32, #tpu.memory_space<vmem>>, vector<1x128xf32>
    %c0_168 = arith.constant 0 : index
    %c0_169 = arith.constant 0 : index
    %507 = vector.load %arg30[%c0_168, %c0_169] : memref<1x128xf32, #tpu.memory_space<vmem>>, vector<1x128xf32>
    %cst_170 = arith.constant dense<0.000000e+00> : vector<16xf32>
    %508 = vector.multi_reduction <add>, %505, %cst_170 [1] : vector<16x128xf32> to vector<16xf32>
    %509 = vector.shape_cast %508 : vector<16xf32> to vector<16x1xf32>
    %cst_171 = arith.constant 1.280000e+02 : f32
    %510 = vector.broadcast %cst_171 : f32 to vector<16x1xf32>
    %511 = arith.divf %509, %510 : vector<16x1xf32>
    %512 = vector.broadcast %511 : vector<16x1xf32> to vector<16x128xf32>
    %513 = arith.subf %505, %512 : vector<16x128xf32>
    %514 = arith.mulf %513, %513 : vector<16x128xf32>
    %cst_172 = arith.constant dense<0.000000e+00> : vector<16xf32>
    %515 = vector.multi_reduction <add>, %514, %cst_172 [1] : vector<16x128xf32> to vector<16xf32>
    %516 = vector.shape_cast %515 : vector<16xf32> to vector<16x1xf32>
    %cst_173 = arith.constant 1.280000e+02 : f32
    %517 = vector.broadcast %cst_173 : f32 to vector<16x1xf32>
    %518 = arith.divf %516, %517 : vector<16x1xf32>
    %519 = vector.broadcast %511 : vector<16x1xf32> to vector<16x128xf32>
    %520 = arith.subf %505, %519 : vector<16x128xf32>
    %cst_174 = arith.constant 9.99999996E-13 : f32
    %521 = vector.broadcast %cst_174 : f32 to vector<16x1xf32>
    %522 = arith.addf %518, %521 : vector<16x1xf32>
    %523 = math.rsqrt %522 : vector<16x1xf32>
    %524 = vector.broadcast %523 : vector<16x1xf32> to vector<16x128xf32>
    %525 = arith.mulf %520, %524 : vector<16x128xf32>
    %526 = vector.broadcast %506 : vector<1x128xf32> to vector<16x128xf32>
    %527 = arith.mulf %525, %526 : vector<16x128xf32>
    %528 = vector.broadcast %507 : vector<1x128xf32> to vector<16x128xf32>
    %529 = arith.addf %527, %528 : vector<16x128xf32>
    %530 = arith.truncf %529 : vector<16x128xf32> to vector<16x128xbf16>
    %c0_175 = arith.constant 0 : index
    %c0_176 = arith.constant 0 : index
    %531 = vector.load %arg31[%c0_175, %c0_176] : memref<128x128xbf16, #tpu.memory_space<vmem>>, vector<128x128xbf16>
    %cst_177 = arith.constant dense<0.000000e+00> : vector<16x128xf32>
    %532 = tpu.matmul %530, %531, %cst_177 {dimension_numbers = #tpu.dot_dimension_numbers<[1], [0], [0], [1], [0, 0, 1, 1], [], []>} : vector<16x128xbf16>, vector<128x128xbf16>, vector<16x128xf32> -> vector<16x128xf32>
    %c0_178 = arith.constant 0 : index
    %c0_179 = arith.constant 0 : index
    %533 = vector.load %arg32[%c0_178, %c0_179] : memref<1x128xf32, #tpu.memory_space<vmem>>, vector<1x128xf32>
    %534 = vector.broadcast %533 : vector<1x128xf32> to vector<16x128xf32>
    %535 = arith.addf %532, %534 : vector<16x128xf32>
    %c0_180 = arith.constant 0 : index
    %c0_181 = arith.constant 0 : index
    %536 = vector.load %arg3[%c0_180, %c0_181] : memref<2x8xf32, #tpu.memory_space<vmem>>, vector<2x8xf32>
    %c0_182 = arith.constant 0 : index
    %c0_183 = arith.constant 0 : index
    %537 = vector.load %arg33[%c0_182, %c0_183] : memref<8x128xf32, #tpu.memory_space<vmem>>, vector<8x128xf32>
    %cst_184 = arith.constant dense<0.000000e+00> : vector<2x128xf32>
    %538 = tpu.matmul %536, %537, %cst_184 {dimension_numbers = #tpu.dot_dimension_numbers<[1], [0], [0], [1], [0, 0, 1, 1], [], []>} : vector<2x8xf32>, vector<8x128xf32>, vector<2x128xf32> -> vector<2x128xf32>
    %c0_185 = arith.constant 0 : index
    %c0_186 = arith.constant 0 : index
    %539 = vector.load %arg34[%c0_185, %c0_186] : memref<1x128xf32, #tpu.memory_space<vmem>>, vector<1x128xf32>
    %540 = vector.broadcast %539 : vector<1x128xf32> to vector<2x128xf32>
    %541 = arith.addf %538, %540 : vector<2x128xf32>
    %cst_187 = arith.constant 0.000000e+00 : f32
    %542 = vector.broadcast %cst_187 : f32 to vector<2x128xf32>
    %543 = arith.maximumf %541, %542 : vector<2x128xf32>
    %544 = vector.extract_strided_slice %543 {offsets = [0, 0], sizes = [1, 128], strides = [1, 1]} : vector<2x128xf32> to vector<1x128xf32>
    %545 = vector.shape_cast %544 : vector<1x128xf32> to vector<1x128xf32>
    %546 = vector.broadcast %545 : vector<1x128xf32> to vector<8x128xf32>
    %547 = vector.extract_strided_slice %543 {offsets = [1, 0], sizes = [1, 128], strides = [1, 1]} : vector<2x128xf32> to vector<1x128xf32>
    %548 = vector.shape_cast %547 : vector<1x128xf32> to vector<1x128xf32>
    %549 = vector.broadcast %548 : vector<1x128xf32> to vector<8x128xf32>
    %550 = tpu.concatenate %546, %549 in 0 : vector<8x128xf32>, vector<8x128xf32> -> vector<16x128xf32>
    %551 = arith.addf %535, %550 : vector<16x128xf32>
    %552 = arith.truncf %551 : vector<16x128xf32> to vector<16x128xbf16>
    %c0_188 = arith.constant 0 : index
    %c0_189 = arith.constant 0 : index
    %553 = vector.load %arg35[%c0_188, %c0_189] : memref<128x128xbf16, #tpu.memory_space<vmem>>, vector<128x128xbf16>
    %cst_190 = arith.constant dense<0.000000e+00> : vector<16x128xf32>
    %554 = tpu.matmul %552, %553, %cst_190 {dimension_numbers = #tpu.dot_dimension_numbers<[1], [0], [0], [1], [0, 0, 1, 1], [], []>} : vector<16x128xbf16>, vector<128x128xbf16>, vector<16x128xf32> -> vector<16x128xf32>
    %c0_191 = arith.constant 0 : index
    %c0_192 = arith.constant 0 : index
    %555 = vector.load %arg36[%c0_191, %c0_192] : memref<1x128xf32, #tpu.memory_space<vmem>>, vector<1x128xf32>
    %556 = vector.broadcast %555 : vector<1x128xf32> to vector<16x128xf32>
    %557 = arith.addf %554, %556 : vector<16x128xf32>
    %c0_193 = arith.constant 0 : index
    %c0_194 = arith.constant 0 : index
    %558 = vector.load %arg37[%c0_193, %c0_194] : memref<16x128xf32, #tpu.memory_space<vmem>>, vector<16x128xf32>
    tpu.vector_store %arg37[%c0_193, %c0_194], %557 {strides = array<i32>} : memref<16x128xf32, #tpu.memory_space<vmem>>, vector<16x128xf32>,
    %c0_195 = arith.constant 0 : index
    %c0_196 = arith.constant 0 : index
    %559 = vector.load %arg4[%c0_195, %c0_196] : memref<16x1xf32, #tpu.memory_space<vmem>>, vector<16x1xf32>
    %560 = vector.extract_strided_slice %557 {offsets = [0, 0], sizes = [16, 1], strides = [1, 1]} : vector<16x128xf32> to vector<16x1xf32>
    %561 = vector.extract_strided_slice %557 {offsets = [0, 1], sizes = [16, 1], strides = [1, 1]} : vector<16x128xf32> to vector<16x1xf32>
    %562 = arith.maximumf %560, %561 : vector<16x1xf32>
    %563 = arith.subf %560, %562 : vector<16x1xf32>
    %564 = math.exp %563 : vector<16x1xf32>
    %565 = arith.subf %561, %562 : vector<16x1xf32>
    %566 = math.exp %565 : vector<16x1xf32>
    %567 = arith.addf %564, %566 : vector<16x1xf32>
    %568 = math.log %567 : vector<16x1xf32>
    %569 = arith.addf %562, %568 : vector<16x1xf32>
    %570 = arith.mulf %559, %561 : vector<16x1xf32>
    %cst_197 = arith.constant 1.000000e+00 : f32
    %571 = vector.broadcast %cst_197 : f32 to vector<16x1xf32>
    %572 = arith.subf %571, %559 : vector<16x1xf32>
    %573 = arith.mulf %572, %560 : vector<16x1xf32>
    %574 = arith.addf %570, %573 : vector<16x1xf32>
    %575 = arith.subf %569, %574 : vector<16x1xf32>
    %576 = vector.shape_cast %575 : vector<16x1xf32> to vector<1x16x1xf32>
    %cst_198 = arith.constant dense<0.000000e+00> : vector<1xf32>
    %577 = vector.multi_reduction <add>, %576, %cst_198 [1, 2] : vector<1x16x1xf32> to vector<1xf32>
    %578 = vector.shape_cast %577 : vector<1xf32> to vector<1x1x1xf32>
    %579 = vector.extract %578[0, 0, 0] : f32 from vector<1x1x1xf32>
    %580 = vector.broadcast %579 : f32 to vector<1x1xf32>
    %cst_199 = arith.constant 1.600000e+01 : f32
    %581 = vector.broadcast %cst_199 : f32 to vector<1x1xf32>
    %582 = arith.divf %580, %581 : vector<1x1xf32>
    %c0_200 = arith.constant 0 : index
    %c0_201 = arith.constant 0 : index
    %583 = vector.load %arg38[%c0_200, %c0_201] : memref<1x1xf32, #tpu.memory_space<vmem>>, vector<1x1xf32>
    tpu.vector_store %arg38[%c0_200, %c0_201], %582 {strides = array<i32>} : memref<1x1xf32, #tpu.memory_space<vmem>>, vector<1x1xf32>,
    return
  }
  func.func @transform_0(%arg0: i32) -> (i32, i32) {
    %c0_i32 = arith.constant 0 : i32
    %c0_i32_0 = arith.constant 0 : i32
    %c0_i32_1 = arith.constant 0 : i32
    return %c0_i32, %c0_i32_0 : i32, i32
  }
  func.func @transform_1(%arg0: i32) -> (i32, i32) {
    %c0_i32 = arith.constant 0 : i32
    %c0_i32_0 = arith.constant 0 : i32
    %c0_i32_1 = arith.constant 0 : i32
    return %c0_i32, %c0_i32_0 : i32, i32
  }
  func.func @transform_2(%arg0: i32) -> (i32, i32) {
    %c0_i32 = arith.constant 0 : i32
    %c0_i32_0 = arith.constant 0 : i32
    %c0_i32_1 = arith.constant 0 : i32
    return %c0_i32, %c0_i32_0 : i32, i32
  }
  func.func @transform_3(%arg0: i32) -> (i32, i32) {
    %c0_i32 = arith.constant 0 : i32
    %c0_i32_0 = arith.constant 0 : i32
    %c0_i32_1 = arith.constant 0 : i32
    return %c0_i32, %c0_i32_0 : i32, i32
  }
  func.func @transform_4(%arg0: i32) -> (i32, i32) {
    %c0_i32 = arith.constant 0 : i32
    %c0_i32_0 = arith.constant 0 : i32
    %c0_i32_1 = arith.constant 0 : i32
    return %c0_i32, %c0_i32_0 : i32, i32
  }
  func.func @transform_5(%arg0: i32) -> (i32, i32) {
    %c0_i32 = arith.constant 0 : i32
    %c0_i32_0 = arith.constant 0 : i32
    %c0_i32_1 = arith.constant 0 : i32
    return %c0_i32, %c0_i32_0 : i32, i32
  }
  func.func @transform_6(%arg0: i32) -> (i32, i32) {
    %c0_i32 = arith.constant 0 : i32
    %c0_i32_0 = arith.constant 0 : i32
    %c0_i32_1 = arith.constant 0 : i32
    return %c0_i32, %c0_i32_0 : i32, i32
  }
  func.func @transform_7(%arg0: i32) -> (i32, i32) {
    %c0_i32 = arith.constant 0 : i32
    %c0_i32_0 = arith.constant 0 : i32
    %c0_i32_1 = arith.constant 0 : i32
    return %c0_i32, %c0_i32_0 : i32, i32
  }
  func.func @transform_8(%arg0: i32) -> (i32, i32) {
    %c0_i32 = arith.constant 0 : i32
    %c0_i32_0 = arith.constant 0 : i32
    %c0_i32_1 = arith.constant 0 : i32
    return %c0_i32, %c0_i32_0 : i32, i32
  }
  func.func @transform_9(%arg0: i32) -> (i32, i32) {
    %c0_i32 = arith.constant 0 : i32
    %c0_i32_0 = arith.constant 0 : i32
    %c0_i32_1 = arith.constant 0 : i32
    return %c0_i32, %c0_i32_0 : i32, i32
  }
  func.func @transform_10(%arg0: i32) -> (i32, i32) {
    %c0_i32 = arith.constant 0 : i32
    %c0_i32_0 = arith.constant 0 : i32
    %c0_i32_1 = arith.constant 0 : i32
    return %c0_i32, %c0_i32_0 : i32, i32
  }
  func.func @transform_11(%arg0: i32) -> (i32, i32) {
    %c0_i32 = arith.constant 0 : i32
    %c0_i32_0 = arith.constant 0 : i32
    %c0_i32_1 = arith.constant 0 : i32
    return %c0_i32, %c0_i32_0 : i32, i32
  }
  func.func @transform_12(%arg0: i32) -> (i32, i32) {
    %c0_i32 = arith.constant 0 : i32
    %c0_i32_0 = arith.constant 0 : i32
    %c0_i32_1 = arith.constant 0 : i32
    return %c0_i32, %c0_i32_0 : i32, i32
  }
  func.func @transform_13(%arg0: i32) -> (i32, i32) {
    %c0_i32 = arith.constant 0 : i32
    %c0_i32_0 = arith.constant 0 : i32
    %c0_i32_1 = arith.constant 0 : i32
    return %c0_i32, %c0_i32_0 : i32, i32
  }
  func.func @transform_14(%arg0: i32) -> (i32, i32) {
    %c0_i32 = arith.constant 0 : i32
    %c0_i32_0 = arith.constant 0 : i32
    %c0_i32_1 = arith.constant 0 : i32
    return %c0_i32, %c0_i32_0 : i32, i32
  }
  func.func @transform_15(%arg0: i32) -> (i32, i32) {
    %c0_i32 = arith.constant 0 : i32
    %c0_i32_0 = arith.constant 0 : i32
    %c0_i32_1 = arith.constant 0 : i32
    return %c0_i32, %c0_i32_0 : i32, i32
  }
  func.func @transform_16(%arg0: i32) -> (i32, i32) {
    %c0_i32 = arith.constant 0 : i32
    %c0_i32_0 = arith.constant 0 : i32
    %c0_i32_1 = arith.constant 0 : i32
    return %c0_i32, %c0_i32_0 : i32, i32
  }
  func.func @transform_17(%arg0: i32) -> (i32, i32) {
    %c0_i32 = arith.constant 0 : i32
    %c0_i32_0 = arith.constant 0 : i32
    %c0_i32_1 = arith.constant 0 : i32
    return %c0_i32, %c0_i32_0 : i32, i32
  }
  func.func @transform_18(%arg0: i32) -> (i32, i32) {
    %c0_i32 = arith.constant 0 : i32
    %c0_i32_0 = arith.constant 0 : i32
    %c0_i32_1 = arith.constant 0 : i32
    return %c0_i32, %c0_i32_0 : i32, i32
  }
  func.func @transform_19(%arg0: i32) -> (i32, i32) {
    %c0_i32 = arith.constant 0 : i32
    %c0_i32_0 = arith.constant 0 : i32
    %c0_i32_1 = arith.constant 0 : i32
    return %c0_i32, %c0_i32_0 : i32, i32
  }
  func.func @transform_20(%arg0: i32) -> (i32, i32) {
    %c0_i32 = arith.constant 0 : i32
    %c0_i32_0 = arith.constant 0 : i32
    %c0_i32_1 = arith.constant 0 : i32
    return %c0_i32, %c0_i32_0 : i32, i32
  }
  func.func @transform_21(%arg0: i32) -> (i32, i32) {
    %c0_i32 = arith.constant 0 : i32
    %c0_i32_0 = arith.constant 0 : i32
    %c0_i32_1 = arith.constant 0 : i32
    return %c0_i32, %c0_i32_0 : i32, i32
  }
  func.func @transform_22(%arg0: i32) -> (i32, i32) {
    %c0_i32 = arith.constant 0 : i32
    %c0_i32_0 = arith.constant 0 : i32
    %c0_i32_1 = arith.constant 0 : i32
    return %c0_i32, %c0_i32_0 : i32, i32
  }
  func.func @transform_23(%arg0: i32) -> (i32, i32) {
    %c0_i32 = arith.constant 0 : i32
    %c0_i32_0 = arith.constant 0 : i32
    %c0_i32_1 = arith.constant 0 : i32
    return %c0_i32, %c0_i32_0 : i32, i32
  }
  func.func @transform_24(%arg0: i32) -> (i32, i32) {
    %c0_i32 = arith.constant 0 : i32
    %c0_i32_0 = arith.constant 0 : i32
    %c0_i32_1 = arith.constant 0 : i32
    return %c0_i32, %c0_i32_0 : i32, i32
  }
  func.func @transform_25(%arg0: i32) -> (i32, i32) {
    %c0_i32 = arith.constant 0 : i32
    %c0_i32_0 = arith.constant 0 : i32
    %c0_i32_1 = arith.constant 0 : i32
    return %c0_i32, %c0_i32_0 : i32, i32
  }
  func.func @transform_26(%arg0: i32) -> (i32, i32) {
    %c0_i32 = arith.constant 0 : i32
    %c0_i32_0 = arith.constant 0 : i32
    %c0_i32_1 = arith.constant 0 : i32
    return %c0_i32, %c0_i32_0 : i32, i32
  }
  func.func @transform_27(%arg0: i32) -> (i32, i32) {
    %c0_i32 = arith.constant 0 : i32
    %c0_i32_0 = arith.constant 0 : i32
    %c0_i32_1 = arith.constant 0 : i32
    return %c0_i32, %c0_i32_0 : i32, i32
  }
  func.func @transform_28(%arg0: i32) -> (i32, i32) {
    %c0_i32 = arith.constant 0 : i32
    %c0_i32_0 = arith.constant 0 : i32
    %c0_i32_1 = arith.constant 0 : i32
    return %c0_i32, %c0_i32_0 : i32, i32
  }
  func.func @transform_29(%arg0: i32) -> (i32, i32) {
    %c0_i32 = arith.constant 0 : i32
    %c0_i32_0 = arith.constant 0 : i32
    %c0_i32_1 = arith.constant 0 : i32
    return %c0_i32, %c0_i32_0 : i32, i32
  }
  func.func @transform_30(%arg0: i32) -> (i32, i32) {
    %c0_i32 = arith.constant 0 : i32
    %c0_i32_0 = arith.constant 0 : i32
    %c0_i32_1 = arith.constant 0 : i32
    return %c0_i32, %c0_i32_0 : i32, i32
  }
  func.func @transform_31(%arg0: i32) -> (i32, i32) {
    %c0_i32 = arith.constant 0 : i32
    %c0_i32_0 = arith.constant 0 : i32
    %c0_i32_1 = arith.constant 0 : i32
    return %c0_i32, %c0_i32_0 : i32, i32
  }
  func.func @transform_32(%arg0: i32) -> (i32, i32) {
    %c0_i32 = arith.constant 0 : i32
    %c0_i32_0 = arith.constant 0 : i32
    %c0_i32_1 = arith.constant 0 : i32
    return %c0_i32, %c0_i32_0 : i32, i32
  }
  func.func @transform_33(%arg0: i32) -> (i32, i32) {
    %c0_i32 = arith.constant 0 : i32
    %c0_i32_0 = arith.constant 0 : i32
    %c0_i32_1 = arith.constant 0 : i32
    return %c0_i32, %c0_i32_0 : i32, i32
  }
  func.func @transform_34(%arg0: i32) -> (i32, i32) {
    %c0_i32 = arith.constant 0 : i32
    %c0_i32_0 = arith.constant 0 : i32
    %c0_i32_1 = arith.constant 0 : i32
    return %c0_i32, %c0_i32_0 : i32, i32
  }
  func.func @transform_35(%arg0: i32) -> (i32, i32) {
    %c0_i32 = arith.constant 0 : i32
    %c0_i32_0 = arith.constant 0 : i32
    %c0_i32_1 = arith.constant 0 : i32
    return %c0_i32, %c0_i32_0 : i32, i32
  }
  func.func @transform_36(%arg0: i32) -> (i32, i32) {
    %c0_i32 = arith.constant 0 : i32
    %c0_i32_0 = arith.constant 0 : i32
    %c0_i32_1 = arith.constant 0 : i32
    return %c0_i32, %c0_i32_0 : i32, i32
  }
  func.func @transform_37(%arg0: i32) -> (i32, i32) {
    %c0_i32 = arith.constant 0 : i32
    %c0_i32_0 = arith.constant 0 : i32
    %c0_i32_1 = arith.constant 0 : i32
    return %c0_i32, %c0_i32_0 : i32, i32
  }
}

</mosaic_0001>

<bundles_post_ra>
// kernel: dual_attentive_bert.1
= control target key start
LH: loop header
LB: loop body
LE: loop exit
PB: predicated region body
PF: predicated region fallthrough
CT: control target
= control target key end

     0   :  { %s6917_s6 = smov 1   ;;  %s6918_s10 = smov 2   ;;  %s7772_s0 = inlined_call_operand.smem [shape: u32[38], index: -1, kind: input, shape index: {}] }
   0x1   :  { %s7000_s5 = sld [smem:[%s7772_s0]]   ;;  %s6919_s14 = smov 3  }
   0x2   :  { %s7005_s9 = sld [smem:[%s7772_s0 + %s6917_s6]]   ;;  %s6920_s18 = smov 4  }
   0x3   :  { %s7010_s13 = sld [smem:[%s7772_s0 + %s6918_s10]]   ;;  %s6921_s22 = smov 5  }
   0x4   :  { %s7015_s17 = sld [smem:[%s7772_s0 + %s6919_s14]]   ;;  %s6922_s26 = smov 6  }
   0x5   :  { %s7020_s21 = sld [smem:[%s7772_s0 + %s6920_s18]]   ;;  %s6923_s30 = smov 7  }
   0x6   :  { %s7025_s25 = sld [smem:[%s7772_s0 + %s6921_s22]]   ;;  %s6924_s4 = smov 8  }
   0x7   :  { %7777 = sst [smem:[#allocation55_spill]] %s7000_s5  ;;  %s6925_s10 = smov 9  }
   0x8   :  { %7778 = sst [smem:[#allocation56_spill]] %s7005_s9  ;;  %s6926_s15 = smov 10  }
   0x9   :  { %7779 = sst [smem:[#allocation57_spill]] %s7010_s13  ;;  %s6927_s20 = smov 11  }
   0xa   :  { %7780 = sst [smem:[#allocation58_spill]] %s7015_s17  ;;  %s6929_s1 = smov 13  }
   0xb   :  { %s7030_s29 = sld [smem:[%s7772_s0 + %s6922_s26]]   ;;  %s6928_s26 = smov 12  }
   0xc   :  { %s7035_s3 = sld [smem:[%s7772_s0 + %s6923_s30]]   ;;  %s6930_s7 = smov 14  }
   0xd   :  { %s7040_s8 = sld [smem:[%s7772_s0 + %s6924_s4]]   ;;  %s6932_s22 = smov 16  }
   0xe   :  { %s7045_s14 = sld [smem:[%s7772_s0 + %s6925_s10]]   ;;  %s6933_s28 = smov 17  }
   0xf   :  { %s7050_s19 = sld [smem:[%s7772_s0 + %s6926_s15]]   ;;  %s6931_s15 = smov 15  }
  0x10   :  { %s7055_s24 = sld [smem:[%s7772_s0 + %s6927_s20]]  }
  0x11   :  { %7781 = sst [smem:[#allocation59_spill]] %s7030_s29 }
  0x12   :  { %s7060_s30 = sld [smem:[%s7772_s0 + %s6928_s26]]  }
  0x13   :  { %s7065_s6 = sld [smem:[%s7772_s0 + %s6929_s1]]  }
  0x14   :  { %s7070_s12 = sld [smem:[%s7772_s0 + %s6930_s7]]   ;;  %s6934_s7 = smov 18  }
  0x15   :  { %s7075_s20 = sld [smem:[%s7772_s0 + %s6931_s15]]   ;;  %s6935_s15 = smov 19  }
  0x16   :  { %7782 = sst [smem:[#allocation60_spill]] %s7055_s24 }
  0x17   :  { %s7080_s27 = sld [smem:[%s7772_s0 + %s6932_s22]]   ;;  %s6936_s22 = smov 20  }
  0x18   :  { %s7085_s4 = sld [smem:[%s7772_s0 + %s6933_s28]]   ;;  %s6937_s28 = smov 21  }
  0x19   :  { %7783 = sst [smem:[#allocation61_spill]] %s7065_s6 }
  0x1a   :  { %s7090_s17 = sld [smem:[%s7772_s0 + %s6934_s7]]   ;;  %s6938_s7 = smov 22  }
  0x1b   :  { %7784 = sst [smem:[#allocation62_spill]] %s7075_s20 }
  0x1c   :  { %s7095_s13 = sld [smem:[%s7772_s0 + %s6935_s15]]   ;;  %s6939_s15 = smov 23  }
  0x1d   :  { %s7100_s9 = sld [smem:[%s7772_s0 + %s6936_s22]]   ;;  %s6940_s22 = smov 24  }
  0x1e   :  { %7785 = sst [smem:[#allocation63_spill]] %s7085_s4 }
  0x1f   :  { %s7105_s29 = sld [smem:[%s7772_s0 + %s6937_s28]]   ;;  %s6941_s28 = smov 25  }
  0x20   :  { %s7110_s5 = sld [smem:[%s7772_s0 + %s6938_s7]]   ;;  %s6942_s7 = smov 26  }
  0x21   :  { %s7130_s4 = sld [smem:[%s7772_s0 + %s6942_s7]]   ;;  %s6946_s7 = smov 30  }
  0x22   :  { %7786 = sst [smem:[#allocation64_spill]] %s7095_s13 }
  0x23   :  { %7787 = sst [smem:[#allocation65_spill]] %s7100_s9 }
  0x24   :  { %s7115_s13 = sld [smem:[%s7772_s0 + %s6939_s15]]   ;;  %s6943_s15 = smov 27  }
  0x25   :  { %7788 = sst [smem:[#allocation66_spill]] %s7105_s29 }
  0x26   :  { %s7120_s9 = sld [smem:[%s7772_s0 + %s6940_s22]]   ;;  %s6944_s22 = smov 28  }
  0x27   :  { %s7125_s29 = sld [smem:[%s7772_s0 + %s6941_s28]]   ;;  %s6945_s28 = smov 29  }
  0x28   :  { %s7150_s20 = sld [smem:[%s7772_s0 + %s6946_s7]]   ;;  %s6950_s7 = smov 34  }
  0x2a   :  { %7789 = sst [smem:[#allocation67_spill]] %s7115_s13 }
  0x2b   :  { %s7135_s13 = sld [smem:[%s7772_s0 + %s6943_s15]]   ;;  %s6947_s15 = smov 31  }
  0x2c   :  { %7790 = sst [smem:[#allocation68_spill]] %s7120_s9 }
  0x2d   :  { %7791 = sst [smem:[#allocation69_spill]] %s7125_s29 }
  0x2e   :  { %s7140_s9 = sld [smem:[%s7772_s0 + %s6944_s22]]   ;;  %s6948_s22 = smov 32  }
  0x2f   :  { %s7145_s29 = sld [smem:[%s7772_s0 + %s6945_s28]]   ;;  %s6949_s28 = smov 33  }
  0x30   :  { %7795 = sst [smem:[#allocation73_spill]] %s7150_s20 }
  0x31   :  { %7792 = sst [smem:[#allocation70_spill]] %s7135_s13 }
  0x32   :  { %s7155_s13 = sld [smem:[%s7772_s0 + %s6947_s15]]   ;;  %s6951_s15 = smov 35  }
  0x33   :  { %s7170_s20 = sld [smem:[%s7772_s0 + %s6950_s7]]  }
  0x34   :  { %7793 = sst [smem:[#allocation71_spill]] %s7140_s9 }
  0x35   :  { %7794 = sst [smem:[#allocation72_spill]] %s7145_s29 }
  0x36   :  { %s7160_s9 = sld [smem:[%s7772_s0 + %s6948_s22]]   ;;  %s6952_s22 = smov 36  }
  0x37   :  { %s7165_s29 = sld [smem:[%s7772_s0 + %s6949_s28]]   ;;  %s6953_s28 = smov 37  }
  0x38   :  { %s7175_s6 = sld [smem:[%s7772_s0 + %s6951_s15]]  }
  0x39   :  { %s7185_s24 = sld [smem:[%s7772_s0 + %s6953_s28]]  }
  0x3c   :  { %7796 = sst [smem:[#allocation74_spill]] %s7160_s9 }
  0x3d   :  { %s7180_s9 = sld [smem:[%s7772_s0 + %s6952_s22]]  }
  0x3e   :  { %81 = vsyncpa [#allocation3], 0 }
  0x3f   :  { %82 = vsyncpa [#allocation6], 0 }
  0x40   :  { %83 = vsyncpa [#allocation9], 0 }
  0x41   :  { %84 = vsyncpa [#allocation12], 0 }
  0x42   :  { %85 = vsyncpa [#allocation15], 0 }
  0x43   :  { %86 = vsyncpa [#allocation18], 0 }
  0x44   :  { %87 = vsyncpa [#allocation21], 0 }
  0x45   :  { %88 = vsyncpa [#allocation24], 0 }
  0x46   :  { %89 = vsyncpa [#allocation27], 0 }
  0x47   :  { %90 = vsyncpa [#allocation30], 0 }
  0x48   :  { %91 = vsyncpa [#allocation33], 0 }
  0x49   :  { %92 = vsyncpa [#allocation36], 0 }
  0x4a   :  { %93 = vsyncpa [#allocation39], 0 }
  0x4b   :  { %94 = vsyncpa [#allocation4], 0  ;;  %s6954_s7 = smov [#allocation5]   ;;  %s6955_s11 = smov [#allocation8]  }
  0x4c   :  { %s119_s10 = sshll.u32 %s6954_s7, 4  ;;  %s140_s15 = sshll.u32 %s6955_s11, 4  ;;  %s120_s10 = int_to_ptr.vmem [resolvable:$true] %s119_s10  ;;  %s141_s15 = int_to_ptr.vmem [resolvable:$true] %s140_s15 }
  0x4d   :  { %s6397_s0 = scalar_lea.vmem %s120_s10, 16  ;;  %s6401_s16 = scalar_lea.vmem %s120_s10, 32 }
  0x4e   :  { %p6398_p0 = scmp.ne.s32.totalorder %s120_s10, %s6397_s0  ;;  %p6402_p1 = scmp.lt.s32.totalorder %s120_s10, %s120_s10 }
  0x4f   :  { %p6403_p2 = scmp.lt.s32.totalorder %s6401_s16, %s6397_s0 }
  0x51   :  { %p6404_p3 = por %p6403_p2, %p6402_p1 }
  0x53   :  { %p6405_p4 = pnand %p6404_p3, %p6398_p0 }
  0x55   :  { %6408 = shalt.err (!%p6405_p4)
}
  0x56   :  { %122 = dma.hbm_to_vmem [thread:$0]  %s7025_s25, 16, %s120_s10, [#allocation6]  }
  0x57   :  { %s6417_s18 = scalar_lea.vmem %s141_s15, 1024  ;;  %p6422_p6 = scmp.lt.s32.totalorder %s141_s15, %s141_s15 }
  0x58   :  { %p6418_p5 = scmp.ne.s32.totalorder %s141_s15, %s6417_s18  ;;  %p6423_p7 = scmp.lt.s32.totalorder %s6417_s18, %s6417_s18 }
  0x5a   :  { %p6424_p8 = por %p6423_p7, %p6422_p6 }
  0x5c   :  { %p6425_p9 = pnand %p6424_p8, %p6418_p5 }
  0x5e   :  { %6428 = shalt.err (!%p6425_p9)
}
  0x5f   :  { %s6956_s22 = smov 64   ;;  %s6957_s23 = smov 4  }
  0x60   :  { %146 = dma.hbm_to_vmem [thread:$0]  %s7040_s8, 1024, %s141_s15, [#allocation9], %s6956_s22, %s6956_s22, %s6957_s23  }
  0x61   :  { %s6958_s26 = smov [#allocation11]   ;;  %s6959_s1 = smov [#allocation14]  }
  0x62   :  { %s163_s28 = sshll.u32 %s6958_s26, 4  ;;  %s182_s2 = sshll.u32 %s6959_s1, 4  ;;  %s164_s28 = int_to_ptr.vmem [resolvable:$true] %s163_s28  ;;  %s183_s2 = int_to_ptr.vmem [resolvable:$true] %s182_s2 }
  0x63   :  { %s6437_s25 = scalar_lea.vmem %s164_s28, 16  ;;  %s6441_s7 = scalar_lea.vmem %s164_s28, 32 }
  0x64   :  { %p6438_p10 = scmp.ne.s32.totalorder %s164_s28, %s6437_s25  ;;  %p6442_p11 = scmp.lt.s32.totalorder %s164_s28, %s164_s28 }
  0x65   :  { %p6443_p12 = scmp.lt.s32.totalorder %s6441_s7, %s6437_s25 }
  0x67   :  { %p6444_p13 = por %p6443_p12, %p6442_p11 }
  0x69   :  { %p6445_p0 = pnand %p6444_p13, %p6438_p10 }
  0x6b   :  { %6448 = shalt.err (!%p6445_p0)
}
  0x6c   :  { %166 = dma.hbm_to_vmem [thread:$0]  %s7050_s19, 16, %s164_s28, [#allocation12]  }
  0x6d   :  { %s6457_s10 = scalar_lea.vmem %s183_s2, 2048  ;;  %p6462_p2 = scmp.lt.s32.totalorder %s183_s2, %s183_s2 }
  0x6e   :  { %p6458_p1 = scmp.ne.s32.totalorder %s183_s2, %s6457_s10  ;;  %p6463_p3 = scmp.lt.s32.totalorder %s6457_s10, %s6457_s10 }
  0x70   :  { %p6464_p4 = por %p6463_p3, %p6462_p2 }
  0x72   :  { %p6465_p5 = pnand %p6464_p4, %p6458_p1 }
  0x74   :  { %6468 = shalt.err (!%p6465_p5)
}
  0x75   :  { %s6960_s8 = smov 128   ;;  %s6961_s11 = smov 8  }
  0x76   :  { %188 = dma.hbm_to_vmem [thread:$0]  %s7060_s30, 2048, %s183_s2, [#allocation15], %s6960_s8, %s6960_s8, %s6961_s11  }
  0x77   :  { %s6962_s15 = smov [#allocation17]   ;;  %s6963_s16 = smov [#allocation20]  }
  0x78   :  { %s204_s0 = sshll.u32 %s6962_s15, 4  ;;  %s227_s18 = sshll.u32 %s6963_s16, 4  ;;  %s205_s0 = int_to_ptr.vmem [resolvable:$true] %s204_s0  ;;  %s228_s18 = int_to_ptr.vmem [resolvable:$true] %s227_s18 }
  0x79   :  { %s6477_s19 = scalar_lea.vmem %s205_s0, 2048  ;;  %p6482_p7 = scmp.lt.s32.totalorder %s205_s0, %s205_s0 }
  0x7a   :  { %p6478_p6 = scmp.ne.s32.totalorder %s205_s0, %s6477_s19  ;;  %p6483_p8 = scmp.lt.s32.totalorder %s6477_s19, %s6477_s19 }
  0x7c   :  { %p6484_p9 = por %p6483_p8, %p6482_p7 }
  0x7e   :  { %p6485_p10 = pnand %p6484_p9, %p6478_p6 }
  0x80   :  { %6488 = shalt.err (!%p6485_p10)
}
  0x81   :  { %210 = dma.hbm_to_vmem [thread:$0]  %s7070_s12, 2048, %s205_s0, [#allocation18], %s6956_s22, %s6956_s22, %s6957_s23  }
  0x82   :  { %s6497_s26 = scalar_lea.vmem %s228_s18, 16  ;;  %s6501_s30 = scalar_lea.vmem %s228_s18, 32 }
  0x83   :  { %p6498_p11 = scmp.ne.s32.totalorder %s228_s18, %s6497_s26  ;;  %p6502_p12 = scmp.lt.s32.totalorder %s228_s18, %s228_s18 }
  0x84   :  { %p6503_p13 = scmp.lt.s32.totalorder %s6501_s30, %s6497_s26 }
  0x86   :  { %p6504_p0 = por %p6503_p13, %p6502_p12 }
  0x88   :  { %p6505_p1 = pnand %p6504_p0, %p6498_p11 }
  0x8a   :  { %6508 = shalt.err (!%p6505_p1)
}
  0x8b   :  { %230 = dma.hbm_to_vmem [thread:$0]  %s7080_s27, 16, %s228_s18, [#allocation21]  }
  0x8c   :  { %s6964_s28 = smov [#allocation23]  }
  0x8d   :  { %s246_s1 = sshll.u32 %s6964_s28, 4  ;;  %s247_s1 = int_to_ptr.vmem [resolvable:$true] %s246_s1 }
  0x8e   :  { %s6517_s2 = scalar_lea.vmem %s247_s1, 3072  ;;  %p6522_p3 = scmp.lt.s32.totalorder %s247_s1, %s247_s1 }
  0x8f   :  { %p6518_p2 = scmp.ne.s32.totalorder %s247_s1, %s6517_s2  ;;  %p6523_p4 = scmp.lt.s32.totalorder %s6517_s2, %s6517_s2 }
  0x91   :  { %p6524_p5 = por %p6523_p4, %p6522_p3 }
  0x93   :  { %p6525_p6 = pnand %p6524_p5, %p6518_p2 }
  0x95   :  { %6528 = shalt.err (!%p6525_p6)
}
  0x96   :  { %s6965_s12 = smov 192   ;;  %s6966_s25 = smov 12  }
  0x97   :  { %252 = dma.hbm_to_vmem [thread:$0]  %s7090_s17, 3072, %s247_s1, [#allocation24], %s6965_s12, %s6965_s12, %s6966_s25  }
  0x98   :  { %s6967_s7 = smov [#allocation26]   ;;  %s6968_s15 = smov [#allocation29]  }
  0x99   :  { %s273_s10 = sshll.u32 %s6967_s7, 4  ;;  %s298_s0 = sshll.u32 %s6968_s15, 4  ;;  %s274_s10 = int_to_ptr.vmem [resolvable:$true] %s273_s10  ;;  %s299_s0 = int_to_ptr.vmem [resolvable:$true] %s298_s0 }
  0x9a   :  { %s6537_s27 = scalar_lea.vmem %s274_s10, 16  ;;  %s6541_s16 = scalar_lea.vmem %s274_s10, 32 }
  0x9b   :  { %p6538_p7 = scmp.ne.s32.totalorder %s274_s10, %s6537_s27  ;;  %p6542_p8 = scmp.lt.s32.totalorder %s274_s10, %s274_s10 }
  0x9c   :  { %p6543_p9 = scmp.lt.s32.totalorder %s6541_s16, %s6537_s27 }
  0x9e   :  { %p6544_p10 = por %p6543_p9, %p6542_p8 }
  0xa0   :  { %p6545_p11 = pnand %p6544_p10, %p6538_p7 }
  0xa2   :  { %6548 = shalt.err (!%p6545_p11)
}
  0xa3   :  { %276 = dma.hbm_to_vmem [thread:$0]  %s7110_s5, 16, %s274_s10, [#allocation27]  }
  0xa4   :  { %s6557_s18 = scalar_lea.vmem %s299_s0, 2048  ;;  %p6562_p13 = scmp.lt.s32.totalorder %s299_s0, %s299_s0 }
  0xa5   :  { %p6558_p12 = scmp.ne.s32.totalorder %s299_s0, %s6557_s18  ;;  %p6563_p0 = scmp.lt.s32.totalorder %s6557_s18, %s6557_s18 }
  0xa7   :  { %p6564_p1 = por %p6563_p0, %p6562_p13 }
  0xa9   :  { %p6565_p2 = pnand %p6564_p1, %p6558_p12 }
  0xab   :  { %6568 = shalt.err (!%p6565_p2)
}
  0xac   :  { %304 = dma.hbm_to_vmem [thread:$0]  %s7130_s4, 2048, %s299_s0, [#allocation30], %s6956_s22, %s6956_s22, %s6957_s23  }
  0xad   :  { %s6969_s17 = smov [#allocation32]   ;;  %s6970_s26 = smov [#allocation35]  }
  0xae   :  { %s329_s19 = sshll.u32 %s6969_s17, 4  ;;  %s349_s30 = sshll.u32 %s6970_s26, 4  ;;  %s330_s19 = int_to_ptr.vmem [resolvable:$true] %s329_s19  ;;  %s350_s30 = int_to_ptr.vmem [resolvable:$true] %s349_s30 }
  0xaf   :  { %s6577_s28 = scalar_lea.vmem %s330_s19, 16  ;;  %s6581_s5 = scalar_lea.vmem %s330_s19, 32 }
  0xb0   :  { %p6578_p3 = scmp.ne.s32.totalorder %s330_s19, %s6577_s28  ;;  %p6582_p4 = scmp.lt.s32.totalorder %s330_s19, %s330_s19 }
  0xb1   :  { %p6583_p5 = scmp.lt.s32.totalorder %s6581_s5, %s6577_s28 }
  0xb3   :  { %p6584_p6 = por %p6583_p5, %p6582_p4 }
  0xb5   :  { %p6585_p7 = pnand %p6584_p6, %p6578_p3 }
  0xb7   :  { %6588 = shalt.err (!%p6585_p7)
}
  0xb8   :  { %332 = dma.hbm_to_vmem [thread:$0]  %s7155_s13, 16, %s330_s19, [#allocation33]  }
  0xb9   :  { %s6597_s1 = scalar_lea.vmem %s350_s30, 16  ;;  %s6601_s2 = scalar_lea.vmem %s350_s30, 32 }
  0xba   :  { %p6598_p8 = scmp.ne.s32.totalorder %s350_s30, %s6597_s1  ;;  %p6602_p9 = scmp.lt.s32.totalorder %s350_s30, %s350_s30 }
  0xbb   :  { %p6603_p10 = scmp.lt.s32.totalorder %s6601_s2, %s6597_s1 }
  0xbd   :  { %p6604_p11 = por %p6603_p10, %p6602_p9 }
  0xbf   :  { %p6605_p12 = pnand %p6604_p11, %p6598_p8 }
  0xc1   :  { %6608 = shalt.err (!%p6605_p12)
}
  0xc2   :  { %352 = dma.hbm_to_vmem [thread:$0]  %s7165_s29, 16, %s350_s30, [#allocation36]  }
  0xc3   :  { %s6971_s4 = smov [#allocation2]   ;;  %s6972_s25 = smov [#allocation7]  }
  0xc4   :  { %s109_s12 = sshll.u32 %s6971_s4, 4  ;;  %s131_s7 = sshll.u32 %s6972_s25, 4  ;;  %s110_s12 = int_to_ptr.vmem [resolvable:$true] %s109_s12  ;;  %s132_s7 = int_to_ptr.vmem [resolvable:$true] %s131_s7 }
  0xc5   :  { %s6617_s10 = scalar_lea.vmem %s110_s12, 16  ;;  %s6621_s15 = scalar_lea.vmem %s110_s12, 32 }
  0xc6   :  { %p6618_p13 = scmp.ne.s32.totalorder %s110_s12, %s6617_s10  ;;  %p6622_p0 = scmp.lt.s32.totalorder %s110_s12, %s110_s12 }
  0xc7   :  { %p6623_p1 = scmp.lt.s32.totalorder %s6621_s15, %s6617_s10 }
  0xc9   :  { %p6624_p2 = por %p6623_p1, %p6622_p0 }
  0xcb   :  { %p6625_p3 = pnand %p6624_p2, %p6618_p13 }
  0xcd   :  { %6628 = shalt.err (!%p6625_p3)
}
  0xce   :  { %112 = dma.hbm_to_vmem [thread:$0]  %s7020_s21, 16, %s110_s12, [#allocation3]  }
  0xcf   :  { %s6637_s13 = scalar_lea.vmem %s132_s7, 48  ;;  %s6641_s0 = scalar_lea.vmem %s132_s7, 64 }
  0xd0   :  { %p6638_p4 = scmp.ne.s32.totalorder %s132_s7, %s6637_s13  ;;  %p6642_p5 = scmp.lt.s32.totalorder %s132_s7, %s132_s7 }
  0xd1   :  { %p6643_p6 = scmp.lt.s32.totalorder %s6641_s0, %s6637_s13 }
  0xd3   :  { %p6644_p7 = por %p6643_p6, %p6642_p5 }
  0xd5   :  { %p6645_p8 = pnand %p6644_p7, %p6638_p4 }
  0xd7   :  { %6648 = shalt.err (!%p6645_p8)
}
  0xd8   :  { %134 = dma.hbm_to_vmem [thread:$0]  %s7035_s3, 48, %s132_s7, [#allocation6]  }
  0xd9   :  { %s6973_s29 = smov [#allocation10]   ;;  %s6974_s16 = smov [#allocation13]  }
  0xda   :  { %s153_s27 = sshll.u32 %s6973_s29, 4  ;;  %s173_s18 = sshll.u32 %s6974_s16, 4  ;;  %s154_s27 = int_to_ptr.vmem [resolvable:$true] %s153_s27  ;;  %s174_s18 = int_to_ptr.vmem [resolvable:$true] %s173_s18 }
  0xdb   :  { %s6657_s17 = scalar_lea.vmem %s154_s27, 16  ;;  %s6661_s19 = scalar_lea.vmem %s154_s27, 32 }
  0xdc   :  { %p6658_p9 = scmp.ne.s32.totalorder %s154_s27, %s6657_s17  ;;  %p6662_p10 = scmp.lt.s32.totalorder %s154_s27, %s154_s27 }
  0xdd   :  { %p6663_p11 = scmp.lt.s32.totalorder %s6661_s19, %s6657_s17 }
  0xdf   :  { %p6664_p12 = por %p6663_p11, %p6662_p10 }
  0xe1   :  { %p6665_p13 = pnand %p6664_p12, %p6658_p9 }
  0xe3   :  { %6668 = shalt.err (!%p6665_p13)
}
  0xe4   :  { %156 = dma.hbm_to_vmem [thread:$0]  %s7045_s14, 16, %s154_s27, [#allocation9]  }
  0xe5   :  { %s6677_s21 = scalar_lea.vmem %s174_s18, 16  ;;  %s6681_s26 = scalar_lea.vmem %s174_s18, 32 }
  0xe6   :  { %p6678_p0 = scmp.ne.s32.totalorder %s174_s18, %s6677_s21  ;;  %p6682_p1 = scmp.lt.s32.totalorder %s174_s18, %s174_s18 }
  0xe7   :  { %p6683_p2 = scmp.lt.s32.totalorder %s6681_s26, %s6677_s21 }
  0xe9   :  { %p6684_p3 = por %p6683_p2, %p6682_p1 }
  0xeb   :  { %p6685_p4 = pnand %p6684_p3, %p6678_p0 }
  0xed   :  { %6688 = shalt.err (!%p6685_p4)
}
  0xee   :  { %s7797_s3 = sld [smem:[#allocation60_spill]]  ;;  %s6975_s30 = smov [#allocation16]  }
  0xef   :  { %s195_s28 = sshll.u32 %s6975_s30, 4  ;;  %s6976_s5 = smov [#allocation19]   ;;  %s196_s28 = int_to_ptr.vmem [resolvable:$true] %s195_s28 }
  0xf0   :  { %s217_s1 = sshll.u32 %s6976_s5, 4  ;;  %s6697_s2 = scalar_lea.vmem %s196_s28, 32  ;;  %s218_s1 = int_to_ptr.vmem [resolvable:$true] %s217_s1 }
  0xf1   :  { %p6698_p5 = scmp.ne.s32.totalorder %s196_s28, %s6697_s2  ;;  %p6702_p6 = scmp.lt.s32.totalorder %s196_s28, %s196_s28 }
  0xf2   :  { %p6703_p7 = scmp.lt.s32.totalorder %s6697_s2, %s6697_s2 }
  0xf4   :  { %176 = dma.hbm_to_vmem [thread:$0]  %s7797_s3, 16, %s174_s18, [#allocation12]  }
  0xf5   :  { %p6704_p8 = por %p6703_p7, %p6702_p6 }
  0xf7   :  { %p6705_p9 = pnand %p6704_p8, %p6698_p5 }
  0xf9   :  { %6708 = shalt.err (!%p6705_p9)
}
  0xfa   :  { %s7798_s14 = sld [smem:[#allocation61_spill]]  ;;  %s6717_s4 = scalar_lea.vmem %s218_s1, 16 }
  0xfb   :  { %p6718_p10 = scmp.ne.s32.totalorder %s218_s1, %s6717_s4  ;;  %s6721_s12 = scalar_lea.vmem %s218_s1, 32 }
  0xfc   :  { %p6722_p11 = scmp.lt.s32.totalorder %s218_s1, %s218_s1  ;;  %p6723_p12 = scmp.lt.s32.totalorder %s6721_s12, %s6717_s4 }
  0xfe   :  { %p6724_p13 = por %p6723_p12, %p6722_p11 }
 0x100   :  { %198 = dma.hbm_to_vmem [thread:$0]  %s7798_s14, 32, %s196_s28, [#allocation15]  }
 0x101   :  { %p6725_p0 = pnand %p6724_p13, %p6718_p10 }
 0x103   :  { %6728 = shalt.err (!%p6725_p0)
}
 0x104   :  { %s7799_s25 = sld [smem:[#allocation62_spill]]  ;;  %s6977_s7 = smov [#allocation22]  }
 0x105   :  { %s237_s10 = sshll.u32 %s6977_s7, 4  ;;  %s6978_s15 = smov [#allocation25]   ;;  %s238_s10 = int_to_ptr.vmem [resolvable:$true] %s237_s10 }
 0x106   :  { %s263_s13 = sshll.u32 %s6978_s15, 4  ;;  %s6737_s0 = scalar_lea.vmem %s238_s10, 16  ;;  %s264_s13 = int_to_ptr.vmem [resolvable:$true] %s263_s13 }
 0x107   :  { %p6738_p1 = scmp.ne.s32.totalorder %s238_s10, %s6737_s0  ;;  %s6741_s29 = scalar_lea.vmem %s238_s10, 32 }
 0x108   :  { %p6742_p2 = scmp.lt.s32.totalorder %s238_s10, %s238_s10  ;;  %p6743_p3 = scmp.lt.s32.totalorder %s6741_s29, %s6737_s0 }
 0x10a   :  { %220 = dma.hbm_to_vmem [thread:$0]  %s7799_s25, 16, %s218_s1, [#allocation18]  }
 0x10b   :  { %p6744_p4 = por %p6743_p3, %p6742_p2 }
 0x10d   :  { %p6745_p5 = pnand %p6744_p4, %p6738_p1 }
 0x10f   :  { %6748 = shalt.err (!%p6745_p5)
}
 0x110   :  { %s7800_s27 = sld [smem:[#allocation63_spill]]  ;;  %s6757_s16 = scalar_lea.vmem %s264_s13, 16 }
 0x111   :  { %p6758_p6 = scmp.ne.s32.totalorder %s264_s13, %s6757_s16  ;;  %s6761_s18 = scalar_lea.vmem %s264_s13, 32 }
 0x112   :  { %p6762_p7 = scmp.lt.s32.totalorder %s264_s13, %s264_s13  ;;  %p6763_p8 = scmp.lt.s32.totalorder %s6761_s18, %s6757_s16 }
 0x114   :  { %p6764_p9 = por %p6763_p8, %p6762_p7 }
 0x116   :  { %240 = dma.hbm_to_vmem [thread:$0]  %s7800_s27, 16, %s238_s10, [#allocation21]  }
 0x117   :  { %p6765_p10 = pnand %p6764_p9, %p6758_p6 }
 0x119   :  { %6768 = shalt.err (!%p6765_p10)
}
 0x11a   :  { %s7801_s17 = sld [smem:[#allocation66_spill]]  ;;  %s6979_s19 = smov [#allocation28]  }
 0x11b   :  { %s284_s21 = sshll.u32 %s6979_s19, 4  ;;  %s6980_s26 = smov [#allocation31]   ;;  %s285_s21 = int_to_ptr.vmem [resolvable:$true] %s284_s21 }
 0x11c   :  { %s316_s3 = sshll.u32 %s6980_s26, 4  ;;  %s6777_s30 = scalar_lea.vmem %s285_s21, 2048  ;;  %s317_s3 = int_to_ptr.vmem [resolvable:$true] %s316_s3 }
 0x11d   :  { %p6778_p11 = scmp.ne.s32.totalorder %s285_s21, %s6777_s30  ;;  %p6782_p12 = scmp.lt.s32.totalorder %s285_s21, %s285_s21 }
 0x11e   :  { %p6783_p13 = scmp.lt.s32.totalorder %s6777_s30, %s6777_s30 }
 0x120   :  { %266 = dma.hbm_to_vmem [thread:$0]  %s7801_s17, 16, %s264_s13, [#allocation24]  }
 0x121   :  { %p6784_p0 = por %p6783_p13, %p6782_p12 }
 0x123   :  { %p6785_p1 = pnand %p6784_p0, %p6778_p11 }
 0x125   :  { %6788 = shalt.err (!%p6785_p1)
}
 0x126   :  { %s7802_s28 = sld [smem:[#allocation68_spill]]  ;;  %s6797_s5 = scalar_lea.vmem %s317_s3, 1024 }
 0x127   :  { %p6798_p2 = scmp.ne.s32.totalorder %s317_s3, %s6797_s5  ;;  %p6802_p3 = scmp.lt.s32.totalorder %s317_s3, %s317_s3 }
 0x128   :  { %p6803_p4 = scmp.lt.s32.totalorder %s6797_s5, %s6797_s5 }
 0x12a   :  { %p6804_p5 = por %p6803_p4, %p6802_p3 }
 0x12c   :  { %290 = dma.hbm_to_vmem [thread:$0]  %s7802_s28, 2048, %s285_s21, [#allocation27], %s6960_s8, %s6960_s8, %s6961_s11  }
 0x12d   :  { %p6805_p6 = pnand %p6804_p5, %p6798_p2 }
 0x12f   :  { %6808 = shalt.err (!%p6805_p6)
}
 0x130   :  { %s7803_s1 = sld [smem:[#allocation73_spill]]  ;;  %s6981_s2 = smov [#allocation34]  }
 0x131   :  { %s339_s14 = sshll.u32 %s6981_s2, 4  ;;  %s6982_s4 = smov [#allocation37]   ;;  %s340_s14 = int_to_ptr.vmem [resolvable:$true] %s339_s14 }
 0x132   :  { %s358_s12 = sshll.u32 %s6982_s4, 4  ;;  %s6817_s25 = scalar_lea.vmem %s340_s14, 128  ;;  %s359_s12 = int_to_ptr.vmem [resolvable:$true] %s358_s12 }
 0x133   :  { %p6818_p7 = scmp.ne.s32.totalorder %s340_s14, %s6817_s25  ;;  %p6822_p8 = scmp.lt.s32.totalorder %s340_s14, %s340_s14 }
 0x134   :  { %p6823_p9 = scmp.lt.s32.totalorder %s6817_s25, %s6817_s25 }
 0x136   :  { %322 = dma.hbm_to_vmem [thread:$0]  %s7803_s1, 1024, %s317_s3, [#allocation30], %s6956_s22, %s6956_s22, %s6957_s23  }
 0x137   :  { %p6824_p10 = por %p6823_p9, %p6822_p8 }
 0x139   :  { %p6825_p11 = pnand %p6824_p10, %p6818_p7 }
 0x13b   :  { %6828 = shalt.err (!%p6825_p11)
}
 0x13c   :  { %s7804_s8 = sld [smem:[#allocation74_spill]]  ;;  %s6837_s11 = scalar_lea.vmem %s359_s12, 1024 }
 0x13d   :  { %p6838_p12 = scmp.ne.s32.totalorder %s359_s12, %s6837_s11  ;;  %p6842_p13 = scmp.lt.s32.totalorder %s359_s12, %s359_s12 }
 0x13e   :  { %p6843_p0 = scmp.lt.s32.totalorder %s6837_s11, %s6837_s11 }
 0x140   :  { %p6844_p1 = por %p6843_p0, %p6842_p13 }
 0x142   :  { %342 = dma.hbm_to_vmem [thread:$0]  %s7804_s8, 128, %s340_s14, [#allocation33]  }
 0x143   :  { %p6845_p2 = pnand %p6844_p1, %p6838_p12 }
 0x145   :  { %6848 = shalt.err (!%p6845_p2)
}
 0x146   :  { %364 = dma.hbm_to_vmem [thread:$0]  %s7170_s20, 1024, %s359_s12, [#allocation36], %s6956_s22, %s6956_s22, %s6957_s23  }
 0x147   :  { %s6983_s7 = smov [#allocation38]  }
 0x148   :  { %s371_s10 = sshll.u32 %s6983_s7, 4  ;;  %s372_s10 = int_to_ptr.vmem [resolvable:$true] %s371_s10 }
 0x149   :  { %s6857_s15 = scalar_lea.vmem %s372_s10, 16  ;;  %s6861_s13 = scalar_lea.vmem %s372_s10, 32 }
 0x14a   :  { %p6858_p3 = scmp.ne.s32.totalorder %s372_s10, %s6857_s15  ;;  %p6862_p4 = scmp.lt.s32.totalorder %s372_s10, %s372_s10 }
 0x14b   :  { %p6863_p5 = scmp.lt.s32.totalorder %s6861_s13, %s6857_s15 }
 0x14d   :  { %p6864_p6 = por %p6863_p5, %p6862_p4 }
 0x14f   :  { %p6865_p7 = pnand %p6864_p6, %p6858_p3 }
 0x151   :  { %6868 = shalt.err (!%p6865_p7)
}
 0x152   :  { %374 = dma.hbm_to_vmem [thread:$0]  %s7175_s6, 16, %s372_s10, [#allocation39]  }
 0x153   :  { %6889 = dma.done.wait [#allocation3], 16  }
 0x154   :  { %6890 = vsyncadd [#allocation3], 4294967280 }
 0x155   :  { %6891 = dma.done.wait [#allocation6], 64  }
 0x156   :  { %6892 = vsyncadd [#allocation6], 4294967232 }
 0x157   :  { %6893 = dma.done.wait [#allocation9], 1040  }
 0x158   :  { %6894 = vsyncadd [#allocation9], 4294966256 }
 0x159   :  { %6895 = dma.done.wait [#allocation12], 32  }
 0x15a   :  { %6896 = vsyncadd [#allocation12], 4294967264 }
 0x15b   :  { %6897 = dma.done.wait [#allocation15], 2080  }
 0x15c   :  { %6898 = vsyncadd [#allocation15], 4294965216 }
 0x15d   :  { %6899 = dma.done.wait [#allocation18], 2064  }
 0x15e   :  { %6900 = vsyncadd [#allocation18], 4294965232 }
 0x15f   :  { %6901 = dma.done.wait [#allocation21], 32  }
 0x160   :  { %6902 = vsyncadd [#allocation21], 4294967264 }
 0x161   :  { %6903 = dma.done.wait [#allocation24], 3088  }
 0x162   :  { %6904 = vsyncadd [#allocation24], 4294964208 }
 0x163   :  { %6905 = dma.done.wait [#allocation27], 2064  }
 0x164   :  { %6906 = vsyncadd [#allocation27], 4294965232 }
 0x165   :  { %6907 = dma.done.wait [#allocation30], 3072  }
 0x166   :  { %6908 = vsyncadd [#allocation30], 4294964224 }
 0x167   :  { %6909 = dma.done.wait [#allocation33], 144  }
 0x168   :  { %6910 = vsyncadd [#allocation33], 4294967152 }
 0x169   :  { %6911 = dma.done.wait [#allocation36], 1040  }
 0x16a   :  { %6912 = vsyncadd [#allocation36], 4294966256 }
 0x16b   :  { %6913 = dma.done.wait [#allocation39], 16  }
 0x16c   :  { %6914 = vsyncadd [#allocation39], 4294967280  ;;  %s7805_s6 = sld [smem:[#allocation55_spill]]  ;;  %v6984_v4 = vmov 0.0   ;;  %v6985_v27 = vmov 0   ;;  %vm6986_vm0 = vmmov 0   ;;  %v527_v53 = vlaneseq }
 0x16d   :  { %s7806_s20 = sld [smem:[#allocation59_spill]]  ;;  %5709 = vmatprep.subr.bf16.mxu1 %v6984_v4  ;;  %702 = vmatprep.mubr.bf16.mxu0 %v6985_v27  ;;  %v5335_v44 = vld [vmem:[#allocation2] ss:$0 sm:$0xff]  ;;  %v5336_v48 = vld [vmem:[#allocation5] ss:$0 sm:$0xff]  ;;  %vm754_vm1 = vcmask 261120  }
 0x16e   :  { %5725 = vmatprep.mubr.msk.bf16.mxu1 %vm6986_vm0, %v6984_v4  ;;  %v7291_v54 = vshrl.u32 %v527_v53, 7  ;;  %v525_v56 = vld [vmem:[#allocation7] sm:$0x7]  ;;  %s7807_s23 = sld [smem:[#allocation56_spill]]  ;;  %vm837_vm2 = vcmask 64512   ;;  %s6987_s0 = smov 96  }
 0x16f   :  { %s6988_s29 = smov 32   ;;  %vm1437_vm3 = vcmask 523264   ;;  %vm1439_vm4 = vcmask 785408   ;;  %s7808_s27 = sld [smem:[#allocation64_spill]]  ;;  %vm5249_vm5 = vcmask 7168   ;;  %vm5265_vm6 = vcmask 0  }
 0x170   :  { %v7294_v55 = vsub.s32 1, %v7291_v54  ;;  %v7297_v57 = vsub.s32 0, %v7291_v54  ;;  %v537_v58 = vsub.s32 2, %v7291_v54  ;;  %s7809_s16 = sld [smem:[#allocation65_spill]]  ;;  %s6989_s3 = smov 127  }
 0x171   :  { %s7811_s18 = sld [smem:[#allocation69_spill]]  ;;  %s6990_s30 = smov 1  }
 0x172   :  { %v449_v0 = vld [vmem:[%s7805_s6] sm:$0xff]  ;;  %v450_v1 = vld [vmem:[%s7805_s6 + $0x8] sm:$0xff]  ;;  %v7301_v59 = vrot.slane %v525_v56, %v7294_v55  ;;  %v530_v62 = vrot.slane %v525_v56, %v7297_v57  ;;  %s7812_s17 = sld [smem:[#allocation70_spill]]  ;;  %s6991_s28 = smov [#allocation40]  }
 0x173   :  { %453 = vadd.xlane.f32.xlu0 %v449_v0  ;;  %v6101_v2 = vld [vmem:[%s7806_s20 + $0xac] ss:$12 sps:$4 sm:$0xff]   ;;  %v6103_v3 = vld [vmem:[%s7806_s20 + $0xa8] ss:$12 sps:$4 sm:$0xff]   ;;  %v6104_v5 = vld [vmem:[%s7806_s20 + $0xb0] ss:$12 sps:$4 sm:$0xff]  }
 0x174   :  { %670 = vmatprep.subr.bf16.mxu0 %v6101_v2  ;;  %5710 = vmatpush3.bf16.msra.mxu1 %v6104_v5  ;;  %v6105_v14 = vld [vmem:[%s7806_s20 + $0x94] ss:$12 sps:$4 sm:$0xff]   ;;  %v6107_v15 = vld [vmem:[%s7806_s20 + $0x90] ss:$12 sps:$4 sm:$0xff]   ;;  %v6108_v16 = vld [vmem:[%s7806_s20 + $0x98] ss:$12 sps:$4 sm:$0xff]  }
 0x175   :  { %671 = vmatpush1.bf16.msra.mxu0 %v6103_v3  ;;  %5711 = vmatprep.subr.bf16.mxu1 %v6984_v4  ;;  %v6109_v17 = vld [vmem:[%s7806_s20 + $0x7c] ss:$12 sps:$4 sm:$0xff]   ;;  %v6111_v18 = vld [vmem:[%s7806_s20 + $0x78] ss:$12 sps:$4 sm:$0xff]   ;;  %v6112_v19 = vld [vmem:[%s7806_s20 + $0x80] ss:$12 sps:$4 sm:$0xff]  }
 0x176   :  { %672 = vmatprep.subr.bf16.mxu0 %v6105_v14  ;;  %v6113_v20 = vld [vmem:[%s7806_s20 + $0x64] ss:$12 sps:$4 sm:$0xff]   ;;  %v6115_v21 = vld [vmem:[%s7806_s20 + $0x60] ss:$12 sps:$4 sm:$0xff]   ;;  %v6116_v22 = vld [vmem:[%s7806_s20 + $0x68] ss:$12 sps:$4 sm:$0xff]  }
 0x177   :  { %455 = vadd.xlane.f32.xlu0 %v450_v1  ;;  %v6117_v23 = vld [vmem:[%s7806_s20 + $0x4c] ss:$12 sps:$4 sm:$0xff]   ;;  %v6119_v24 = vld [vmem:[%s7806_s20 + $0x48] ss:$12 sps:$4 sm:$0xff]   ;;  %v6120_v25 = vld [vmem:[%s7806_s20 + $0x50] ss:$12 sps:$4 sm:$0xff]  }
 0x178   :  { %5712 = vmatpush3.bf16.msra.mxu1 %v6108_v16  ;;  %v6121_v26 = vld [vmem:[%s7806_s20 + $0x34] ss:$12 sps:$4 sm:$0xff]   ;;  %v6123_v28 = vld [vmem:[%s7806_s20 + $0x30] ss:$12 sps:$4 sm:$0xff]   ;;  %v6124_v29 = vld [vmem:[%s7806_s20 + $0x38] ss:$12 sps:$4 sm:$0xff]  }
 0x179   :  { %673 = vmatpush1.bf16.msra.mxu0 %v6107_v15  ;;  %5713 = vmatprep.subr.bf16.mxu1 %v6984_v4  ;;  %v6125_v30 = vld [vmem:[%s7806_s20 + $0x1c] ss:$12 sps:$4 sm:$0xff]   ;;  %v6127_v31 = vld [vmem:[%s7806_s20 + $0x18] ss:$12 sps:$4 sm:$0xff]   ;;  %v6128_v32 = vld [vmem:[%s7806_s20 + $0x20] ss:$12 sps:$4 sm:$0xff]  }
 0x17a   :  { %674 = vmatprep.subr.bf16.mxu0 %v6109_v17  ;;  %v6129_v33 = vld [vmem:[%s7806_s20 + $0x4] ss:$12 sps:$4 sm:$0xff]   ;;  %v6131_v34 = vld [vmem:[%s7806_s20] ss:$12 sps:$4 sm:$0xff]   ;;  %v6132_v35 = vld [vmem:[%s7806_s20 + $0x8] ss:$12 sps:$4 sm:$0xff]  }
 0x17b   :  { %s7813_s19 = sld [smem:[#allocation57_spill]]  ;;  %s5275_s5 = sshll.u32 %s6991_s28, 4  ;;  %s5276_s5 = int_to_ptr.vmem [resolvable:$true] %s5275_s5 }
 0x17c   :  { %5714 = vmatpush3.bf16.msra.mxu1 %v6112_v19  ;;  %s7814_s21 = sld [smem:[#allocation71_spill]]  ;;  %s6869_s2 = scalar_lea.vmem %s5276_s5, 16 }
 0x17d   :  { %675 = vmatpush1.bf16.msra.mxu0 %v6111_v18  ;;  %5715 = vmatprep.subr.bf16.mxu1 %v6984_v4  ;;  %s7815_s26 = sld [smem:[#allocation72_spill]]  ;;  %p6870_p8 = scmp.ne.s32.totalorder %s5276_s5, %s6869_s2 }
 0x17e   :  { %676 = vmatprep.subr.bf16.mxu0 %v6113_v20  ;;  %s6873_s14 = scalar_lea.vmem %s5276_s5, 32  ;;  %p6874_p9 = scmp.lt.s32.totalorder %s5276_s5, %s5276_s5 }
 0x17f   :  { %p6875_p10 = scmp.lt.s32.totalorder %s6873_s14, %s6869_s2 }
 0x180   :  { %5716 = vmatpush3.bf16.msra.mxu1 %v6116_v22 }
 0x181   :  { %677 = vmatpush1.bf16.msra.mxu0 %v6115_v21  ;;  %5717 = vmatprep.subr.bf16.mxu1 %v6984_v4  ;;  %p6876_p11 = por %p6875_p10, %p6874_p9 }
 0x182   :  { %678 = vmatprep.subr.bf16.mxu0 %v6117_v23 }
 0x183   :  { %p6877_p12 = pnand %p6876_p11, %p6870_p8 }
 0x184   :  { %5718 = vmatpush3.bf16.msra.mxu1 %v6120_v25 }
 0x185   :  { %679 = vmatpush1.bf16.msra.mxu0 %v6119_v24  ;;  %5719 = vmatprep.subr.bf16.mxu1 %v6984_v4 }
 0x186   :  { %680 = vmatprep.subr.bf16.mxu0 %v6121_v26 }
 0x188   :  { %5720 = vmatpush3.bf16.msra.mxu1 %v6124_v29 }
 0x189   :  { %681 = vmatpush1.bf16.msra.mxu0 %v6123_v28  ;;  %5721 = vmatprep.subr.bf16.mxu1 %v6984_v4 }
 0x18a   :  { %682 = vmatprep.subr.bf16.mxu0 %v6125_v30 }
 0x18c   :  { %5722 = vmatpush3.bf16.msra.mxu1 %v6128_v32 }
 0x18d   :  { %683 = vmatpush1.bf16.msra.mxu0 %v6127_v31  ;;  %5723 = vmatprep.subr.bf16.mxu1 %v6984_v4 }
 0x18e   :  { %684 = vmatprep.subr.bf16.mxu0 %v6129_v33 }
 0x190   :  { %5724 = vmatpush3.bf16.msra.mxu1 %v6132_v35 }
 0x191   :  { %685 = vmatpush1.bf16.msra.mxu0 %v6131_v34  ;;  %5764 = vmatprep.subr.mxu1 %v6984_v4 }
 0x192   :  { %5729 = vmatprep.subr.mxu0 %v6984_v4 }
 0x1fc   :  { %v454_v6 = vpop.xlane.xlu0 %453 }
 0x1fd   :  { %v458_v7 = vmul.f32 0.0078125, %v454_v6 }
 0x1ff   :  { %v7239_v8 = vsub.f32 %v449_v0, %v458_v7 }
 0x200   :  { %v456_v9 = vpop.xlane.xlu0 %455 }
 0x201   :  { %v459_v10 = vmul.f32 0.0078125, %v456_v9  ;;  %v462_v11 = vmul.f32 %v7239_v8, %v7239_v8 }
 0x203   :  { %v7243_v12 = vsub.f32 %v450_v1, %v459_v10  ;;  %464 = vadd.xlane.f32.xlu1 %v462_v11  ;;  %v538_v1 = vrot.slane %v525_v56, %v537_v58  ;;  %v7327_v11 = vld [vmem:[%s7807_s23] sm:$0x3] }
 0x205   :  { %v463_v13 = vmul.f32 %v7243_v12, %v7243_v12 }
 0x207   :  { %466 = vadd.xlane.f32.xlu1 %v463_v13  ;;  %v7333_v13 = vrot.slane %v7327_v11, %v7297_v57 }
 0x28c   :  { %v465_v36 = vpop.xlane.xlu1 %464 }
 0x28d   :  { %v468_v37 = vmul.f32 0.0078125, %v465_v36 }
 0x28f   :  { %v470_v38 = vadd.f32 1e-12, %v468_v37 }
 0x290   :  { %v467_v39 = vpop.xlane.xlu1 %466 }
 0x291   :  { %6277 = vrsqrt.f32 %v470_v38  ;;  %v469_v40 = vmul.f32 0.0078125, %v467_v39 }
 0x293   :  { %v471_v41 = vadd.f32 1e-12, %v469_v40 }
 0x295   :  { %6279 = vrsqrt.f32 %v471_v41 }
 0x29e   :  { %v6278_v42 = vpop.eup %6277 }
 0x29f   :  { %v474_v43 = vmul.f32 %v6278_v42, %v7239_v8 }
 0x2a1   :  { %v482_v47 = vmul.f32 %v5335_v44, %v474_v43 }
 0x2a2   :  { %v6280_v45 = vpop.eup %6279 }
 0x2a3   :  { %v475_v46 = vmul.f32 %v6280_v45, %v7243_v12  ;;  %v7281_v50 = vadd.f32 %v5336_v48, %v482_v47 }
 0x2a5   :  { %v483_v49 = vmul.f32 %v5335_v44, %v475_v46 }
 0x2a7   :  { %v7283_v51 = vadd.f32 %v5336_v48, %v483_v49 }
 0x2a9   :  { %v492_v52 = vpack.c.bf16 %v7283_v51, %v7281_v50 }
 0x2ab   :  { %703 = vmatmul.mubr.bf16.vlgmr.msra.gmra.mxu0 %v492_v52  ;;  %5726 = vmatmul.mubr.bf16.vlgmr.msra.gmra.mxu1 %v492_v52 }
 0x2ac   :  { %5731 = vmatprep.mubr.msk.f32.mxu0 %vm6986_vm0, %v6984_v4  ;;  %5766 = vmatprep.mubr.msk.f32.mxu1 %vm6986_vm0, %v6984_v4 }
 0x36b   :  { %v704_v60 = vpop.f32.mrf.mxu0  ;;  %v747_v61 = vpop.f32.mrf.mxu1 }
 0x36c   :  { %v7315_v8 = vadd.f32 %v704_v60, %v530_v62  ;;  %v7318_v10 = vadd.f32 %v747_v61, %v538_v1 }
 0x36d   :  { %v706_v63 = vpop.f32.mrf.mxu0  ;;  %v5727_v0 = vpop.f32.mrf.mxu1 }
 0x36e   :  { %v7307_v2 = vadd.f32 %v706_v63, %v7301_v59 }
 0x36f   :  { %v708_v3 = vpop.f32.mrf.mxu0  ;;  %v750_v5 = vpop.f32.mrf.mxu1 }
 0x370   :  { %v7309_v6 = vadd.f32 %v708_v3, %v530_v62  ;;  %v7311_v7 = vadd.f32 %v750_v5, %v538_v1  ;;  %5730 = vmatpush3.xpose.msk.msra.mxu0 %vm754_vm1, %v7307_v2 }
 0x371   :  { %v5728_v9 = vpop.f32.mrf.mxu1  ;;  %5734 = vmatprep.subr.mxu0 %v6984_v4  ;;  %v7329_v12 = vpop.f32.mrf.mxu0 }
 0x373   :  { %5732 = vmatmul.mubr.msk.f32.vlgmr.msra.gmra.mxu0 %vm754_vm1, %v7315_v8 }
 0x374   :  { %5735 = vmatpush3.msra.mxu0 %v7318_v10  ;;  %5736 = vmatprep.mubr.msk.f32.mxu0 %vm6986_vm0, %v6984_v4 }
 0x375   :  { %5739 = vmatprep.subr.mxu0 %v6984_v4 }
 0x433   :  { %v827_v14 = vpop.f32.mrf.mxu0 }
 0x434   :  { %v831_v15 = vmul.f32 0.17677669, %v827_v14 }
 0x435   :  { %v5733_v16 = vpop.f32.mrf.mxu0 }
 0x436   :  { %v836_v17 = vadd.f32 %v7333_v13, %v831_v15 }
 0x438   :  { %v838_v18 = vsel %vm837_vm2, %v836_v17, -inf }
 0x439   :  { %839 = vmax.xlane.f32.xlu0 %v838_v18 }
 0x44f   :  { %924 = vrot.lane.b32.xlu0 %v7307_v2, %s6987_s0 }
 0x4c2   :  { %v840_v19 = vpop.xlane.xlu0 %839 }
 0x4c3   :  { %v841_v20 = vsub.f32 %v836_v17, %v840_v19 }
 0x4c5   :  { %v842_v21 = vmul.f32 1.442695, %v841_v20 }
 0x4c6   :  { %v925_v28 = vpop.permute.xlu0 %924 }
 0x4c7   :  { %6281 = vpow2.f32 %v842_v21 }
 0x4d4   :  { %v6282_v22 = vpop.eup %6281 }
 0x4d5   :  { %v844_v23 = vsel %vm837_vm2, %v6282_v22, 0.0 }
 0x4d6   :  { %845 = vadd.xlane.f32.xlu1 %v844_v23 }
 0x4e7   :  { %922 = vrot.lane.b32.xlu1 %v7315_v8, %s6987_s0 }
 0x55f   :  { %v846_v24 = vpop.xlane.xlu1 %845 }
 0x560   :  { %6283 = vrcp.f32 %v846_v24 }
 0x563   :  { %v923_v29 = vpop.permute.xlu1 %922 }
 0x56d   :  { %v6284_v25 = vpop.eup %6283 }
 0x56e   :  { %v848_v26 = vmul.f32 %v6284_v25, %v6282_v22 }
 0x570   :  { %5737 = vmatmul.mubr.msk.f32.vlgmr.msra.gmra.mxu0 %vm837_vm2, %v848_v26  ;;  %v7427_v26 = vrot.slane %v7327_v11, %v7294_v55 }
 0x571   :  { %5740 = vmatpush3.xpose.msk.msra.mxu0 %vm754_vm1, %v925_v28  ;;  %5741 = vmatprep.mubr.msk.f32.mxu0 %vm6986_vm0, %v6984_v4 }
 0x572   :  { %5744 = vmatprep.subr.mxu0 %v6984_v4 }
 0x574   :  { %5742 = vmatmul.mubr.msk.f32.vlgmr.msra.gmra.mxu0 %vm754_vm1, %v923_v29 }
 0x575   :  { %5746 = vmatprep.mubr.msk.f32.mxu0 %vm6986_vm0, %v6984_v4 }
 0x630   :  { %v7350_v30 = vpop.f32.mrf.mxu0 }
 0x632   :  { %v5738_v31 = vpop.f32.mrf.mxu0 }
 0x634   :  { %v996_v32 = vpop.f32.mrf.mxu0 }
 0x635   :  { %v1000_v33 = vmul.f32 0.17677669, %v996_v32 }
 0x636   :  { %v5743_v34 = vpop.f32.mrf.mxu0 }
 0x637   :  { %v1001_v35 = vadd.f32 %v1000_v33, %v7333_v13 }
 0x639   :  { %v1002_v36 = vsel %vm837_vm2, %v1001_v35, -inf }
 0x63a   :  { %1003 = vmax.xlane.f32.xlu1 %v1002_v36 }
 0x64b   :  { %1092 = vrot.lane.b32.xlu1 %v7307_v2, %s6956_s22 }
 0x64f   :  { %1090 = vrot.lane.b32.xlu1 %v7315_v8, %s6956_s22 }
 0x6c3   :  { %v1004_v37 = vpop.xlane.xlu1 %1003 }
 0x6c4   :  { %v1005_v38 = vsub.f32 %v1001_v35, %v1004_v37 }
 0x6c6   :  { %v1006_v39 = vmul.f32 1.442695, %v1005_v38 }
 0x6c7   :  { %v1093_v45 = vpop.permute.xlu1 %1092 }
 0x6c8   :  { %6285 = vpow2.f32 %v1006_v39 }
 0x6cb   :  { %v1091_v47 = vpop.permute.xlu1 %1090 }
 0x6d5   :  { %v6286_v40 = vpop.eup %6285 }
 0x6d6   :  { %v1008_v41 = vsel %vm837_vm2, %v6286_v40, 0.0 }
 0x6d7   :  { %1009 = vadd.xlane.f32.xlu0 %v1008_v41 }
 0x6ed   :  { %1014 = vrot.lane.b32.xlu0 %v7318_v10, %s6987_s0 }
 0x760   :  { %v1010_v42 = vpop.xlane.xlu0 %1009 }
 0x761   :  { %6287 = vrcp.f32 %v1010_v42 }
 0x764   :  { %v1015_v43 = vpop.permute.xlu0 %1014 }
 0x765   :  { %5745 = vmatpush3.msra.mxu0 %v1015_v43 }
 0x766   :  { %5749 = vmatprep.subr.mxu0 %v6984_v4 }
 0x76e   :  { %v6288_v44 = vpop.eup %6287 }
 0x76f   :  { %v1012_v46 = vmul.f32 %v6288_v44, %v6286_v40 }
 0x771   :  { %5747 = vmatmul.mubr.msk.f32.vlgmr.msra.gmra.mxu0 %vm837_vm2, %v1012_v46 }
 0x772   :  { %5750 = vmatpush3.xpose.msk.msra.mxu0 %vm754_vm1, %v1093_v45  ;;  %5751 = vmatprep.mubr.msk.f32.mxu0 %vm6986_vm0, %v6984_v4 }
 0x773   :  { %5754 = vmatprep.subr.mxu0 %v6984_v4 }
 0x775   :  { %5752 = vmatmul.mubr.msk.f32.vlgmr.msra.gmra.mxu0 %vm754_vm1, %v1091_v47 }
 0x776   :  { %5756 = vmatprep.mubr.msk.f32.mxu0 %vm6986_vm0, %v6984_v4 }
 0x831   :  { %v7370_v48 = vpop.f32.mrf.mxu0 }
 0x833   :  { %v5748_v49 = vpop.f32.mrf.mxu0 }
 0x835   :  { %v1164_v52 = vpop.f32.mrf.mxu0 }
 0x836   :  { %v1168_v53 = vmul.f32 0.17677669, %v1164_v52 }
 0x837   :  { %v5753_v56 = vpop.f32.mrf.mxu0 }
 0x838   :  { %v1169_v60 = vadd.f32 %v1168_v53, %v7333_v13 }
 0x83a   :  { %v1170_v61 = vsel %vm837_vm2, %v1169_v60, -inf }
 0x83b   :  { %1171 = vmax.xlane.f32.xlu1 %v1170_v61 }
 0x84c   :  { %1259 = vrot.lane.b32.xlu1 %v7307_v2, %s6988_s29  ;;  %v711_v2 = vadd.f32 %v7329_v12, %v7301_v59 }
 0x850   :  { %1257 = vrot.lane.b32.xlu1 %v7315_v8, %s6988_s29 }
 0x854   :  { %1607 = vrot.lane.b32.xlu1 %v7309_v6, %s6987_s0 }
 0x858   :  { %1775 = vrot.lane.b32.xlu1 %v7309_v6, %s6956_s22 }
 0x85c   :  { %1942 = vrot.lane.b32.xlu1 %v7309_v6, %s6988_s29 }
 0x8c4   :  { %v1172_v62 = vpop.xlane.xlu1 %1171 }
 0x8c5   :  { %v1173_v63 = vsub.f32 %v1169_v60, %v1172_v62 }
 0x8c7   :  { %v1174_v0 = vmul.f32 1.442695, %v1173_v63 }
 0x8c8   :  { %v1260_v9 = vpop.permute.xlu1 %1259 }
 0x8c9   :  { %6289 = vpow2.f32 %v1174_v0 }
 0x8cc   :  { %v1258_v16 = vpop.permute.xlu1 %1257 }
 0x8d0   :  { %v1608_v12 = vpop.permute.xlu1 %1607 }
 0x8d4   :  { %v1776_v18 = vpop.permute.xlu1 %1775 }
 0x8d6   :  { %v6290_v1 = vpop.eup %6289 }
 0x8d7   :  { %v1176_v3 = vsel %vm837_vm2, %v6290_v1, 0.0 }
 0x8d8   :  { %1177 = vadd.xlane.f32.xlu0 %v1176_v3 }
 0x8ee   :  { %1181 = vrot.lane.b32.xlu0 %v7318_v10, %s6956_s22 }
 0x8f2   :  { %1609 = vrot.lane.b32.xlu0 %v711_v2, %s6987_s0 }
 0x8f6   :  { %1777 = vrot.lane.b32.xlu0 %v711_v2, %s6956_s22 }
 0x8fa   :  { %1944 = vrot.lane.b32.xlu0 %v711_v2, %s6988_s29 }
 0x961   :  { %v1178_v5 = vpop.xlane.xlu0 %1177 }
 0x962   :  { %6291 = vrcp.f32 %v1178_v5 }
 0x965   :  { %v1182_v8 = vpop.permute.xlu0 %1181 }
 0x966   :  { %5755 = vmatpush3.msra.mxu0 %v1182_v8 }
 0x967   :  { %5759 = vmatprep.subr.mxu0 %v6984_v4 }
 0x969   :  { %v1610_v59 = vpop.permute.xlu0 %1609 }
 0x96d   :  { %v1778_v17 = vpop.permute.xlu0 %1777 }
 0x96f   :  { %v6292_v14 = vpop.eup %6291 }
 0x970   :  { %v1180_v15 = vmul.f32 %v6292_v14, %v6290_v1 }
 0x971   :  { %v1945_v19 = vpop.permute.xlu0 %1944 }
 0x972   :  { %5757 = vmatmul.mubr.msk.f32.vlgmr.msra.gmra.mxu0 %vm837_vm2, %v1180_v15 }
 0x973   :  { %5760 = vmatpush3.xpose.msk.msra.mxu0 %vm754_vm1, %v1260_v9  ;;  %5761 = vmatprep.mubr.msk.f32.mxu0 %vm6986_vm0, %v6984_v4 }
 0x974   :  { %5769 = vmatprep.subr.mxu0 %v6984_v4 }
 0x976   :  { %5762 = vmatmul.mubr.msk.f32.vlgmr.msra.gmra.mxu0 %vm754_vm1, %v1258_v16 }
 0x977   :  { %5770 = vmatpush3.xpose.msk.msra.mxu0 %vm754_vm1, %v711_v2  ;;  %5771 = vmatprep.mubr.msk.f32.mxu0 %vm6986_vm0, %v6984_v4 }
 0x978   :  { %5779 = vmatprep.subr.mxu0 %v6984_v4 }
 0x97a   :  { %5772 = vmatmul.mubr.msk.f32.vlgmr.msra.gmra.mxu0 %vm754_vm1, %v7309_v6  ;;  %v1943_v6 = vpop.permute.xlu1 %1942 }
 0x97b   :  { %5780 = vmatpush3.xpose.msk.msra.mxu0 %vm754_vm1, %v1610_v59  ;;  %5781 = vmatprep.mubr.msk.f32.mxu0 %vm6986_vm0, %v6984_v4 }
 0x97c   :  { %5789 = vmatprep.subr.mxu0 %v6984_v4 }
 0x97e   :  { %5782 = vmatmul.mubr.msk.f32.vlgmr.msra.gmra.mxu0 %vm754_vm1, %v1608_v12 }
 0x97f   :  { %5790 = vmatpush3.xpose.msk.msra.mxu0 %vm754_vm1, %v1778_v17  ;;  %5791 = vmatprep.mubr.msk.f32.mxu0 %vm6986_vm0, %v6984_v4 }
 0x980   :  { %5799 = vmatprep.subr.mxu0 %v6984_v4 }
 0x982   :  { %5792 = vmatmul.mubr.msk.f32.vlgmr.msra.gmra.mxu0 %vm754_vm1, %v1776_v18 }
 0x983   :  { %5800 = vmatpush3.xpose.msk.msra.mxu0 %vm754_vm1, %v1945_v19  ;;  %5801 = vmatprep.mubr.msk.f32.mxu0 %vm6986_vm0, %v6984_v4 }
 0x984   :  { %5809 = vmatprep.subr.bf16.mxu0 %v6984_v4 }
 0x986   :  { %5802 = vmatmul.mubr.msk.f32.vlgmr.msra.gmra.mxu0 %vm754_vm1, %v1943_v6 }
 0x987   :  { %5825 = vmatprep.mubr.msk.bf16.mxu0 %vm6986_vm0, %v6984_v4 }
 0xa32   :  { %v7422_v20 = vpop.f32.mrf.mxu0 }
 0xa34   :  { %v5758_v21 = vpop.f32.mrf.mxu0 }
 0xa36   :  { %v1331_v22 = vpop.f32.mrf.mxu0 }
 0xa37   :  { %v1335_v23 = vmul.f32 0.17677669, %v1331_v22 }
 0xa38   :  { %v5763_v24 = vpop.f32.mrf.mxu0 }
 0xa39   :  { %v1336_v25 = vadd.f32 %v1335_v23, %v7333_v13 }
 0xa3a   :  { %v1513_v28 = vpop.f32.mrf.mxu0 }
 0xa3b   :  { %v1517_v29 = vmul.f32 0.17677669, %v1513_v28  ;;  %v1337_v31 = vsel %vm837_vm2, %v1336_v25, -inf }
 0xa3c   :  { %1338 = vmax.xlane.f32.xlu0 %v1337_v31  ;;  %v5773_v32 = vpop.f32.mrf.mxu0 }
 0xa3d   :  { %v1522_v33 = vadd.f32 %v7427_v26, %v1517_v29 }
 0xa3e   :  { %v1681_v34 = vpop.f32.mrf.mxu0 }
 0xa3f   :  { %v1685_v35 = vmul.f32 0.17677669, %v1681_v34  ;;  %v1523_v36 = vsel %vm837_vm2, %v1522_v33, -inf }
 0xa40   :  { %1524 = vmax.xlane.f32.xlu1 %v1523_v36  ;;  %v5783_v37 = vpop.f32.mrf.mxu0 }
 0xa41   :  { %v1686_v38 = vadd.f32 %v1685_v35, %v7427_v26 }
 0xa42   :  { %v1849_v39 = vpop.f32.mrf.mxu0 }
 0xa43   :  { %v1853_v40 = vmul.f32 0.17677669, %v1849_v39  ;;  %v1687_v11 = vsel %vm837_vm2, %v1686_v38, -inf }
 0xa44   :  { %1688 = vmax.xlane.f32.xlu0 %v1687_v11  ;;  %v5793_v41 = vpop.f32.mrf.mxu0 }
 0xa45   :  { %v1854_v42 = vadd.f32 %v1853_v40, %v7427_v26 }
 0xa46   :  { %v2016_v43 = vpop.f32.mrf.mxu0 }
 0xa47   :  { %v2020_v44 = vmul.f32 0.17677669, %v2016_v43  ;;  %v1855_v45 = vsel %vm837_vm2, %v1854_v42, -inf }
 0xa48   :  { %1856 = vmax.xlane.f32.xlu0 %v1855_v45  ;;  %v5803_v46 = vpop.f32.mrf.mxu0  ;;  %v6133_v45 = vld [vmem:[#allocation8 + $0x38] sm:$0xff]  }
 0xa49   :  { %v2021_v47 = vadd.f32 %v2020_v44, %v7427_v26  ;;  %5810 = vmatpush3.bf16.msra.mxu0 %v6133_v45  ;;  %v6147_v45 = vld [vmem:[#allocation14 + $0x50] ss:$8 sps:$4 sm:$0xff]  }
 0xa4a   :  { %5811 = vmatprep.subr.bf16.mxu0 %v6984_v4 }
 0xa4b   :  { %v2022_v49 = vsel %vm837_vm2, %v2021_v47, -inf }
 0xa4c   :  { %2023 = vmax.xlane.f32.xlu0 %v2022_v49 }
 0xac5   :  { %v1339_v52 = vpop.xlane.xlu0 %1338 }
 0xac6   :  { %v1340_v53 = vsub.f32 %v1336_v25, %v1339_v52 }
 0xac8   :  { %v1341_v56 = vmul.f32 1.442695, %v1340_v53 }
 0xac9   :  { %v1525_v60 = vpop.xlane.xlu1 %1524 }
 0xaca   :  { %6293 = vpow2.f32 %v1341_v56  ;;  %v1526_v61 = vsub.f32 %v1522_v33, %v1525_v60  ;;  %v6135_v56 = vld [vmem:[#allocation8 + $0x28] sm:$0xff]  }
 0xacc   :  { %v1527_v62 = vmul.f32 1.442695, %v1526_v61 }
 0xacd   :  { %v1689_v63 = vpop.xlane.xlu0 %1688 }
 0xace   :  { %6295 = vpow2.f32 %v1527_v62  ;;  %v1690_v0 = vsub.f32 %v1686_v38, %v1689_v63  ;;  %v6136_v63 = vld [vmem:[#allocation8 + $0x20] sm:$0xff]  }
 0xad0   :  { %v1691_v1 = vmul.f32 1.442695, %v1690_v0  ;;  %v6137_v0 = vld [vmem:[#allocation8 + $0x18] sm:$0xff]  }
 0xad1   :  { %v1857_v3 = vpop.xlane.xlu0 %1856 }
 0xad2   :  { %6297 = vpow2.f32 %v1691_v1  ;;  %v1858_v2 = vsub.f32 %v1854_v42, %v1857_v3  ;;  %v6139_v1 = vld [vmem:[#allocation8 + $0x8] sm:$0xff]  }
 0xad4   :  { %v1859_v5 = vmul.f32 1.442695, %v1858_v2 }
 0xad5   :  { %v2024_v18 = vpop.xlane.xlu0 %2023 }
 0xad6   :  { %6299 = vpow2.f32 %v1859_v5  ;;  %v2025_v19 = vsub.f32 %v2021_v47, %v2024_v18  ;;  %v6134_v47 = vld [vmem:[#allocation8 + $0x30] sm:$0xff]  }
 0xad7   :  { %v6294_v8 = vpop.eup %6293  ;;  %5812 = vmatpush3.bf16.msra.mxu0 %v6134_v47  ;;  %v6152_v47 = vld [vmem:[#allocation14 + $0x44] ss:$8 sps:$4 sm:$0xff]  }
 0xad8   :  { %v1343_v9 = vsel %vm837_vm2, %v6294_v8, 0.0  ;;  %v2026_v6 = vmul.f32 1.442695, %v2025_v19  ;;  %5813 = vmatprep.subr.bf16.mxu0 %v6984_v4 }
 0xad9   :  { %1344 = vadd.xlane.f32.xlu1 %v1343_v9 }
 0xada   :  { %6301 = vpow2.f32 %v2026_v6 }
 0xadb   :  { %v6296_v14 = vpop.eup %6295  ;;  %5814 = vmatpush3.bf16.msra.mxu0 %v6135_v56  ;;  %v6156_v56 = vld [vmem:[#allocation14 + $0x20] ss:$8 sps:$4 sm:$0xff]  }
 0xadc   :  { %v1529_v15 = vsel %vm837_vm2, %v6296_v14, 0.0  ;;  %5815 = vmatprep.subr.bf16.mxu0 %v6984_v4 }
 0xadd   :  { %1530 = vadd.xlane.f32.xlu0 %v1529_v15 }
 0xadf   :  { %v6298_v16 = vpop.eup %6297  ;;  %5816 = vmatpush3.bf16.msra.mxu0 %v6136_v63  ;;  %v6162_v63 = vld [vmem:[#allocation14] ss:$8 sps:$4 sm:$0xff]  }
 0xae0   :  { %v1693_v59 = vsel %vm837_vm2, %v6298_v16, 0.0  ;;  %5817 = vmatprep.subr.bf16.mxu0 %v6984_v4 }
 0xae1   :  { %1694 = vadd.xlane.f32.xlu1 %v1693_v59 }
 0xae3   :  { %v6300_v12 = vpop.eup %6299  ;;  %5818 = vmatpush3.bf16.msra.mxu0 %v6137_v0 }
 0xae4   :  { %v1861_v17 = vsel %vm837_vm2, %v6300_v12, 0.0  ;;  %5819 = vmatprep.subr.bf16.mxu0 %v6984_v4 }
 0xae5   :  { %1862 = vadd.xlane.f32.xlu0 %v1861_v17 }
 0xae7   :  { %v6302_v21 = vpop.eup %6301 }
 0xae8   :  { %v2028_v22 = vsel %vm837_vm2, %v6302_v21, 0.0 }
 0xaf2   :  { %1699 = vrot.lane.b32.xlu1 %v7311_v7, %s6987_s0 }
 0xaf6   :  { %1866 = vrot.lane.b32.xlu1 %v7311_v7, %s6956_s22 }
 0xafb   :  { %1348 = vrot.lane.b32.xlu0 %v7318_v10, %s6988_s29 }
 0xb1a   :  { %2029 = vadd.xlane.f32.xlu1 %v2028_v22 }
 0xb2b   :  { %2033 = vrot.lane.b32.xlu1 %v7311_v7, %s6988_s29 }
 0xb62   :  { %v1345_v23 = vpop.xlane.xlu1 %1344 }
 0xb63   :  { %6303 = vrcp.f32 %v1345_v23 }
 0xb66   :  { %v1531_v24 = vpop.xlane.xlu0 %1530 }
 0xb67   :  { %6305 = vrcp.f32 %v1531_v24 }
 0xb6a   :  { %v1695_v25 = vpop.xlane.xlu1 %1694 }
 0xb6b   :  { %6307 = vrcp.f32 %v1695_v25 }
 0xb6e   :  { %v1863_v28 = vpop.xlane.xlu0 %1862  ;;  %v1700_v34 = vpop.permute.xlu1 %1699 }
 0xb6f   :  { %6309 = vrcp.f32 %v1863_v28  ;;  %v5385_v28 = vld [vmem:[#allocation10] ss:$0 sm:$0xff] }
 0xb70   :  { %v6304_v10 = vpop.eup %6303 }
 0xb71   :  { %v1347_v29 = vmul.f32 %v6304_v10, %v6294_v8 }
 0xb72   :  { %v1349_v31 = vpop.permute.xlu0 %1348  ;;  %v1867_v38 = vpop.permute.xlu1 %1866 }
 0xb73   :  { %5765 = vmatpush3.msra.mxu1 %v1349_v31 }
 0xb74   :  { %v6306_v32 = vpop.eup %6305  ;;  %5767 = vmatmul.mubr.msk.f32.vlgmr.msra.gmra.mxu1 %vm837_vm2, %v1347_v29  ;;  %5774 = vmatprep.subr.mxu1 %v6984_v4 }
 0xb75   :  { %5775 = vmatpush3.msra.mxu1 %v7311_v7  ;;  %5776 = vmatprep.mubr.msk.f32.mxu1 %vm6986_vm0, %v6984_v4  ;;  %v1533_v33 = vmul.f32 %v6306_v32, %v6296_v14 }
 0xb76   :  { %5784 = vmatprep.subr.mxu1 %v6984_v4 }
 0xb78   :  { %v6308_v35 = vpop.eup %6307  ;;  %5777 = vmatmul.mubr.msk.f32.vlgmr.msra.gmra.mxu1 %vm837_vm2, %v1533_v33 }
 0xb79   :  { %5785 = vmatpush3.msra.mxu1 %v1700_v34  ;;  %5786 = vmatprep.mubr.msk.f32.mxu1 %vm6986_vm0, %v6984_v4  ;;  %v1697_v36 = vmul.f32 %v6308_v35, %v6298_v16 }
 0xb7a   :  { %5794 = vmatprep.subr.mxu1 %v6984_v4 }
 0xb7c   :  { %v6310_v37 = vpop.eup %6309  ;;  %5787 = vmatmul.mubr.msk.f32.vlgmr.msra.gmra.mxu1 %vm837_vm2, %v1697_v36  ;;  %v6141_v36 = vld [vmem:[#allocation14 + $0x70] ss:$8 sps:$4 sm:$0xff]  }
 0xb7d   :  { %5795 = vmatpush3.msra.mxu1 %v1867_v38  ;;  %5796 = vmatprep.mubr.msk.f32.mxu1 %vm6986_vm0, %v6984_v4  ;;  %v1865_v7 = vmul.f32 %v6310_v37, %v6300_v12  ;;  %v6143_v37 = vld [vmem:[#allocation14 + $0x74] ss:$8 sps:$4 sm:$0xff]  }
 0xb7e   :  { %5804 = vmatprep.subr.mxu1 %v6984_v4 }
 0xb80   :  { %5797 = vmatmul.mubr.msk.f32.vlgmr.msra.gmra.mxu1 %vm837_vm2, %v1865_v7 }
 0xb81   :  { %5806 = vmatprep.mubr.msk.f32.mxu1 %vm6986_vm0, %v6984_v4 }
 0xba3   :  { %v2030_v39 = vpop.xlane.xlu1 %2029 }
 0xba4   :  { %6311 = vrcp.f32 %v2030_v39 }
 0xba7   :  { %v2034_v40 = vpop.permute.xlu1 %2033 }
 0xba8   :  { %5805 = vmatpush3.msra.mxu1 %v2034_v40 }
 0xba9   :  { %2388 = vmatprep.subr.bf16.mxu1 %v6143_v37  ;;  %v2296_v37 = vld [vmem:[#allocation16] sm:$0x3] }
 0xbb1   :  { %v6312_v11 = vpop.eup %6311 }
 0xbb2   :  { %v2032_v41 = vmul.f32 %v6312_v11, %v6302_v21 }
 0xbb4   :  { %5807 = vmatmul.mubr.msk.f32.vlgmr.msra.gmra.mxu1 %vm837_vm2, %v2032_v41 }
 0xbb5   :  { %2420 = vmatprep.mubr.bf16.mxu1 %v6985_v27  ;;  %2389 = vmatpush1.bf16.msra.mxu1 %v6141_v36  ;;  %v6180_v36 = vld [vmem:[#allocation17] sm:$0xff]  }
 0xc34   :  { %v1420_v42 = vpop.f32.mrf.mxu1 }
 0xc36   :  { %v5768_v43 = vpop.f32.mrf.mxu1 }
 0xc37   :  { %v6146_v43 = vld [vmem:[#allocation14 + $0x64] ss:$8 sps:$4 sm:$0xff]  }
 0xc38   :  { %v1603_v44 = vpop.f32.mrf.mxu1  ;;  %2390 = vmatprep.subr.bf16.mxu1 %v6146_v43 }
 0xc3a   :  { %v5778_v46 = vpop.f32.mrf.mxu1 }
 0xc3b   :  { %v6150_v46 = vld [vmem:[#allocation14 + $0x40] ss:$8 sps:$4 sm:$0xff]  }
 0xc3c   :  { %v1771_v49 = vpop.f32.mrf.mxu1 }
 0xc3d   :  { %v6071_v52 = vpack.i.bf16 %v1771_v49, %v7370_v48  ;;  %v6138_v48 = vld [vmem:[#allocation8 + $0x10] sm:$0xff]   ;;  %v6155_v49 = vld [vmem:[#allocation14 + $0x34] ss:$8 sps:$4 sm:$0xff]  }
 0xc3e   :  { %v5788_v53 = vpop.f32.mrf.mxu1  ;;  %5820 = vmatpush3.bf16.msra.mxu0 %v6138_v48 }
 0xc3f   :  { %6072 = vrot.lane.b32.xlu0 %v6071_v52, %s6988_s29  ;;  %5821 = vmatprep.subr.bf16.mxu0 %v6984_v4  ;;  %v6153_v52 = vld [vmem:[#allocation14 + $0x30] ss:$8 sps:$4 sm:$0xff]   ;;  %v6158_v53 = vld [vmem:[#allocation14 + $0x24] ss:$8 sps:$4 sm:$0xff]  }
 0xc40   :  { %v1938_v60 = vpop.f32.mrf.mxu1 }
 0xc41   :  { %v6076_v61 = vpack.i.bf16 %v1938_v60, %v7422_v20  ;;  %v6140_v20 = vld [vmem:[#allocation8] sm:$0xff]  }
 0xc42   :  { %v5798_v62 = vpop.f32.mrf.mxu1  ;;  %5822 = vmatpush3.bf16.msra.mxu0 %v6139_v1  ;;  %v6161_v60 = vld [vmem:[#allocation14 + $0x14] ss:$8 sps:$4 sm:$0xff]  }
 0xc43   :  { %6077 = vrot.lane.b32.xlu1 %v6076_v61, %s6956_s22  ;;  %5823 = vmatprep.subr.bf16.mxu0 %v6984_v4  ;;  %v6159_v61 = vld [vmem:[#allocation14 + $0x10] ss:$8 sps:$4 sm:$0xff]   ;;  %v6164_v62 = vld [vmem:[#allocation14 + $0x4] ss:$8 sps:$4 sm:$0xff]  }
 0xc46   :  { %5824 = vmatpush3.bf16.msra.mxu0 %v6140_v20 }
 0xc74   :  { %v2105_v3 = vpop.f32.mrf.mxu1 }
 0xc75   :  { %v6081_v2 = vpack.i.bf16 %v2105_v3, %v1420_v42 }
 0xc76   :  { %v5808_v5 = vpop.f32.mrf.mxu1 }
 0xc77   :  { %6082 = vrot.lane.b32.xlu0 %v6081_v2, %s6987_s0 }
 0xcb1   :  { %v6073_v8 = vpop.permute.xlu0 %6072 }
 0xcb2   :  { %v6075_v14 = vunpack.i.h.bf16 %v6073_v8  ;;  %v6074_v15 = vunpack.i.l.bf16 %v6073_v8 }
 0xcb4   :  { %v2121_v17 = vsel %vm754_vm1, %v1603_v44, %v6075_v14  ;;  %v1436_v18 = vsel %vm754_vm1, %v7350_v30, %v6074_v15  ;;  %v6144_v44 = vld [vmem:[#allocation14 + $0x60] ss:$8 sps:$4 sm:$0xff]  }
 0xcb5   :  { %v6078_v9 = vpop.permute.xlu1 %6077  ;;  %2391 = vmatpush1.bf16.msra.mxu1 %v6144_v44 }
 0xcb6   :  { %v6080_v16 = vunpack.i.h.bf16 %v6078_v9  ;;  %v6079_v59 = vunpack.i.l.bf16 %v6078_v9  ;;  %v5394_v9 = vld [vmem:[#allocation11] ss:$0 sm:$0xff] }
 0xcb8   :  { %v2122_v21 = vsel %vm1437_vm3, %v2121_v17, %v6080_v16  ;;  %v1438_v22 = vsel %vm1437_vm3, %v1436_v18, %v6079_v59  ;;  %v5395_v59 = vld [vmem:[#allocation13] ss:$0 sm:$0xff] }
 0xce9   :  { %v6083_v12 = vpop.permute.xlu0 %6082 }
 0xcea   :  { %v6085_v19 = vunpack.i.h.bf16 %v6083_v12  ;;  %v6084_v6 = vunpack.i.l.bf16 %v6083_v12 }
 0xcec   :  { %v2123_v23 = vsel %vm1439_vm4, %v2122_v21, %v6085_v19  ;;  %v1440_v24 = vsel %vm1439_vm4, %v1438_v22, %v6084_v6  ;;  %v6165_v6 = vld [vmem:[#allocation17 + $0x78] sm:$0xff]   ;;  %v6167_v22 = vld [vmem:[#allocation17 + $0x70] sm:$0xff]  }
 0xced   :  { %v2124_v25 = vpack.c.bf16 %v2123_v23, %v1440_v24  ;;  %v6166_v21 = vld [vmem:[#allocation17 + $0x38] sm:$0xff]   ;;  %5595 = vmatprep.subr.bf16.mxu0 %v6165_v6  ;;  %v6168_v23 = vld [vmem:[#allocation17 + $0x30] sm:$0xff]   ;;  %v6169_v24 = vld [vmem:[#allocation17 + $0x68] sm:$0xff]  }
 0xcef   :  { %5826 = vmatmul.mubr.bf16.vlgmr.msra.gmra.mxu0 %v2124_v25  ;;  %v6170_v25 = vld [vmem:[#allocation17 + $0x28] sm:$0xff]  }
 0xcf0   :  { %5596 = vmatpush3.bf16.msra.mxu0 %v6166_v21 }
 0xcf1   :  { %5597 = vmatprep.subr.bf16.mxu0 %v6167_v22 }
 0xcf4   :  { %5598 = vmatpush3.bf16.msra.mxu0 %v6168_v23 }
 0xcf5   :  { %5599 = vmatprep.subr.bf16.mxu0 %v6169_v24 }
 0xcf8   :  { %5600 = vmatpush3.bf16.msra.mxu0 %v6170_v25 }
 0xdaf   :  { %v2230_v10 = vpop.f32.mrf.mxu0 }
 0xdb0   :  { %v2231_v29 = vadd.f32 %v5385_v28, %v2230_v10  ;;  %v6172_v10 = vld [vmem:[#allocation17 + $0x20] sm:$0xff]  }
 0xdb1   :  { %v5827_v31 = vpop.f32.mrf.mxu0 }
 0xdb2   :  { %v2237_v32 = vadd.f32 %v2231_v29, %v7281_v50  ;;  %v6173_v29 = vld [vmem:[#allocation17 + $0x58] sm:$0xff]  }
 0xdb3   :  { %v2233_v33 = vpop.f32.mrf.mxu0  ;;  %v6174_v31 = vld [vmem:[#allocation17 + $0x18] sm:$0xff]  }
 0xdb4   :  { %v2234_v30 = vadd.f32 %v5385_v28, %v2233_v33  ;;  %2241 = vadd.xlane.f32.xlu1 %v2237_v32  ;;  %v6171_v28 = vld [vmem:[#allocation17 + $0x60] sm:$0xff]   ;;  %v6176_v33 = vld [vmem:[#allocation17 + $0x10] sm:$0xff]  }
 0xdb5   :  { %v5828_v34 = vpop.f32.mrf.mxu0  ;;  %5601 = vmatprep.subr.bf16.mxu0 %v6171_v28 }
 0xdb6   :  { %v2238_v35 = vadd.f32 %v2234_v30, %v7283_v51  ;;  %v6149_v51 = vld [vmem:[#allocation14 + $0x54] ss:$8 sps:$4 sm:$0xff]   ;;  %5602 = vmatpush3.bf16.msra.mxu0 %v6172_v10  ;;  %v6177_v30 = vld [vmem:[#allocation17 + $0x48] sm:$0xff]  }
 0xdb7   :  { %2392 = vmatprep.subr.bf16.mxu1 %v6149_v51  ;;  %5603 = vmatprep.subr.bf16.mxu0 %v6173_v29  ;;  %v6178_v34 = vld [vmem:[#allocation17 + $0x8] sm:$0xff]  }
 0xdb8   :  { %2243 = vadd.xlane.f32.xlu0 %v2238_v35  ;;  %2393 = vmatpush1.bf16.msra.mxu1 %v6147_v45 }
 0xdb9   :  { %2394 = vmatprep.subr.bf16.mxu1 %v6152_v47 }
 0xdba   :  { %5604 = vmatpush3.bf16.msra.mxu0 %v6174_v31 }
 0xdbc   :  { %2395 = vmatpush1.bf16.msra.mxu1 %v6150_v46 }
 0xdbd   :  { %2396 = vmatprep.subr.bf16.mxu1 %v6155_v49 }
 0xdc0   :  { %2397 = vmatpush1.bf16.msra.mxu1 %v6153_v52 }
 0xdc1   :  { %2398 = vmatprep.subr.bf16.mxu1 %v6158_v53 }
 0xdc4   :  { %2399 = vmatpush1.bf16.msra.mxu1 %v6156_v56 }
 0xdc5   :  { %2400 = vmatprep.subr.bf16.mxu1 %v6161_v60 }
 0xdc8   :  { %2401 = vmatpush1.bf16.msra.mxu1 %v6159_v61 }
 0xdc9   :  { %2402 = vmatprep.subr.bf16.mxu1 %v6164_v62 }
 0xdcc   :  { %2403 = vmatpush1.bf16.msra.mxu1 %v6162_v63 }
 0xe3d   :  { %v2242_v38 = vpop.xlane.xlu1 %2241 }
 0xe3e   :  { %v2245_v7 = vmul.f32 0.0078125, %v2242_v38  ;;  %v2301_v38 = vrot.slane %v2296_v37, %v7297_v57 }
 0xe40   :  { %v2247_v39 = vsub.f32 %v2237_v32, %v2245_v7  ;;  %v6175_v32 = vld [vmem:[#allocation17 + $0x50] sm:$0xff]   ;;  %v2305_v7 = vrot.slane %v2296_v37, %v7294_v55 }
 0xe41   :  { %v2244_v40 = vpop.xlane.xlu0 %2243  ;;  %5605 = vmatprep.subr.bf16.mxu0 %v6175_v32 }
 0xe42   :  { %v2246_v11 = vmul.f32 0.0078125, %v2244_v40  ;;  %v2249_v41 = vmul.f32 %v2247_v39, %v2247_v39  ;;  %5606 = vmatpush3.bf16.msra.mxu0 %v6176_v33 }
 0xe43   :  { %5607 = vmatprep.subr.bf16.mxu0 %v6177_v30  ;;  %v5412_v30 = vld [vmem:[#allocation19] ss:$0 sm:$0xff] }
 0xe44   :  { %v2248_v42 = vsub.f32 %v2238_v35, %v2246_v11  ;;  %2251 = vadd.xlane.f32.xlu0 %v2249_v41  ;;  %v6179_v35 = vld [vmem:[#allocation17 + $0x40] sm:$0xff]  }
 0xe46   :  { %v2250_v50 = vmul.f32 %v2248_v42, %v2248_v42  ;;  %5608 = vmatpush3.bf16.msra.mxu0 %v6178_v34 }
 0xe47   :  { %5609 = vmatprep.subr.bf16.mxu0 %v6179_v35 }
 0xe48   :  { %2253 = vadd.xlane.f32.xlu0 %v2250_v50 }
 0xe4a   :  { %5610 = vmatpush3.bf16.msra.mxu0 %v6180_v36 }
 0xe4b   :  { %5829 = vmatprep.subr.bf16.mxu0 %v6984_v4 }
 0xecd   :  { %v2252_v0 = vpop.xlane.xlu0 %2251 }
 0xece   :  { %v2255_v48 = vmul.f32 0.0078125, %v2252_v0 }
 0xed0   :  { %v2257_v1 = vadd.f32 1e-12, %v2255_v48 }
 0xed1   :  { %v2254_v20 = vpop.xlane.xlu0 %2253 }
 0xed2   :  { %6313 = vrsqrt.f32 %v2257_v1  ;;  %v2256_v3 = vmul.f32 0.0078125, %v2254_v20 }
 0xed4   :  { %v2258_v2 = vadd.f32 1e-12, %v2256_v3 }
 0xed6   :  { %6315 = vrsqrt.f32 %v2258_v2 }
 0xedf   :  { %v6314_v5 = vpop.eup %6313 }
 0xee0   :  { %v2261_v8 = vmul.f32 %v6314_v5, %v2247_v39 }
 0xee2   :  { %v2269_v16 = vmul.f32 %v5394_v9, %v2261_v8 }
 0xee3   :  { %v6316_v14 = vpop.eup %6315 }
 0xee4   :  { %v2262_v15 = vmul.f32 %v6316_v14, %v2248_v42  ;;  %v7491_v17 = vadd.f32 %v5395_v59, %v2269_v16 }
 0xee6   :  { %v2270_v12 = vmul.f32 %v5394_v9, %v2262_v15 }
 0xee8   :  { %v7493_v18 = vadd.f32 %v5395_v59, %v2270_v12 }
 0xeea   :  { %v2279_v19 = vpack.c.bf16 %v7493_v18, %v7491_v17 }
 0xeec   :  { %2421 = vmatmul.mubr.bf16.vlgmr.msra.gmra.mxu1 %v2279_v19 }
 0xeed   :  { %2897 = vmatprep.mubr.bf16.mxu1 %v6985_v27 }
 0xfac   :  { %v2422_v39 = vpop.f32.mrf.mxu1 }
 0xfad   :  { %v2423_v40 = vadd.f32 %v2422_v39, %v2301_v38 }
 0xfae   :  { %v2424_v11 = vpop.f32.mrf.mxu1 }
 0xfaf   :  { %v2431_v41 = vmul.f32 %v2423_v40, %v2423_v40  ;;  %v2425_v42 = vadd.f32 %v2424_v11, %v2305_v7 }
 0xfb0   :  { %v2426_v50 = vpop.f32.mrf.mxu1 }
 0xfb1   :  { %v2435_v43 = vmul.f32 %v2431_v41, %v2423_v40  ;;  %v2432_v44 = vmul.f32 %v2425_v42, %v2425_v42  ;;  %v2427_v51 = vadd.f32 %v2426_v50, %v2301_v38  ;;  %v6181_v41 = vld [vmem:[#allocation23 + $0xa8] ss:$12 sps:$4 sm:$0xff]   ;;  %v6184_v50 = vld [vmem:[#allocation23 + $0xb0] ss:$12 sps:$4 sm:$0xff]  }
 0xfb2   :  { %v2428_v45 = vpop.f32.mrf.mxu1 }
 0xfb3   :  { %v2439_v46 = vmul.f32 0.044715, %v2435_v43  ;;  %v2436_v47 = vmul.f32 %v2432_v44, %v2425_v42  ;;  %v2433_v49 = vmul.f32 %v2427_v51, %v2427_v51  ;;  %v2429_v52 = vadd.f32 %v2428_v45, %v2305_v7 }
 0xfb5   :  { %v2443_v53 = vadd.f32 %v2439_v46, %v2423_v40  ;;  %v2440_v56 = vmul.f32 0.044715, %v2436_v47  ;;  %v2437_v60 = vmul.f32 %v2433_v49, %v2427_v51  ;;  %v2434_v61 = vmul.f32 %v2429_v52, %v2429_v52  ;;  %v6187_v49 = vld [vmem:[#allocation23 + $0x94] ss:$12 sps:$4 sm:$0xff]  }
 0xfb7   :  { %v2447_v62 = vmul.f32 0.7978846, %v2443_v53  ;;  %v2444_v63 = vadd.f32 %v2440_v56, %v2425_v42  ;;  %v2441_v0 = vmul.f32 0.044715, %v2437_v60  ;;  %v2438_v48 = vmul.f32 %v2434_v61, %v2429_v52  ;;  %v6188_v53 = vld [vmem:[#allocation23 + $0x98] ss:$12 sps:$4 sm:$0xff]  }
 0xfb8   :  { %v6191_v56 = vld [vmem:[#allocation23 + $0x7c] ss:$12 sps:$4 sm:$0xff]   ;;  %v6189_v60 = vld [vmem:[#allocation23 + $0x78] ss:$12 sps:$4 sm:$0xff]   ;;  %v6192_v61 = vld [vmem:[#allocation23 + $0x80] ss:$12 sps:$4 sm:$0xff]  }
 0xfb9   :  { %v2448_v1 = vmul.f32 0.7978846, %v2444_v63  ;;  %v2445_v20 = vadd.f32 %v2441_v0, %v2427_v51  ;;  %v2442_v3 = vmul.f32 0.044715, %v2438_v48  ;;  %6317 = vtanh.f32 %v2447_v62  ;;  %v6193_v62 = vld [vmem:[#allocation23 + $0x60] ss:$12 sps:$4 sm:$0xff]  }
 0xfba   :  { %v6195_v63 = vld [vmem:[#allocation23 + $0x64] ss:$12 sps:$4 sm:$0xff]   ;;  %v6196_v0 = vld [vmem:[#allocation23 + $0x68] ss:$12 sps:$4 sm:$0xff]   ;;  %v6199_v48 = vld [vmem:[#allocation23 + $0x4c] ss:$12 sps:$4 sm:$0xff]  }
 0xfbb   :  { %6319 = vtanh.f32 %v2448_v1  ;;  %v2449_v2 = vmul.f32 0.7978846, %v2445_v20  ;;  %v2446_v5 = vadd.f32 %v2442_v3, %v2429_v52  ;;  %v6197_v1 = vld [vmem:[#allocation23 + $0x48] ss:$12 sps:$4 sm:$0xff]   ;;  %v6200_v20 = vld [vmem:[#allocation23 + $0x50] ss:$12 sps:$4 sm:$0xff]  }
 0xfbc   :  { %v6203_v3 = vld [vmem:[#allocation23 + $0x34] ss:$12 sps:$4 sm:$0xff]  }
 0xfbd   :  { %6321 = vtanh.f32 %v2449_v2  ;;  %v2450_v8 = vmul.f32 0.7978846, %v2446_v5  ;;  %v6201_v2 = vld [vmem:[#allocation23 + $0x30] ss:$12 sps:$4 sm:$0xff]   ;;  %v6204_v5 = vld [vmem:[#allocation23 + $0x38] ss:$12 sps:$4 sm:$0xff]  }
 0xfbf   :  { %6323 = vtanh.f32 %v2450_v8  ;;  %v6207_v8 = vld [vmem:[#allocation23 + $0x1c] ss:$12 sps:$4 sm:$0xff]  }
 0xfc6   :  { %v6318_v9 = vpop.eup %6317 }
 0xfc7   :  { %v2455_v59 = vadd.f32 1.0, %v6318_v9  ;;  %v6205_v9 = vld [vmem:[#allocation23 + $0x18] ss:$12 sps:$4 sm:$0xff]  }
 0xfc8   :  { %v6320_v14 = vpop.eup %6319 }
 0xfc9   :  { %v2456_v15 = vadd.f32 1.0, %v6320_v14  ;;  %v2459_v23 = vmul.f32 0.5, %v2455_v59  ;;  %v6208_v14 = vld [vmem:[#allocation23 + $0x20] ss:$12 sps:$4 sm:$0xff]   ;;  %v6212_v59 = vld [vmem:[#allocation23 + $0x8] ss:$12 sps:$4 sm:$0xff]  }
 0xfca   :  { %v6322_v16 = vpop.eup %6321 }
 0xfcb   :  { %v2457_v12 = vadd.f32 1.0, %v6322_v16  ;;  %v2460_v22 = vmul.f32 0.5, %v2456_v15  ;;  %v2463_v29 = vmul.f32 %v2459_v23, %v2423_v40  ;;  %v6211_v15 = vld [vmem:[#allocation23 + $0x4] ss:$12 sps:$4 sm:$0xff]   ;;  %v6209_v16 = vld [vmem:[#allocation23] ss:$12 sps:$4 sm:$0xff]  }
 0xfcc   :  { %v6324_v19 = vpop.eup %6323 }
 0xfcd   :  { %v2461_v6 = vmul.f32 0.5, %v2457_v12  ;;  %v2458_v21 = vadd.f32 1.0, %v6324_v19  ;;  %v2464_v28 = vmul.f32 %v2460_v22, %v2425_v42  ;;  %v6183_v42 = vld [vmem:[#allocation23 + $0xac] ss:$12 sps:$4 sm:$0xff]  }
 0xfce   :  { %2865 = vmatprep.subr.bf16.mxu1 %v6183_v42 }
 0xfcf   :  { %v2462_v24 = vmul.f32 0.5, %v2458_v21  ;;  %v2465_v25 = vmul.f32 %v2461_v6, %v2427_v51  ;;  %2866 = vmatpush1.bf16.msra.mxu1 %v6181_v41 }
 0xfd0   :  { %2867 = vmatprep.subr.bf16.mxu1 %v6187_v49 }
 0xfd1   :  { %v2466_v10 = vmul.f32 %v2462_v24, %v2429_v52  ;;  %v2467_v32 = vpack.c.bf16 %v2465_v25, %v2463_v29  ;;  %v6185_v52 = vld [vmem:[#allocation23 + $0x90] ss:$12 sps:$4 sm:$0xff]  }
 0xfd3   :  { %v2468_v31 = vpack.c.bf16 %v2466_v10, %v2464_v28  ;;  %2868 = vmatpush1.bf16.msra.mxu1 %v6185_v52  ;;  %v5429_v28 = vld [vmem:[#allocation20] ss:$0 sm:$0xff] }
 0xfd4   :  { %2869 = vmatprep.subr.bf16.mxu1 %v6191_v56 }
 0xfd5   :  { %2636 = vmatprep.mubr.bf16.mxu0 %v2468_v31 }
 0xfd6   :  { %2637 = vmatmul.mubr.bf16.vlgmr.msra.gmra.mxu0 %v2467_v32  ;;  %v5430_v32 = vld [vmem:[#allocation22] ss:$0 sm:$0xff] }
 0xfd7   :  { %5845 = vmatprep.mubr.msk.bf16.mxu0 %vm6986_vm0, %v6984_v4  ;;  %5830 = vmatpush3.bf16.msra.mxu0 %v6184_v50 }
 0xfd8   :  { %5831 = vmatprep.subr.bf16.mxu0 %v6984_v4  ;;  %2870 = vmatpush1.bf16.msra.mxu1 %v6189_v60 }
 0xfd9   :  { %2871 = vmatprep.subr.bf16.mxu1 %v6195_v63 }
 0xfdb   :  { %5832 = vmatpush3.bf16.msra.mxu0 %v6188_v53 }
 0xfdc   :  { %5833 = vmatprep.subr.bf16.mxu0 %v6984_v4  ;;  %2872 = vmatpush1.bf16.msra.mxu1 %v6193_v62 }
 0xfdd   :  { %2873 = vmatprep.subr.bf16.mxu1 %v6199_v48 }
 0xfdf   :  { %5834 = vmatpush3.bf16.msra.mxu0 %v6192_v61 }
 0xfe0   :  { %5835 = vmatprep.subr.bf16.mxu0 %v6984_v4  ;;  %2874 = vmatpush1.bf16.msra.mxu1 %v6197_v1 }
 0xfe1   :  { %2875 = vmatprep.subr.bf16.mxu1 %v6203_v3 }
 0xfe3   :  { %5836 = vmatpush3.bf16.msra.mxu0 %v6196_v0 }
 0xfe4   :  { %5837 = vmatprep.subr.bf16.mxu0 %v6984_v4  ;;  %2876 = vmatpush1.bf16.msra.mxu1 %v6201_v2 }
 0xfe5   :  { %2877 = vmatprep.subr.bf16.mxu1 %v6207_v8 }
 0xfe7   :  { %5838 = vmatpush3.bf16.msra.mxu0 %v6200_v20 }
 0xfe8   :  { %5839 = vmatprep.subr.bf16.mxu0 %v6984_v4  ;;  %2878 = vmatpush1.bf16.msra.mxu1 %v6205_v9 }
 0xfe9   :  { %2879 = vmatprep.subr.bf16.mxu1 %v6211_v15 }
 0xfeb   :  { %5840 = vmatpush3.bf16.msra.mxu0 %v6204_v5 }
 0xfec   :  { %5841 = vmatprep.subr.bf16.mxu0 %v6984_v4  ;;  %2880 = vmatpush1.bf16.msra.mxu1 %v6209_v16 }
 0xfed   :  { %5849 = vmatprep.subr.mxu1 %v6984_v4 }
 0xfef   :  { %5842 = vmatpush3.bf16.msra.mxu0 %v6208_v14 }
 0xff0   :  { %5843 = vmatprep.subr.bf16.mxu0 %v6984_v4 }
 0xff3   :  { %5844 = vmatpush3.bf16.msra.mxu0 %v6212_v59 }
 0xff4   :  { %5889 = vmatprep.subr.mxu0 %v6984_v4 }
0x1096   :  { %v5611_v33 = vpop.f32.mrf.mxu0 }
0x1098   :  { %v5612_v34 = vpop.f32.mrf.mxu0 }
0x1099   :  { %v5613_v35 = vadd.f32 %v5612_v34, %v5611_v33 }
0x109a   :  { %v5614_v36 = vpop.f32.mrf.mxu0 }
0x109b   :  { %v2639_v37 = vadd.f32 %v5613_v35, %v5412_v30 }
0x109c   :  { %v5615_v38 = vpop.f32.mrf.mxu0 }
0x109d   :  { %v5616_v7 = vadd.f32 %v5615_v38, %v5614_v36  ;;  %v2645_v39 = vadd.f32 %v2639_v37, %v7491_v17  ;;  %v2720_v36 = vld [vmem:[%s7808_s27] sm:$0x7] }
0x109e   :  { %v2729_v37 = vrot.slane %v2720_v36, %v7294_v55  ;;  %v2733_v41 = vrot.slane %v2720_v36, %v537_v58 }
0x109f   :  { %v2642_v11 = vadd.f32 %v5616_v7, %v5412_v30  ;;  %2649 = vadd.xlane.f32.xlu1 %v2645_v39 }
0x10a1   :  { %v2646_v40 = vadd.f32 %v2642_v11, %v7493_v18 }
0x10a3   :  { %2651 = vadd.xlane.f32.xlu0 %v2646_v40 }
0x1128   :  { %v2650_v43 = vpop.xlane.xlu1 %2649 }
0x1129   :  { %v2653_v44 = vmul.f32 0.0078125, %v2650_v43 }
0x112b   :  { %v7506_v51 = vsub.f32 %v2645_v39, %v2653_v44  ;;  %v2725_v39 = vrot.slane %v2720_v36, %v7297_v57 }
0x112c   :  { %v2652_v45 = vpop.xlane.xlu0 %2651 }
0x112d   :  { %v2654_v46 = vmul.f32 0.0078125, %v2652_v45  ;;  %v2657_v17 = vmul.f32 %v7506_v51, %v7506_v51 }
0x112f   :  { %v7510_v47 = vsub.f32 %v2646_v40, %v2654_v46  ;;  %2659 = vadd.xlane.f32.xlu1 %v2657_v17 }
0x1131   :  { %v2658_v18 = vmul.f32 %v7510_v47, %v7510_v47 }
0x1133   :  { %2661 = vadd.xlane.f32.xlu0 %v2658_v18 }
0x11b8   :  { %v2660_v12 = vpop.xlane.xlu1 %2659 }
0x11b9   :  { %v2663_v19 = vmul.f32 0.0078125, %v2660_v12 }
0x11bb   :  { %v2665_v6 = vadd.f32 1e-12, %v2663_v19 }
0x11bc   :  { %v2662_v21 = vpop.xlane.xlu0 %2661 }
0x11bd   :  { %6325 = vrsqrt.f32 %v2665_v6  ;;  %v2664_v22 = vmul.f32 0.0078125, %v2662_v21 }
0x11bf   :  { %v2666_v23 = vadd.f32 1e-12, %v2664_v22 }
0x11c1   :  { %6327 = vrsqrt.f32 %v2666_v23 }
0x11ca   :  { %v6326_v24 = vpop.eup %6325 }
0x11cb   :  { %v2669_v25 = vmul.f32 %v6326_v24, %v7506_v51 }
0x11cd   :  { %v2677_v31 = vmul.f32 %v5429_v28, %v2669_v25 }
0x11ce   :  { %v6328_v10 = vpop.eup %6327 }
0x11cf   :  { %v2670_v29 = vmul.f32 %v6328_v10, %v7510_v47  ;;  %v7524_v30 = vadd.f32 %v5430_v32, %v2677_v31 }
0x11d1   :  { %v2678_v33 = vmul.f32 %v5429_v28, %v2670_v29 }
0x11d3   :  { %v7526_v34 = vadd.f32 %v5430_v32, %v2678_v33 }
0x11d5   :  { %v2687_v35 = vpack.c.bf16 %v7526_v34, %v7524_v30 }
0x11d7   :  { %2898 = vmatmul.mubr.bf16.vlgmr.msra.gmra.mxu1 %v2687_v35  ;;  %5846 = vmatmul.mubr.bf16.vlgmr.msra.gmra.mxu0 %v2687_v35 }
0x11d8   :  { %5851 = vmatprep.mubr.msk.f32.mxu1 %vm6986_vm0, %v6984_v4  ;;  %5891 = vmatprep.mubr.msk.f32.mxu0 %vm6986_vm0, %v6984_v4 }
0x1297   :  { %v2899_v38 = vpop.f32.mrf.mxu1  ;;  %v2942_v7 = vpop.f32.mrf.mxu0 }
0x1298   :  { %v7545_v51 = vadd.f32 %v2899_v38, %v2725_v39  ;;  %v7548_v17 = vadd.f32 %v2942_v7, %v2733_v41 }
0x1299   :  { %v2901_v11 = vpop.f32.mrf.mxu1  ;;  %v5847_v40 = vpop.f32.mrf.mxu0 }
0x129a   :  { %v7539_v42 = vadd.f32 %v2901_v11, %v2729_v37 }
0x129b   :  { %v2903_v50 = vpop.f32.mrf.mxu1  ;;  %v2945_v43 = vpop.f32.mrf.mxu0 }
0x129c   :  { %v7541_v44 = vadd.f32 %v2945_v43, %v2733_v41  ;;  %5850 = vmatpush3.xpose.msk.msra.mxu1 %vm754_vm1, %v7539_v42  ;;  %v7557_v54 = vadd.f32 %v2903_v50, %v2725_v39 }
0x129d   :  { %v2905_v45 = vpop.f32.mrf.mxu1  ;;  %v5848_v46 = vpop.f32.mrf.mxu0  ;;  %5854 = vmatprep.subr.mxu1 %v6984_v4 }
0x129e   :  { %v7550_v47 = vadd.f32 %v2905_v45, %v2729_v37 }
0x129f   :  { %5852 = vmatmul.mubr.msk.f32.vlgmr.msra.gmra.mxu1 %vm754_vm1, %v7545_v51 }
0x12a0   :  { %5855 = vmatpush3.msra.mxu1 %v7548_v17  ;;  %5890 = vmatpush3.xpose.msk.msra.mxu0 %vm754_vm1, %v7550_v47 }
0x12a1   :  { %5856 = vmatprep.mubr.msk.f32.mxu1 %vm6986_vm0, %v6984_v4  ;;  %5859 = vmatprep.subr.mxu1 %v6984_v4 }
0x12a2   :  { %5899 = vmatprep.subr.mxu0 %v6984_v4 }
0x12a3   :  { %5892 = vmatmul.mubr.msk.f32.vlgmr.msra.gmra.mxu0 %vm754_vm1, %v7557_v54 }
0x12a4   :  { %5901 = vmatprep.mubr.msk.f32.mxu0 %vm6986_vm0, %v6984_v4 }
0x135f   :  { %v3021_v58 = vpop.f32.mrf.mxu1 }
0x1360   :  { %v3025_v18 = vmul.f32 0.17677669, %v3021_v58 }
0x1361   :  { %v5853_v49 = vpop.f32.mrf.mxu1 }
0x1362   :  { %v3026_v52 = vadd.f32 %v3025_v18, %v7333_v13 }
0x1363   :  { %v7568_v53 = vpop.f32.mrf.mxu0 }
0x1364   :  { %v3027_v56 = vsel %vm837_vm2, %v3026_v52, -inf  ;;  %v3704_v45 = vmul.f32 0.17677669, %v7568_v53 }
0x1365   :  { %v5893_v60 = vpop.f32.mrf.mxu0  ;;  %3028 = vmax.xlane.f32.xlu1 %v3027_v56 }
0x1366   :  { %v3705_v46 = vadd.f32 %v3704_v45, %v7427_v26 }
0x1376   :  { %3113 = vrot.lane.b32.xlu1 %v7539_v42, %s6987_s0 }
0x13ee   :  { %v3029_v61 = vpop.xlane.xlu1 %3028 }
0x13ef   :  { %v3030_v62 = vsub.f32 %v3026_v52, %v3029_v61 }
0x13f1   :  { %v3031_v63 = vmul.f32 1.442695, %v3030_v62 }
0x13f2   :  { %v3114_v2 = vpop.permute.xlu1 %3113 }
0x13f3   :  { %6329 = vpow2.f32 %v3031_v63 }
0x1400   :  { %v6330_v0 = vpop.eup %6329 }
0x1401   :  { %v3033_v48 = vsel %vm837_vm2, %v6330_v0, 0.0 }
0x1402   :  { %3034 = vadd.xlane.f32.xlu0 %v3033_v48 }
0x1418   :  { %3111 = vrot.lane.b32.xlu0 %v7545_v51, %s6987_s0 }
0x148b   :  { %v3035_v1 = vpop.xlane.xlu0 %3034 }
0x148c   :  { %6331 = vrcp.f32 %v3035_v1 }
0x148f   :  { %v3112_v5 = vpop.permute.xlu0 %3111 }
0x1499   :  { %v6332_v20 = vpop.eup %6331 }
0x149a   :  { %v3037_v3 = vmul.f32 %v6332_v20, %v6330_v0 }
0x149c   :  { %5857 = vmatmul.mubr.msk.f32.vlgmr.msra.gmra.mxu1 %vm837_vm2, %v3037_v3 }
0x149d   :  { %5860 = vmatpush3.xpose.msk.msra.mxu1 %vm754_vm1, %v3114_v2  ;;  %5861 = vmatprep.mubr.msk.f32.mxu1 %vm6986_vm0, %v6984_v4 }
0x149e   :  { %5864 = vmatprep.subr.mxu1 %v6984_v4 }
0x14a0   :  { %5862 = vmatmul.mubr.msk.f32.vlgmr.msra.gmra.mxu1 %vm754_vm1, %v3112_v5 }
0x14a1   :  { %5866 = vmatprep.mubr.msk.f32.mxu1 %vm6986_vm0, %v6984_v4 }
0x155c   :  { %v7584_v8 = vpop.f32.mrf.mxu1 }
0x155e   :  { %v5858_v9 = vpop.f32.mrf.mxu1 }
0x1560   :  { %v3185_v14 = vpop.f32.mrf.mxu1 }
0x1561   :  { %v3189_v15 = vmul.f32 0.17677669, %v3185_v14 }
0x1562   :  { %v5863_v16 = vpop.f32.mrf.mxu1 }
0x1563   :  { %v3190_v59 = vadd.f32 %v3189_v15, %v7333_v13 }
0x1565   :  { %v3191_v12 = vsel %vm837_vm2, %v3190_v59, -inf }
0x1566   :  { %3192 = vmax.xlane.f32.xlu1 %v3191_v12 }
0x1577   :  { %3203 = vrot.lane.b32.xlu1 %v7548_v17, %s6987_s0 }
0x157b   :  { %3279 = vrot.lane.b32.xlu1 %v7545_v51, %s6956_s22 }
0x15ef   :  { %v3193_v19 = vpop.xlane.xlu1 %3192 }
0x15f0   :  { %v3194_v6 = vsub.f32 %v3190_v59, %v3193_v19 }
0x15f2   :  { %v3195_v21 = vmul.f32 1.442695, %v3194_v6 }
0x15f3   :  { %v3204_v22 = vpop.permute.xlu1 %3203 }
0x15f4   :  { %6333 = vpow2.f32 %v3195_v21  ;;  %5865 = vmatpush3.msra.mxu1 %v3204_v22 }
0x15f5   :  { %5869 = vmatprep.subr.mxu1 %v6984_v4 }
0x15f7   :  { %v3280_v31 = vpop.permute.xlu1 %3279 }
0x1601   :  { %v6334_v23 = vpop.eup %6333 }
0x1602   :  { %v3197_v24 = vsel %vm837_vm2, %v6334_v23, 0.0 }
0x1603   :  { %3198 = vadd.xlane.f32.xlu0 %v3197_v24 }
0x1619   :  { %3281 = vrot.lane.b32.xlu0 %v7539_v42, %s6956_s22 }
0x168c   :  { %v3199_v25 = vpop.xlane.xlu0 %3198 }
0x168d   :  { %6335 = vrcp.f32 %v3199_v25 }
0x1690   :  { %v3282_v29 = vpop.permute.xlu0 %3281 }
0x169a   :  { %v6336_v28 = vpop.eup %6335 }
0x169b   :  { %v3201_v10 = vmul.f32 %v6336_v28, %v6334_v23 }
0x169d   :  { %5867 = vmatmul.mubr.msk.f32.vlgmr.msra.gmra.mxu1 %vm837_vm2, %v3201_v10 }
0x169e   :  { %5870 = vmatpush3.xpose.msk.msra.mxu1 %vm754_vm1, %v3282_v29  ;;  %5871 = vmatprep.mubr.msk.f32.mxu1 %vm6986_vm0, %v6984_v4 }
0x169f   :  { %5874 = vmatprep.subr.mxu1 %v6984_v4 }
0x16a1   :  { %5872 = vmatmul.mubr.msk.f32.vlgmr.msra.gmra.mxu1 %vm754_vm1, %v3280_v31 }
0x16a2   :  { %5876 = vmatprep.mubr.msk.f32.mxu1 %vm6986_vm0, %v6984_v4 }
0x175d   :  { %v7604_v32 = vpop.f32.mrf.mxu1 }
0x175f   :  { %v5868_v33 = vpop.f32.mrf.mxu1 }
0x1761   :  { %v3353_v35 = vpop.f32.mrf.mxu1 }
0x1762   :  { %v3357_v36 = vmul.f32 0.17677669, %v3353_v35 }
0x1763   :  { %v5873_v37 = vpop.f32.mrf.mxu1 }
0x1764   :  { %v3358_v38 = vadd.f32 %v3357_v36, %v7333_v13 }
0x1766   :  { %v3359_v7 = vsel %vm837_vm2, %v3358_v38, -inf }
0x1767   :  { %3360 = vmax.xlane.f32.xlu1 %v3359_v7 }
0x1778   :  { %3448 = vrot.lane.b32.xlu1 %v7539_v42, %s6988_s29 }
0x177c   :  { %3446 = vrot.lane.b32.xlu1 %v7545_v51, %s6988_s29 }
0x1780   :  { %3792 = vrot.lane.b32.xlu1 %v7550_v47, %s6987_s0 }
0x1784   :  { %3960 = vrot.lane.b32.xlu1 %v7550_v47, %s6956_s22 }
0x1788   :  { %4127 = vrot.lane.b32.xlu1 %v7550_v47, %s6988_s29  ;;  %v3706_v47 = vsel %vm837_vm2, %v3705_v46, -inf }
0x17f0   :  { %v3361_v39 = vpop.xlane.xlu1 %3360 }
0x17f1   :  { %v3362_v11 = vsub.f32 %v3358_v38, %v3361_v39 }
0x17f3   :  { %v3363_v40 = vmul.f32 1.442695, %v3362_v11 }
0x17f4   :  { %v3449_v41 = vpop.permute.xlu1 %3448 }
0x17f5   :  { %6337 = vpow2.f32 %v3363_v40 }
0x17f8   :  { %v3447_v50 = vpop.permute.xlu1 %3446 }
0x17fc   :  { %v3793_v43 = vpop.permute.xlu1 %3792 }
0x17fd   :  { %5900 = vmatpush3.xpose.msk.msra.mxu0 %vm754_vm1, %v3793_v43 }
0x17fe   :  { %5909 = vmatprep.subr.mxu0 %v6984_v4 }
0x1800   :  { %v3961_v49 = vpop.permute.xlu1 %3960 }
0x1802   :  { %v6338_v42 = vpop.eup %6337 }
0x1803   :  { %v3365_v51 = vsel %vm837_vm2, %v6338_v42, 0.0 }
0x1804   :  { %3366 = vadd.xlane.f32.xlu0 %v3365_v51  ;;  %v4128_v53 = vpop.permute.xlu1 %4127 }
0x181a   :  { %3370 = vrot.lane.b32.xlu0 %v7548_v17, %s6956_s22 }
0x181e   :  { %3790 = vrot.lane.b32.xlu0 %v7557_v54, %s6987_s0 }
0x1822   :  { %3958 = vrot.lane.b32.xlu0 %v7557_v54, %s6956_s22 }
0x1826   :  { %4125 = vrot.lane.b32.xlu0 %v7557_v54, %s6988_s29 }
0x1845   :  { %3707 = vmax.xlane.f32.xlu0 %v3706_v47 }
0x188d   :  { %v3367_v58 = vpop.xlane.xlu0 %3366 }
0x188e   :  { %6339 = vrcp.f32 %v3367_v58 }
0x1891   :  { %v3371_v18 = vpop.permute.xlu0 %3370 }
0x1892   :  { %5875 = vmatpush3.msra.mxu1 %v3371_v18 }
0x1893   :  { %5879 = vmatprep.subr.mxu1 %v6984_v4 }
0x1895   :  { %v3791_v52 = vpop.permute.xlu0 %3790 }
0x1896   :  { %5902 = vmatmul.mubr.msk.f32.vlgmr.msra.gmra.mxu0 %vm754_vm1, %v3791_v52 }
0x1897   :  { %5910 = vmatpush3.xpose.msk.msra.mxu0 %vm754_vm1, %v3961_v49  ;;  %5911 = vmatprep.mubr.msk.f32.mxu0 %vm6986_vm0, %v6984_v4 }
0x1898   :  { %5919 = vmatprep.subr.mxu0 %v6984_v4 }
0x1899   :  { %v3959_v54 = vpop.permute.xlu0 %3958 }
0x189a   :  { %5912 = vmatmul.mubr.msk.f32.vlgmr.msra.gmra.mxu0 %vm754_vm1, %v3959_v54 }
0x189b   :  { %v6340_v56 = vpop.eup %6339  ;;  %5920 = vmatpush3.xpose.msk.msra.mxu0 %vm754_vm1, %v4128_v53  ;;  %5921 = vmatprep.mubr.msk.f32.mxu0 %vm6986_vm0, %v6984_v4 }
0x189c   :  { %v3369_v60 = vmul.f32 %v6340_v56, %v6338_v42  ;;  %5929 = vmatprep.subr.bf16.mxu0 %v6984_v4 }
0x189d   :  { %v4126_v61 = vpop.permute.xlu0 %4125 }
0x189e   :  { %5877 = vmatmul.mubr.msk.f32.vlgmr.msra.gmra.mxu1 %vm837_vm2, %v3369_v60  ;;  %5922 = vmatmul.mubr.msk.f32.vlgmr.msra.gmra.mxu0 %vm754_vm1, %v4126_v61 }
0x189f   :  { %5880 = vmatpush3.xpose.msk.msra.mxu1 %vm754_vm1, %v3449_v41  ;;  %5881 = vmatprep.mubr.msk.f32.mxu1 %vm6986_vm0, %v6984_v4 }
0x18a0   :  { %5884 = vmatprep.subr.mxu1 %v6984_v4  ;;  %5945 = vmatprep.mubr.msk.bf16.mxu0 %vm6986_vm0, %v6984_v4 }
0x18a2   :  { %5882 = vmatmul.mubr.msk.f32.vlgmr.msra.gmra.mxu1 %vm754_vm1, %v3447_v50 }
0x18a3   :  { %5886 = vmatprep.mubr.msk.f32.mxu1 %vm6986_vm0, %v6984_v4 }
0x18ce   :  { %v3708_v62 = vpop.xlane.xlu0 %3707 }
0x18cf   :  { %v3709_v0 = vsub.f32 %v3705_v46, %v3708_v62 }
0x18d1   :  { %v3710_v2 = vmul.f32 1.442695, %v3709_v0 }
0x18d3   :  { %6341 = vpow2.f32 %v3710_v2 }
0x18e0   :  { %v6342_v31 = vpop.eup %6341 }
0x18e1   :  { %v3712_v33 = vsel %vm837_vm2, %v6342_v31, 0.0 }
0x1956   :  { %v3864_v63 = vpop.f32.mrf.mxu0 }
0x1957   :  { %v3868_v48 = vmul.f32 0.17677669, %v3864_v63 }
0x1958   :  { %v5903_v1 = vpop.f32.mrf.mxu0 }
0x1959   :  { %v3869_v20 = vadd.f32 %v3868_v48, %v7427_v26 }
0x195a   :  { %v4032_v3 = vpop.f32.mrf.mxu0 }
0x195b   :  { %v4036_v5 = vmul.f32 0.17677669, %v4032_v3  ;;  %v3870_v9 = vsel %vm837_vm2, %v3869_v20, -inf }
0x195c   :  { %3871 = vmax.xlane.f32.xlu0 %v3870_v9  ;;  %v5913_v14 = vpop.f32.mrf.mxu0 }
0x195d   :  { %v4037_v15 = vadd.f32 %v4036_v5, %v7427_v26  ;;  %v6213_v14 = vld [vmem:[%s7809_s16 + $0x38] sm:$0xff]  }
0x195e   :  { %v7657_v16 = vpop.f32.mrf.mxu1  ;;  %v4199_v59 = vpop.f32.mrf.mxu0  ;;  %5930 = vmatpush3.bf16.msra.mxu0 %v6213_v14  ;;  %v6232_v14 = vld [vmem:[#allocation28 + $0x44] ss:$8 sps:$4 sm:$0xff]  }
0x195f   :  { %v4038_v12 = vsel %vm837_vm2, %v4037_v15, -inf  ;;  %v4203_v22 = vmul.f32 0.17677669, %v4199_v59  ;;  %5931 = vmatprep.subr.bf16.mxu0 %v6984_v4  ;;  %v6215_v59 = vld [vmem:[%s7809_s16 + $0x28] sm:$0xff]  }
0x1960   :  { %4039 = vmax.xlane.f32.xlu0 %v4038_v12  ;;  %v5878_v19 = vpop.f32.mrf.mxu1  ;;  %v5923_v6 = vpop.f32.mrf.mxu0  ;;  %v6216_v12 = vld [vmem:[%s7809_s16 + $0x20] sm:$0xff]  }
0x1961   :  { %v4204_v10 = vadd.f32 %v4203_v22, %v7427_v26  ;;  %v6217_v19 = vld [vmem:[%s7809_s16 + $0x18] sm:$0xff]   ;;  %v6219_v22 = vld [vmem:[%s7809_s16 + $0x8] sm:$0xff]  }
0x1962   :  { %v3520_v21 = vpop.f32.mrf.mxu1 }
0x1963   :  { %v3524_v23 = vmul.f32 0.17677669, %v3520_v21  ;;  %v4205_v29 = vsel %vm837_vm2, %v4204_v10, -inf }
0x1964   :  { %v5883_v24 = vpop.f32.mrf.mxu1 }
0x1965   :  { %v3525_v25 = vadd.f32 %v3524_v23, %v7333_v13 }
0x1967   :  { %v3526_v28 = vsel %vm837_vm2, %v3525_v25, -inf }
0x1968   :  { %3527 = vmax.xlane.f32.xlu1 %v3526_v28 }
0x196c   :  { %4206 = vmax.xlane.f32.xlu1 %v4205_v29 }
0x1970   :  { %3713 = vadd.xlane.f32.xlu1 %v3712_v33 }
0x19e5   :  { %v3872_v35 = vpop.xlane.xlu0 %3871 }
0x19e6   :  { %v3873_v36 = vsub.f32 %v3869_v20, %v3872_v35 }
0x19e8   :  { %v3874_v37 = vmul.f32 1.442695, %v3873_v36 }
0x19e9   :  { %v4040_v38 = vpop.xlane.xlu0 %4039 }
0x19ea   :  { %6343 = vpow2.f32 %v3874_v37  ;;  %v4041_v7 = vsub.f32 %v4037_v15, %v4040_v38  ;;  %v6214_v15 = vld [vmem:[%s7809_s16 + $0x30] sm:$0xff]  }
0x19eb   :  { %5932 = vmatpush3.bf16.msra.mxu0 %v6214_v15  ;;  %v6235_v15 = vld [vmem:[#allocation28 + $0x34] ss:$8 sps:$4 sm:$0xff]  }
0x19ec   :  { %v4042_v39 = vmul.f32 1.442695, %v4041_v7  ;;  %5933 = vmatprep.subr.bf16.mxu0 %v6984_v4 }
0x19ee   :  { %6345 = vpow2.f32 %v4042_v39 }
0x19ef   :  { %5934 = vmatpush3.bf16.msra.mxu0 %v6215_v59  ;;  %v6233_v59 = vld [vmem:[#allocation28 + $0x30] ss:$8 sps:$4 sm:$0xff]  }
0x19f0   :  { %5935 = vmatprep.subr.bf16.mxu0 %v6984_v4 }
0x19f1   :  { %v3528_v13 = vpop.xlane.xlu1 %3527 }
0x19f2   :  { %v3529_v11 = vsub.f32 %v3525_v25, %v3528_v13  ;;  %v6220_v25 = vld [vmem:[%s7809_s16] sm:$0xff]  }
0x19f3   :  { %5936 = vmatpush3.bf16.msra.mxu0 %v6216_v12  ;;  %v6238_v12 = vld [vmem:[#allocation28 + $0x24] ss:$8 sps:$4 sm:$0xff]  }
0x19f4   :  { %v3530_v40 = vmul.f32 1.442695, %v3529_v11  ;;  %5937 = vmatprep.subr.bf16.mxu0 %v6984_v4 }
0x19f5   :  { %v4207_v26 = vpop.xlane.xlu1 %4206 }
0x19f6   :  { %6347 = vpow2.f32 %v3530_v40  ;;  %v4208_v41 = vsub.f32 %v4204_v10, %v4207_v26 }
0x19f7   :  { %v6344_v50 = vpop.eup %6343  ;;  %5938 = vmatpush3.bf16.msra.mxu0 %v6217_v19  ;;  %v6236_v19 = vld [vmem:[#allocation28 + $0x20] ss:$8 sps:$4 sm:$0xff]  }
0x19f8   :  { %v4209_v43 = vmul.f32 1.442695, %v4208_v41  ;;  %v3876_v42 = vsel %vm837_vm2, %v6344_v50, 0.0  ;;  %5939 = vmatprep.subr.bf16.mxu0 %v6984_v4 }
0x19f9   :  { %3877 = vadd.xlane.f32.xlu0 %v3876_v42  ;;  %v3714_v49 = vpop.xlane.xlu1 %3713 }
0x19fa   :  { %6349 = vpow2.f32 %v4209_v43 }
0x19fb   :  { %v6346_v51 = vpop.eup %6345 }
0x19fc   :  { %v4044_v45 = vsel %vm837_vm2, %v6346_v51, 0.0 }
0x19fd   :  { %4045 = vadd.xlane.f32.xlu1 %v4044_v45 }
0x1a03   :  { %v6348_v46 = vpop.eup %6347 }
0x1a04   :  { %v3532_v47 = vsel %vm837_vm2, %v6348_v46, 0.0 }
0x1a05   :  { %3533 = vadd.xlane.f32.xlu0 %v3532_v47 }
0x1a07   :  { %v6350_v58 = vpop.eup %6349 }
0x1a08   :  { %v4211_v18 = vsel %vm837_vm2, %v6350_v58, 0.0 }
0x1a09   :  { %4212 = vadd.xlane.f32.xlu0 %v4211_v18 }
0x1a0e   :  { %3537 = vrot.lane.b32.xlu1 %v7548_v17, %s6988_s29 }
0x1a12   :  { %4049 = vrot.lane.b32.xlu1 %v7541_v44, %s6956_s22 }
0x1a16   :  { %4216 = vrot.lane.b32.xlu1 %v7541_v44, %s6988_s29 }
0x1a1f   :  { %3882 = vrot.lane.b32.xlu0 %v7541_v44, %s6987_s0 }
0x1a82   :  { %v3878_v54 = vpop.xlane.xlu0 %3877 }
0x1a86   :  { %v4046_v52 = vpop.xlane.xlu1 %4045 }
0x1a8a   :  { %v3538_v53 = vpop.permute.xlu1 %3537 }
0x1a8b   :  { %5885 = vmatpush3.msra.mxu1 %v3538_v53 }
0x1a8c   :  { %5894 = vmatprep.subr.mxu1 %v6984_v4 }
0x1a8e   :  { %v3534_v56 = vpop.xlane.xlu0 %3533  ;;  %v4050_v1 = vpop.permute.xlu1 %4049 }
0x1a8f   :  { %6351 = vrcp.f32 %v3534_v56 }
0x1a90   :  { %6353 = vrcp.f32 %v3714_v49 }
0x1a91   :  { %6355 = vrcp.f32 %v3878_v54 }
0x1a92   :  { %6357 = vrcp.f32 %v4046_v52  ;;  %v4213_v17 = vpop.xlane.xlu0 %4212  ;;  %v4217_v5 = vpop.permute.xlu1 %4216 }
0x1a93   :  { %6359 = vrcp.f32 %v4213_v17 }
0x1a96   :  { %v3883_v48 = vpop.permute.xlu0 %3882 }
0x1a9c   :  { %v6352_v60 = vpop.eup %6351 }
0x1a9d   :  { %v3536_v61 = vmul.f32 %v6352_v60, %v6348_v46  ;;  %v6354_v62 = vpop.eup %6353  ;;  %v6221_v60 = vld [vmem:[#allocation28 + $0x70] ss:$8 sps:$4 sm:$0xff]  }
0x1a9e   :  { %v3716_v63 = vmul.f32 %v6354_v62, %v6342_v31  ;;  %v6356_v0 = vpop.eup %6355 }
0x1a9f   :  { %5887 = vmatmul.mubr.msk.f32.vlgmr.msra.gmra.mxu1 %vm837_vm2, %v3536_v61  ;;  %v3880_v20 = vmul.f32 %v6356_v0, %v6344_v50  ;;  %v6223_v61 = vld [vmem:[#allocation28 + $0x74] ss:$8 sps:$4 sm:$0xff]  }
0x1aa0   :  { %5895 = vmatpush3.msra.mxu1 %v7541_v44  ;;  %5896 = vmatprep.mubr.msk.f32.mxu1 %vm6986_vm0, %v6984_v4  ;;  %v6358_v44 = vpop.eup %6357 }
0x1aa1   :  { %5904 = vmatprep.subr.mxu1 %v6984_v4  ;;  %v4048_v3 = vmul.f32 %v6358_v44, %v6346_v51  ;;  %v6360_v2 = vpop.eup %6359 }
0x1aa2   :  { %v4215_v9 = vmul.f32 %v6360_v2, %v6350_v58  ;;  %v5479_v58 = vld [vmem:[#allocation25] ss:$0 sm:$0xff]  ;;  %v6224_v2 = vld [vmem:[#allocation28 + $0x60] ss:$8 sps:$4 sm:$0xff]  }
0x1aa3   :  { %5897 = vmatmul.mubr.msk.f32.vlgmr.msra.gmra.mxu1 %vm837_vm2, %v3716_v63 }
0x1aa4   :  { %5905 = vmatpush3.msra.mxu1 %v3883_v48  ;;  %5906 = vmatprep.mubr.msk.f32.mxu1 %vm6986_vm0, %v6984_v4 }
0x1aa5   :  { %5914 = vmatprep.subr.mxu1 %v6984_v4 }
0x1aa7   :  { %5907 = vmatmul.mubr.msk.f32.vlgmr.msra.gmra.mxu1 %vm837_vm2, %v3880_v20 }
0x1aa8   :  { %5915 = vmatpush3.msra.mxu1 %v4050_v1  ;;  %5916 = vmatprep.mubr.msk.f32.mxu1 %vm6986_vm0, %v6984_v4 }
0x1aa9   :  { %5924 = vmatprep.subr.mxu1 %v6984_v4 }
0x1aab   :  { %5917 = vmatmul.mubr.msk.f32.vlgmr.msra.gmra.mxu1 %vm837_vm2, %v4048_v3  ;;  %v6226_v3 = vld [vmem:[#allocation28 + $0x64] ss:$8 sps:$4 sm:$0xff]  }
0x1aac   :  { %5925 = vmatpush3.msra.mxu1 %v4217_v5  ;;  %5926 = vmatprep.mubr.msk.f32.mxu1 %vm6986_vm0, %v6984_v4  ;;  %v6227_v5 = vld [vmem:[#allocation28 + $0x50] ss:$8 sps:$4 sm:$0xff]  }
0x1aad   :  { %4571 = vmatprep.subr.bf16.mxu1 %v6223_v61 }
0x1aaf   :  { %5927 = vmatmul.mubr.msk.f32.vlgmr.msra.gmra.mxu1 %vm837_vm2, %v4215_v9  ;;  %v6230_v9 = vld [vmem:[#allocation28 + $0x40] ss:$8 sps:$4 sm:$0xff]  }
0x1ab0   :  { %4603 = vmatprep.mubr.bf16.mxu1 %v6985_v27  ;;  %v6218_v27 = vld [vmem:[%s7809_s16 + $0x10] sm:$0xff]   ;;  %4572 = vmatpush1.bf16.msra.mxu1 %v6221_v60 }
0x1ab1   :  { %5940 = vmatpush3.bf16.msra.mxu0 %v6218_v27  ;;  %4573 = vmatprep.subr.bf16.mxu1 %v6226_v3  ;;  %v6241_v27 = vld [vmem:[#allocation28 + $0x14] ss:$8 sps:$4 sm:$0xff]  }
0x1ab2   :  { %5941 = vmatprep.subr.bf16.mxu0 %v6984_v4 }
0x1ab4   :  { %4574 = vmatpush1.bf16.msra.mxu1 %v6224_v2 }
0x1ab5   :  { %5942 = vmatpush3.bf16.msra.mxu0 %v6219_v22  ;;  %v6242_v22 = vld [vmem:[#allocation28] ss:$8 sps:$4 sm:$0xff]  }
0x1ab6   :  { %5943 = vmatprep.subr.bf16.mxu0 %v6984_v4 }
0x1ab9   :  { %5944 = vmatpush3.bf16.msra.mxu0 %v6220_v25 }
0x1b5f   :  { %v3609_v6 = vpop.f32.mrf.mxu1 }
0x1b61   :  { %v5888_v21 = vpop.f32.mrf.mxu1 }
0x1b62   :  { %v6244_v21 = vld [vmem:[#allocation28 + $0x4] ss:$8 sps:$4 sm:$0xff]  }
0x1b63   :  { %v3786_v23 = vpop.f32.mrf.mxu1 }
0x1b65   :  { %v5898_v24 = vpop.f32.mrf.mxu1 }
0x1b67   :  { %v3954_v28 = vpop.f32.mrf.mxu1 }
0x1b68   :  { %v6086_v10 = vpack.i.bf16 %v3954_v28, %v7604_v32 }
0x1b69   :  { %v5908_v29 = vpop.f32.mrf.mxu1 }
0x1b6a   :  { %6087 = vrot.lane.b32.xlu1 %v6086_v10, %s6988_s29 }
0x1b6b   :  { %v4121_v31 = vpop.f32.mrf.mxu1 }
0x1b6c   :  { %v6091_v33 = vpack.i.bf16 %v4121_v31, %v7657_v16 }
0x1b6d   :  { %v5918_v35 = vpop.f32.mrf.mxu1 }
0x1b6e   :  { %6092 = vrot.lane.b32.xlu0 %v6091_v33, %s6956_s22  ;;  %s7810_s22 = sld [smem:[#allocation67_spill]]  ;;  %v5488_v35 = vld [vmem:[#allocation26] ss:$0 sm:$0xff] }
0x1b6f   :  { %v4288_v36 = vpop.f32.mrf.mxu1 }
0x1b70   :  { %v6096_v37 = vpack.i.bf16 %v4288_v36, %v3609_v6  ;;  %v6239_v6 = vld [vmem:[#allocation28 + $0x10] ss:$8 sps:$4 sm:$0xff]  }
0x1b71   :  { %v5928_v38 = vpop.f32.mrf.mxu1 }
0x1b72   :  { %6097 = vrot.lane.b32.xlu1 %v6096_v37, %s6987_s0 }
0x1bdc   :  { %v6088_v7 = vpop.permute.xlu1 %6087 }
0x1bdd   :  { %v6090_v13 = vunpack.i.h.bf16 %v6088_v7  ;;  %v6089_v11 = vunpack.i.l.bf16 %v6088_v7  ;;  %v5489_v7 = vld [vmem:[%s7810_s22] ss:$0 sm:$0xff] }
0x1bdf   :  { %v4304_v41 = vsel %vm754_vm1, %v3786_v23, %v6090_v13  ;;  %v3625_v16 = vsel %vm754_vm1, %v7584_v8, %v6089_v11 }
0x1be0   :  { %v6093_v39 = vpop.permute.xlu0 %6092 }
0x1be1   :  { %v6095_v32 = vunpack.i.h.bf16 %v6093_v39  ;;  %v6094_v40 = vunpack.i.l.bf16 %v6093_v39 }
0x1be3   :  { %v4305_v42 = vsel %vm1437_vm3, %v4304_v41, %v6095_v32  ;;  %v3626_v51 = vsel %vm1437_vm3, %v3625_v16, %v6094_v40  ;;  %v6245_v40 = vld [vmem:[#allocation29 + $0x78] sm:$0xff]   ;;  %v6247_v41 = vld [vmem:[#allocation29 + $0x70] sm:$0xff]  }
0x1be4   :  { %v6098_v26 = vpop.permute.xlu1 %6097  ;;  %5667 = vmatprep.subr.bf16.mxu0 %v6245_v40  ;;  %v6248_v16 = vld [vmem:[#allocation29 + $0x30] sm:$0xff]  }
0x1be5   :  { %v6100_v50 = vunpack.i.h.bf16 %v6098_v26  ;;  %v6099_v43 = vunpack.i.l.bf16 %v6098_v26  ;;  %v6246_v26 = vld [vmem:[#allocation29 + $0x38] sm:$0xff]  }
0x1be7   :  { %v4306_v45 = vsel %vm1439_vm4, %v4305_v42, %v6100_v50  ;;  %v3627_v46 = vsel %vm1439_vm4, %v3626_v51, %v6099_v43  ;;  %v6249_v50 = vld [vmem:[#allocation29 + $0x68] sm:$0xff]   ;;  %v6251_v42 = vld [vmem:[#allocation29 + $0x60] sm:$0xff]  }
0x1be8   :  { %v4307_v47 = vpack.c.bf16 %v4306_v45, %v3627_v46  ;;  %v6250_v43 = vld [vmem:[#allocation29 + $0x28] sm:$0xff]   ;;  %v6252_v51 = vld [vmem:[#allocation29 + $0x20] sm:$0xff]   ;;  %v6253_v45 = vld [vmem:[#allocation29 + $0x58] sm:$0xff]  }
0x1be9   :  { %v6254_v46 = vld [vmem:[#allocation29 + $0x18] sm:$0xff]  }
0x1bea   :  { %5946 = vmatmul.mubr.bf16.vlgmr.msra.gmra.mxu0 %v4307_v47  ;;  %v6255_v47 = vld [vmem:[#allocation29 + $0x50] sm:$0xff]  }
0x1beb   :  { %5668 = vmatpush3.bf16.msra.mxu0 %v6246_v26 }
0x1bec   :  { %5669 = vmatprep.subr.bf16.mxu0 %v6247_v41 }
0x1bef   :  { %5670 = vmatpush3.bf16.msra.mxu0 %v6248_v16 }
0x1bf0   :  { %5671 = vmatprep.subr.bf16.mxu0 %v6249_v50 }
0x1bf3   :  { %5672 = vmatpush3.bf16.msra.mxu0 %v6250_v43 }
0x1bf4   :  { %5673 = vmatprep.subr.bf16.mxu0 %v6251_v42 }
0x1bf7   :  { %5674 = vmatpush3.bf16.msra.mxu0 %v6252_v51  ;;  %v5506_v51 = vld [vmem:[%s7812_s17] ss:$0 sm:$0xff] }
0x1bf8   :  { %5675 = vmatprep.subr.bf16.mxu0 %v6253_v45 }
0x1bfb   :  { %5676 = vmatpush3.bf16.msra.mxu0 %v6254_v46 }
0x1bfc   :  { %5677 = vmatprep.subr.bf16.mxu0 %v6255_v47 }
0x1caa   :  { %v4413_v18 = vpop.f32.mrf.mxu0 }
0x1cab   :  { %v4414_v49 = vadd.f32 %v5479_v58, %v4413_v18  ;;  %v6257_v18 = vld [vmem:[#allocation29 + $0x48] sm:$0xff]  }
0x1cac   :  { %v5947_v52 = vpop.f32.mrf.mxu0 }
0x1cad   :  { %v4420_v54 = vadd.f32 %v4414_v49, %v7524_v30  ;;  %v6258_v49 = vld [vmem:[#allocation29 + $0x8] sm:$0xff]   ;;  %v6259_v52 = vld [vmem:[#allocation29 + $0x40] sm:$0xff]  }
0x1cae   :  { %v4416_v53 = vpop.f32.mrf.mxu0 }
0x1caf   :  { %v4417_v8 = vadd.f32 %v5479_v58, %v4416_v53  ;;  %4424 = vadd.xlane.f32.xlu0 %v4420_v54  ;;  %v6256_v58 = vld [vmem:[#allocation29 + $0x10] sm:$0xff]   ;;  %v4479_v53 = vld [vmem:[%s7811_s18] sm:$0x3] }
0x1cb0   :  { %v5948_v56 = vpop.f32.mrf.mxu0  ;;  %5678 = vmatpush3.bf16.msra.mxu0 %v6256_v58 }
0x1cb1   :  { %v4421_v17 = vadd.f32 %v4417_v8, %v7526_v34  ;;  %v6229_v34 = vld [vmem:[#allocation28 + $0x54] ss:$8 sps:$4 sm:$0xff]   ;;  %5679 = vmatprep.subr.bf16.mxu0 %v6257_v18  ;;  %v4484_v8 = vrot.slane %v4479_v53, %v7297_v57  ;;  %v4488_v56 = vrot.slane %v4479_v53, %v7294_v55 }
0x1cb2   :  { %4575 = vmatprep.subr.bf16.mxu1 %v6229_v34 }
0x1cb3   :  { %4426 = vadd.xlane.f32.xlu1 %v4421_v17  ;;  %4576 = vmatpush1.bf16.msra.mxu1 %v6227_v5 }
0x1cb4   :  { %4577 = vmatprep.subr.bf16.mxu1 %v6232_v14  ;;  %5680 = vmatpush3.bf16.msra.mxu0 %v6258_v49 }
0x1cb5   :  { %5681 = vmatprep.subr.bf16.mxu0 %v6259_v52 }
0x1cb7   :  { %4578 = vmatpush1.bf16.msra.mxu1 %v6230_v9 }
0x1cb8   :  { %4579 = vmatprep.subr.bf16.mxu1 %v6235_v15 }
0x1cbb   :  { %4580 = vmatpush1.bf16.msra.mxu1 %v6233_v59 }
0x1cbc   :  { %4581 = vmatprep.subr.bf16.mxu1 %v6238_v12 }
0x1cbf   :  { %4582 = vmatpush1.bf16.msra.mxu1 %v6236_v19 }
0x1cc0   :  { %4583 = vmatprep.subr.bf16.mxu1 %v6241_v27 }
0x1cc3   :  { %4584 = vmatpush1.bf16.msra.mxu1 %v6239_v6 }
0x1cc4   :  { %4585 = vmatprep.subr.bf16.mxu1 %v6244_v21 }
0x1cc7   :  { %4586 = vmatpush1.bf16.msra.mxu1 %v6242_v22 }
0x1cc8   :  { %5949 = vmatprep.subr.bf16.mxu1 %v6984_v4 }
0x1d38   :  { %v4425_v62 = vpop.xlane.xlu0 %4424 }
0x1d39   :  { %v4428_v63 = vmul.f32 0.0078125, %v4425_v62 }
0x1d3b   :  { %v4430_v0 = vsub.f32 %v4420_v54, %v4428_v63  ;;  %v6260_v54 = vld [vmem:[#allocation29] sm:$0xff]  }
0x1d3c   :  { %v4427_v48 = vpop.xlane.xlu1 %4426  ;;  %5682 = vmatpush3.bf16.msra.mxu0 %v6260_v54 }
0x1d3d   :  { %v4429_v1 = vmul.f32 0.0078125, %v4427_v48  ;;  %v4432_v20 = vmul.f32 %v4430_v0, %v4430_v0  ;;  %5969 = vmatprep.subr.mxu0 %v6984_v4 }
0x1d3f   :  { %v4431_v44 = vsub.f32 %v4421_v17, %v4429_v1  ;;  %4434 = vadd.xlane.f32.xlu0 %v4432_v20 }
0x1d41   :  { %v4433_v30 = vmul.f32 %v4431_v44, %v4431_v44 }
0x1d43   :  { %4436 = vadd.xlane.f32.xlu0 %v4433_v30 }
0x1dc8   :  { %v4435_v23 = vpop.xlane.xlu0 %4434 }
0x1dc9   :  { %v4438_v24 = vmul.f32 0.0078125, %v4435_v23 }
0x1dcb   :  { %v4440_v25 = vadd.f32 1e-12, %v4438_v24 }
0x1dcc   :  { %v4437_v28 = vpop.xlane.xlu0 %4436 }
0x1dcd   :  { %6361 = vrsqrt.f32 %v4440_v25  ;;  %v4439_v10 = vmul.f32 0.0078125, %v4437_v28 }
0x1dcf   :  { %v4441_v29 = vadd.f32 1e-12, %v4439_v10 }
0x1dd1   :  { %6363 = vrsqrt.f32 %v4441_v29 }
0x1dda   :  { %v6362_v31 = vpop.eup %6361 }
0x1ddb   :  { %v4444_v33 = vmul.f32 %v6362_v31, %v4430_v0 }
0x1ddd   :  { %v4452_v38 = vmul.f32 %v5488_v35, %v4444_v33 }
0x1dde   :  { %v6364_v36 = vpop.eup %6363 }
0x1ddf   :  { %v4445_v37 = vmul.f32 %v6364_v36, %v4431_v44  ;;  %v7727_v13 = vadd.f32 %v5489_v7, %v4452_v38 }
0x1de1   :  { %v4453_v39 = vmul.f32 %v5488_v35, %v4445_v37 }
0x1de3   :  { %v7729_v11 = vadd.f32 %v5489_v7, %v4453_v39 }
0x1de5   :  { %v4462_v32 = vpack.c.bf16 %v7729_v11, %v7727_v13 }
0x1de7   :  { %4604 = vmatmul.mubr.bf16.vlgmr.msra.gmra.mxu1 %v4462_v32 }
0x1de8   :  { %5965 = vmatprep.mubr.msk.bf16.mxu1 %vm6986_vm0, %v6984_v4 }
0x1ea7   :  { %v4605_v17 = vpop.f32.mrf.mxu1 }
0x1ea8   :  { %v4606_v60 = vadd.f32 %v4605_v17, %v4484_v8 }
0x1ea9   :  { %v4607_v61 = vpop.f32.mrf.mxu1 }
0x1eaa   :  { %v4614_v62 = vmul.f32 %v4606_v60, %v4606_v60  ;;  %v4608_v63 = vadd.f32 %v4607_v61, %v4488_v56 }
0x1eab   :  { %v4609_v0 = vpop.f32.mrf.mxu1 }
0x1eac   :  { %v4618_v48 = vmul.f32 %v4614_v62, %v4606_v60  ;;  %v4615_v1 = vmul.f32 %v4608_v63, %v4608_v63  ;;  %v4610_v20 = vadd.f32 %v4609_v0, %v4484_v8  ;;  %v6261_v8 = vld [vmem:[#allocation31 + $0x38] sm:$0xff]  }
0x1ead   :  { %v4611_v44 = vpop.f32.mrf.mxu1  ;;  %5950 = vmatpush3.bf16.msra.mxu1 %v6261_v8 }
0x1eae   :  { %v4622_v30 = vmul.f32 0.044715, %v4618_v48  ;;  %v4619_v3 = vmul.f32 %v4615_v1, %v4608_v63  ;;  %v4616_v2 = vmul.f32 %v4610_v20, %v4610_v20  ;;  %v4612_v34 = vadd.f32 %v4611_v44, %v4488_v56  ;;  %5951 = vmatprep.subr.bf16.mxu1 %v6984_v4  ;;  %v6264_v1 = vld [vmem:[#allocation31 + $0x20] sm:$0xff]  }
0x1eaf   :  { %v4983_v44 = vld [vmem:[%s7813_s19] sm:$0x3] }
0x1eb0   :  { %v4626_v5 = vadd.f32 %v4622_v30, %v4606_v60  ;;  %v4623_v9 = vmul.f32 0.044715, %v4619_v3  ;;  %v4620_v14 = vmul.f32 %v4616_v2, %v4610_v20  ;;  %v4617_v15 = vmul.f32 %v4612_v34, %v4612_v34  ;;  %v6265_v30 = vld [vmem:[#allocation31 + $0x18] sm:$0xff]   ;;  %v6266_v3 = vld [vmem:[#allocation31 + $0x10] sm:$0xff]   ;;  %v6267_v2 = vld [vmem:[#allocation31 + $0x8] sm:$0xff]  }
0x1eb2   :  { %v4630_v59 = vmul.f32 0.7978846, %v4626_v5  ;;  %v4627_v12 = vadd.f32 %v4623_v9, %v4608_v63  ;;  %v4624_v19 = vmul.f32 0.044715, %v4620_v14  ;;  %v4621_v27 = vmul.f32 %v4617_v15, %v4612_v34 }
0x1eb4   :  { %v4631_v6 = vmul.f32 0.7978846, %v4627_v12  ;;  %v4628_v21 = vadd.f32 %v4624_v19, %v4610_v20  ;;  %v4625_v22 = vmul.f32 0.044715, %v4621_v27  ;;  %6365 = vtanh.f32 %v4630_v59 }
0x1eb6   :  { %6367 = vtanh.f32 %v4631_v6  ;;  %v4632_v23 = vmul.f32 0.7978846, %v4628_v21  ;;  %v4629_v24 = vadd.f32 %v4625_v22, %v4612_v34  ;;  %v5523_v6 = vld [vmem:[%s7814_s21] ss:$0 sm:$0xff] }
0x1eb8   :  { %6369 = vtanh.f32 %v4632_v23  ;;  %v4633_v25 = vmul.f32 0.7978846, %v4629_v24  ;;  %v5524_v24 = vld [vmem:[%s7815_s26] ss:$0 sm:$0xff] }
0x1eba   :  { %6371 = vtanh.f32 %v4633_v25 }
0x1ec1   :  { %v6366_v28 = vpop.eup %6365 }
0x1ec2   :  { %v4638_v33 = vadd.f32 1.0, %v6366_v28 }
0x1ec3   :  { %v6368_v10 = vpop.eup %6367 }
0x1ec4   :  { %v4639_v29 = vadd.f32 1.0, %v6368_v10  ;;  %v4642_v39 = vmul.f32 0.5, %v4638_v33  ;;  %v6270_v33 = vld [vmem:[#allocation37 + $0x30] sm:$0xff]  }
0x1ec5   :  { %v6370_v31 = vpop.eup %6369 }
0x1ec6   :  { %v4640_v35 = vadd.f32 1.0, %v6370_v31  ;;  %v4643_v7 = vmul.f32 0.5, %v4639_v29  ;;  %v4646_v16 = vmul.f32 %v4642_v39, %v4606_v60  ;;  %v6269_v29 = vld [vmem:[#allocation37 + $0x38] sm:$0xff]   ;;  %v6274_v39 = vld [vmem:[#allocation37 + $0x10] sm:$0xff]  }
0x1ec7   :  { %v6372_v36 = vpop.eup %6371 }
0x1ec8   :  { %v4644_v37 = vmul.f32 0.5, %v4640_v35  ;;  %v4641_v38 = vadd.f32 1.0, %v6372_v36  ;;  %v4647_v26 = vmul.f32 %v4643_v7, %v4608_v63  ;;  %v6271_v35 = vld [vmem:[#allocation37 + $0x28] sm:$0xff]   ;;  %v6272_v36 = vld [vmem:[#allocation37 + $0x20] sm:$0xff]  }
0x1eca   :  { %v4645_v32 = vmul.f32 0.5, %v4641_v38  ;;  %v4648_v40 = vmul.f32 %v4644_v37, %v4610_v20  ;;  %v4984_v20 = vld [vmem:[#allocation34] sm:$0xff] }
0x1ecb   :  { %v6273_v37 = vld [vmem:[#allocation37 + $0x18] sm:$0xff]  }
0x1ecc   :  { %v4649_v41 = vmul.f32 %v4645_v32, %v4612_v34  ;;  %v4650_v43 = vpack.c.bf16 %v4648_v40, %v4646_v16  ;;  %v6268_v34 = vld [vmem:[#allocation31] sm:$0xff]   ;;  %v6275_v32 = vld [vmem:[#allocation37 + $0x8] sm:$0xff]   ;;  %v6276_v40 = vld [vmem:[#allocation37] sm:$0xff]  }
0x1ece   :  { %v4651_v50 = vpack.c.bf16 %v4649_v41, %v4647_v26  ;;  %v5534_v26 = vld [vmem:[#allocation35] ss:$0 sm:$0xff] }
0x1ed0   :  { %4819 = vmatprep.mubr.bf16.mxu0 %v4651_v50  ;;  %v5525_v50 = vld [vmem:[#allocation32] ss:$0 sm:$0xff] }
0x1ed1   :  { %4820 = vmatmul.mubr.bf16.vlgmr.msra.gmra.mxu0 %v4650_v43 }
0x1ed2   :  { %5971 = vmatprep.mubr.msk.f32.mxu0 %vm6986_vm0, %v6984_v4  ;;  %5970 = vmatpush3.msra.mxu0 %v4984_v20 }
0x1ed9   :  { %5972 = vmatmul.mubr.msk.f32.vlgmr.msra.gmra.mxu0 %vm837_vm2, %v4983_v44 }
0x1f91   :  { %v5683_v42 = vpop.f32.mrf.mxu0 }
0x1f93   :  { %v5684_v45 = vpop.f32.mrf.mxu0 }
0x1f94   :  { %v5685_v46 = vadd.f32 %v5684_v45, %v5683_v42 }
0x1f95   :  { %v5686_v47 = vpop.f32.mrf.mxu0 }
0x1f96   :  { %v4822_v58 = vadd.f32 %v5685_v46, %v5506_v51 }
0x1f97   :  { %v5687_v18 = vpop.f32.mrf.mxu0 }
0x1f98   :  { %v5688_v49 = vadd.f32 %v5687_v18, %v5686_v47  ;;  %v4828_v52 = vadd.f32 %v4822_v58, %v7727_v13  ;;  %v6262_v13 = vld [vmem:[#allocation31 + $0x30] sm:$0xff]  }
0x1f99   :  { %5952 = vmatpush3.bf16.msra.mxu1 %v6262_v13  ;;  %v5061_v38 = vpop.f32.mrf.mxu0 }
0x1f9a   :  { %v4825_v54 = vadd.f32 %v5688_v49, %v5506_v51  ;;  %4832 = vadd.xlane.f32.xlu0 %v4828_v52  ;;  %5953 = vmatprep.subr.bf16.mxu1 %v6984_v4  ;;  %v5062_v41 = vadd.f32 %v5534_v26, %v5061_v38 }
0x1f9b   :  { %v5973_v7 = vpop.f32.mrf.mxu0 }
0x1f9c   :  { %v4829_v53 = vadd.f32 %v4825_v54, %v7729_v11  ;;  %v6263_v11 = vld [vmem:[#allocation31 + $0x28] sm:$0xff]   ;;  %v5065_v16 = vmax.f32 %v5062_v41, 0.0 }
0x1f9d   :  { %5954 = vmatpush3.bf16.msra.mxu1 %v6263_v11  ;;  %v5536_v54 = vld [vmem:[#allocation38] ss:$0 sm:$0xff] }
0x1f9e   :  { %4834 = vadd.xlane.f32.xlu1 %v4829_v53  ;;  %5955 = vmatprep.subr.bf16.mxu1 %v6984_v4  ;;  %v5069_v51 = vrot.slane %v5065_v16, %v7297_v57  ;;  %v5073_v45 = vrot.slane %v5065_v16, %v7294_v55 }
0x1fa1   :  { %5956 = vmatpush3.bf16.msra.mxu1 %v6264_v1 }
0x1fa2   :  { %5957 = vmatprep.subr.bf16.mxu1 %v6984_v4 }
0x1fa5   :  { %5958 = vmatpush3.bf16.msra.mxu1 %v6265_v30 }
0x1fa6   :  { %5959 = vmatprep.subr.bf16.mxu1 %v6984_v4 }
0x1fa9   :  { %5960 = vmatpush3.bf16.msra.mxu1 %v6266_v3 }
0x1faa   :  { %5961 = vmatprep.subr.bf16.mxu1 %v6984_v4 }
0x1fad   :  { %5962 = vmatpush3.bf16.msra.mxu1 %v6267_v2 }
0x1fae   :  { %5963 = vmatprep.subr.bf16.mxu1 %v6984_v4 }
0x1fb1   :  { %5964 = vmatpush3.bf16.msra.mxu1 %v6268_v34 }
0x1fb2   :  { %5974 = vmatprep.subr.bf16.mxu1 %v6984_v4 }
0x2023   :  { %v4833_v56 = vpop.xlane.xlu0 %4832 }
0x2024   :  { %v4836_v17 = vmul.f32 0.0078125, %v4833_v56 }
0x2026   :  { %v4838_v60 = vsub.f32 %v4828_v52, %v4836_v17 }
0x2027   :  { %v4835_v61 = vpop.xlane.xlu1 %4834 }
0x2028   :  { %v4837_v62 = vmul.f32 0.0078125, %v4835_v61  ;;  %v4840_v63 = vmul.f32 %v4838_v60, %v4838_v60 }
0x202a   :  { %v4839_v0 = vsub.f32 %v4829_v53, %v4837_v62  ;;  %4842 = vadd.xlane.f32.xlu0 %v4840_v63 }
0x202c   :  { %v4841_v48 = vmul.f32 %v4839_v0, %v4839_v0 }
0x202e   :  { %4844 = vadd.xlane.f32.xlu1 %v4841_v48 }
0x20b3   :  { %v4843_v5 = vpop.xlane.xlu0 %4842 }
0x20b4   :  { %v4846_v9 = vmul.f32 0.0078125, %v4843_v5 }
0x20b6   :  { %v4848_v14 = vadd.f32 1e-12, %v4846_v9 }
0x20b7   :  { %v4845_v15 = vpop.xlane.xlu1 %4844 }
0x20b8   :  { %6373 = vrsqrt.f32 %v4848_v14  ;;  %v4847_v59 = vmul.f32 0.0078125, %v4845_v15 }
0x20ba   :  { %v4849_v12 = vadd.f32 1e-12, %v4847_v59 }
0x20bc   :  { %6375 = vrsqrt.f32 %v4849_v12 }
0x20c5   :  { %v6374_v19 = vpop.eup %6373 }
0x20c6   :  { %v4852_v27 = vmul.f32 %v6374_v19, %v4838_v60 }
0x20c8   :  { %v4860_v23 = vmul.f32 %v5523_v6, %v4852_v27 }
0x20c9   :  { %v6376_v21 = vpop.eup %6375 }
0x20ca   :  { %v4853_v22 = vmul.f32 %v6376_v21, %v4839_v0  ;;  %v4868_v28 = vadd.f32 %v5524_v24, %v4860_v23 }
0x20cc   :  { %v4861_v25 = vmul.f32 %v5523_v6, %v4853_v22 }
0x20ce   :  { %v4869_v10 = vadd.f32 %v5524_v24, %v4861_v25 }
0x20d0   :  { %v4870_v31 = vpack.c.bf16 %v4869_v10, %v4868_v28 }
0x20d2   :  { %5966 = vmatmul.mubr.bf16.vlgmr.msra.gmra.mxu1 %v4870_v31 }
0x20d3   :  { %5975 = vmatpush3.bf16.msra.mxu1 %v6269_v29  ;;  %5990 = vmatprep.mubr.msk.bf16.mxu1 %vm6986_vm0, %v6984_v4 }
0x20d4   :  { %5976 = vmatprep.subr.bf16.mxu1 %v6984_v4 }
0x20d7   :  { %5977 = vmatpush3.bf16.msra.mxu1 %v6270_v33 }
0x20d8   :  { %5978 = vmatprep.subr.bf16.mxu1 %v6984_v4 }
0x20db   :  { %5979 = vmatpush3.bf16.msra.mxu1 %v6271_v35 }
0x20dc   :  { %5980 = vmatprep.subr.bf16.mxu1 %v6984_v4 }
0x20df   :  { %5981 = vmatpush3.bf16.msra.mxu1 %v6272_v36 }
0x20e0   :  { %5982 = vmatprep.subr.bf16.mxu1 %v6984_v4 }
0x20e3   :  { %5983 = vmatpush3.bf16.msra.mxu1 %v6273_v37 }
0x20e4   :  { %5984 = vmatprep.subr.bf16.mxu1 %v6984_v4 }
0x20e7   :  { %5985 = vmatpush3.bf16.msra.mxu1 %v6274_v39 }
0x20e8   :  { %5986 = vmatprep.subr.bf16.mxu1 %v6984_v4 }
0x20eb   :  { %5987 = vmatpush3.bf16.msra.mxu1 %v6275_v32 }
0x20ec   :  { %5988 = vmatprep.subr.bf16.mxu1 %v6984_v4 }
0x20ef   :  { %5989 = vmatpush3.bf16.msra.mxu1 %v6276_v40 }
0x2192   :  { %v4976_v43 = vpop.f32.mrf.mxu1 }
0x2193   :  { %v4977_v46 = vadd.f32 %v5525_v50, %v4976_v43 }
0x2194   :  { %v5967_v42 = vpop.f32.mrf.mxu1 }
0x2195   :  { %v5074_v49 = vadd.f32 %v5069_v51, %v4977_v46 }
0x2196   :  { %v4979_v47 = vpop.f32.mrf.mxu1 }
0x2197   :  { %v4980_v58 = vadd.f32 %v5525_v50, %v4979_v47 }
0x2198   :  { %v5968_v18 = vpop.f32.mrf.mxu1 }
0x2199   :  { %v5075_v4 = vadd.f32 %v5073_v45, %v4980_v58 }
0x219b   :  { %v5076_v52 = vpack.c.bf16 %v5075_v4, %v5074_v49 }
0x219d   :  { %5991 = vmatmul.mubr.bf16.vlgmr.msra.gmra.mxu1 %v5076_v52 }
0x225d   :  { %v5182_v53 = vpop.f32.mrf.mxu1 }
0x225e   :  { %v5183_v8 = vadd.f32 %v5536_v54, %v5182_v53 }
0x225f   :  { %v5992_v56 = vpop.f32.mrf.mxu1 }
0x2260   :  { %5189 = vst [vmem:[%s7180_s9] sm:$0xff] %v5183_v8  ;;  %5195 = vrot.lane.b32.xlu0 %v5183_v8, %s6989_s3 }
0x2261   :  { %v5185_v17 = vpop.f32.mrf.mxu1 }
0x2262   :  { %v5186_v57 = vadd.f32 %v5536_v54, %v5185_v17 }
0x2263   :  { %v5993_v60 = vpop.f32.mrf.mxu1 }
0x2264   :  { %5190 = vst [vmem:[%s7180_s9 + $0x8] sm:$0xff] %v5186_v57  ;;  %5197 = vrot.lane.b32.xlu1 %v5186_v57, %s6989_s3  ;;  %s7816_s9 = sld [smem:[#allocation58_spill]] }
0x226a   :  { %v5191_v27 = vld [vmem:[%s7816_s9] sm:$0xff]  ;;  %v5192_v6 = vld [vmem:[%s7816_s9 + $0x8] sm:$0xff] }
0x226b   :  { %v5241_v21 = vsub.f32 1.0, %v5191_v27  ;;  %v5242_v24 = vsub.f32 1.0, %v5192_v6 }
0x226d   :  { %v5243_v28 = vmul.f32 %v5241_v21, %v5183_v8  ;;  %v5244_v35 = vmul.f32 %v5242_v24, %v5186_v57 }
0x22d2   :  { %v5196_v55 = vpop.permute.xlu0 %5195 }
0x22d3   :  { %v5201_v61 = vmax.f32 %v5183_v8, %v5196_v55  ;;  %v5239_v23 = vmul.f32 %v5196_v55, %v5191_v27 }
0x22d5   :  { %5211 = vrot.lane.b32.xlu1 %v5201_v61, %s6990_s30  ;;  %v5203_v3 = vsub.f32 %v5183_v8, %v5201_v61  ;;  %v5245_v33 = vadd.f32 %v5243_v28, %v5239_v23 }
0x22d6   :  { %v5198_v62 = vpop.permute.xlu1 %5197 }
0x22d7   :  { %v5202_v63 = vmax.f32 %v5186_v57, %v5198_v62  ;;  %v5205_v2 = vmul.f32 1.442695, %v5203_v3  ;;  %v5240_v10 = vmul.f32 %v5198_v62, %v5192_v6 }
0x22d9   :  { %5213 = vrot.lane.b32.xlu1 %v5202_v63, %s6990_s30  ;;  %v5204_v34 = vsub.f32 %v5186_v57, %v5202_v63  ;;  %v5246_v37 = vadd.f32 %v5244_v35, %v5240_v10 }
0x22db   :  { %v5207_v5 = vmul.f32 1.442695, %v5204_v34 }
0x2347   :  { %v5212_v0 = vpop.permute.xlu1 %5211 }
0x2348   :  { %v5217_v48 = vsub.f32 %v5183_v8, %v5212_v0 }
0x234a   :  { %v5219_v13 = vmul.f32 1.442695, %v5217_v48 }
0x234b   :  { %v5214_v11 = vpop.permute.xlu1 %5213 }
0x234c   :  { %6377 = vpow2.f32 %v5219_v13  ;;  %v5218_v1 = vsub.f32 %v5186_v57, %v5214_v11 }
0x234e   :  { %v5221_v20 = vmul.f32 1.442695, %v5218_v1 }
0x2350   :  { %6379 = vpow2.f32 %v5221_v20 }
0x2351   :  { %6381 = vpow2.f32 %v5205_v2 }
0x2352   :  { %6383 = vpow2.f32 %v5207_v5 }
0x2359   :  { %v6378_v44 = vpop.eup %6377 }
0x235a   :  { %5225 = vrot.lane.b32.xlu0 %v6378_v44, %s6989_s3 }
0x235d   :  { %v6380_v30 = vpop.eup %6379 }
0x235e   :  { %5227 = vrot.lane.b32.xlu1 %v6380_v30, %s6989_s3  ;;  %v6382_v9 = vpop.eup %6381 }
0x235f   :  { %v6384_v59 = vpop.eup %6383 }
0x23cc   :  { %v5226_v14 = vpop.permute.xlu0 %5225 }
0x23cd   :  { %v5231_v15 = vadd.f32 %v6382_v9, %v5226_v14 }
0x23cf   :  { %6385 = vlog2.f32 %v5231_v15 }
0x23d0   :  { %v5228_v12 = vpop.permute.xlu1 %5227 }
0x23d1   :  { %v5232_v19 = vadd.f32 %v6384_v59, %v5228_v12 }
0x23d3   :  { %6387 = vlog2.f32 %v5232_v19 }
0x23dc   :  { %v6386_v22 = vpop.eup %6385 }
0x23dd   :  { %v5234_v25 = vmul.f32 0.6931472, %v6386_v22 }
0x23df   :  { %v5237_v29 = vadd.f32 %v5234_v25, %v5201_v61 }
0x23e0   :  { %v6388_v31 = vpop.eup %6387 }
0x23e1   :  { %v5236_v36 = vmul.f32 0.6931472, %v6388_v31  ;;  %v5247_v7 = vsub.f32 %v5237_v29, %v5245_v33 }
0x23e3   :  { %v5238_v38 = vadd.f32 %v5236_v36, %v5202_v63  ;;  %v5250_v32 = vsel %vm5249_vm5, %v5247_v7, 0.0 }
0x23e5   :  { %v5248_v39 = vsub.f32 %v5238_v38, %v5246_v37 }
0x23e7   :  { %v5251_v40 = vsel %vm5249_vm5, %v5248_v39, 0.0 }
0x23e8   :  { %v5252_v26 = vadd.f32 %v5251_v40, %v5250_v32 }
0x23ea   :  { %5253 = vadd.xlane.f32.xlu0 %v5252_v26 }
0x2473   :  { %v5254_v41 = vpop.xlane.xlu0 %5253 }
0x2474   :  { %v5255_v16 = vrot.slane %v5254_v41, 4 }
0x2476   :  { %v5256_v50 = vadd.f32 %v5255_v16, %v5254_v41 }
0x2478   :  { %v5257_v43 = vrot.slane %v5256_v50, 2 }
0x247a   :  { %v5258_v42 = vadd.f32 %v5257_v43, %v5256_v50 }
0x247c   :  { %v5259_v51 = vrot.slane %v5258_v42, 1 }
0x247e   :  { %v5260_v45 = vadd.f32 %v5259_v51, %v5258_v42 }
0x2480   :  { %5994 = vpush %v5260_v45 }
0x24b1   :  { %s5995_s1 = spop %5994 }
0x24b2   :  { %v5262_v46 = vstv %s5995_s1 }
0x24b3   :  { %v5264_v47 = vmul.f32 0.0625, %v5262_v46 }
0x24b5   :  { %5266 = vst.msk [vmem:[#allocation40] sm:$0x1] %vm5265_vm6, %v5264_v47 }
0x24b6   :  { %6880 = shalt.err (!%p6877_p12)
}
0x24b7   :  { %5278 = dma.vmem_to_hbm [thread:$0]  %s5276_s5, 16, %s7185_s24, [#allocation4]  }
0x24b8   :  { %6915 = dma.done.wait [#allocation4], 16  }
0x24b9   :  { %6916 = vsyncadd [#allocation4], 4294967280 }
0x24ba   :  { %5284 = vsyncpa [#allocation3], 1 }
0x24bb   :  { %5285 = vsyncpa [#allocation6], 1 }
0x24bc   :  { %5286 = vsyncpa [#allocation9], 1 }
0x24bd   :  { %5287 = vsyncpa [#allocation12], 1 }
0x24be   :  { %5288 = vsyncpa [#allocation15], 1 }
0x24bf   :  { %5289 = vsyncpa [#allocation18], 1 }
0x24c0   :  { %5290 = vsyncpa [#allocation21], 1 }
0x24c1   :  { %5291 = vsyncpa [#allocation24], 1 }
0x24c2   :  { %5292 = vsyncpa [#allocation27], 1 }
0x24c3   :  { %5293 = vsyncpa [#allocation30], 1 }
0x24c4   :  { %5294 = vsyncpa [#allocation33], 1 }
0x24c5   :  { %5295 = vsyncpa [#allocation36], 1 }
0x24c6   :  { %5296 = vsyncpa [#allocation39], 1 }
0x24c7   :  { %5297 = vsyncpa [#allocation4], 1 }

</bundles_post_ra>
